<compile_context>
chip_gen: v6e
topology: v6e:2x2x1
jax: 0.10.0
libtpu: 0.0.40
codegen_flags: <defaults>
</compile_context>

<pallas_src>
import math

import jax
import jax.numpy as jnp
from jax import lax
from jax.experimental import pallas as pl
from jax.experimental.pallas import tpu as pltpu

BN_EPS = 1e-5
MXU_DTYPE = jnp.bfloat16


# ----------------------------- Pallas kernels -----------------------------

def _matmul_bias_kernel(w_ref, x_ref, b_ref, o_ref):
    # (Cout, K) @ (K, TM) + b -> (Cout, TM); M (lanes) is the tiled grid axis.
    y = jnp.dot(w_ref[...], x_ref[...], preferred_element_type=jnp.float32)
    o_ref[...] = (y + b_ref[...]).astype(o_ref.dtype)


def _conv_bn_relu_kernel(w_ref, x_ref, p_ref, o_ref):
    # Fused conv(matmul) + bias, BatchNorm3d (training-mode batch stats,
    # biased variance), ReLU.  p_ref columns: [bias, gamma, beta] per channel.
    y = jnp.dot(w_ref[...], x_ref[...], preferred_element_type=jnp.float32)
    p = p_ref[...]
    y = y + p[:, 0:1]
    mean = jnp.mean(y, axis=1, keepdims=True)
    var = jnp.mean(jnp.square(y - mean), axis=1, keepdims=True)
    out = p[:, 1:2] * ((y - mean) * lax.rsqrt(var + BN_EPS)) + p[:, 2:3]
    o_ref[...] = jnp.maximum(out, 0.0).astype(o_ref.dtype)


def _conv_bn_relu_res_kernel(w_ref, x_ref, p_ref, res_ref, o_ref):
    # Same as above plus the ResBlock skip, added AFTER the ReLU to match the
    # reference `relu(bn(conv(pad(x)))) + x`.
    y = jnp.dot(w_ref[...], x_ref[...], preferred_element_type=jnp.float32)
    p = p_ref[...]
    y = y + p[:, 0:1]
    mean = jnp.mean(y, axis=1, keepdims=True)
    var = jnp.mean(jnp.square(y - mean), axis=1, keepdims=True)
    out = p[:, 1:2] * ((y - mean) * lax.rsqrt(var + BN_EPS)) + p[:, 2:3]
    out = jnp.maximum(out, 0.0) + res_ref[...].astype(jnp.float32)
    o_ref[...] = out.astype(o_ref.dtype)


def _latent_kernel(x_ref, we_ref, be_ref, wd_ref, bd_ref, o_ref):
    # Fused AE latent path: z = We @ x + be ; y = Wd @ z + bd (both 1x1 convs).
    z = jnp.dot(we_ref[...], x_ref[...], preferred_element_type=jnp.float32)
    z = z + be_ref[...]
    y = jnp.dot(wd_ref[...], z.astype(MXU_DTYPE),
                preferred_element_type=jnp.float32)
    o_ref[...] = (y + bd_ref[...]).astype(o_ref.dtype)


# ----------------------------- Pallas wrappers -----------------------------

def pallas_matmul_bias(wT, xT, b, out_dtype=MXU_DTYPE):
    # (Cout, K) @ (K, M) + b -> (Cout, M); M padded to lane multiples and
    # tiled ("parallel") so large volumes shard across TensorCores / fit VMEM.
    Cout, K = wT.shape
    M = xT.shape[1]
    TM = 512
    if M > TM:
        Mp = -(-M // TM) * TM
        if Mp != M:
            xT = jnp.pad(xT, ((0, 0), (0, Mp - M)))
    else:
        Mp, TM = M, M
    out = pl.pallas_call(
        _matmul_bias_kernel,
        out_shape=jax.ShapeDtypeStruct((Cout, Mp), out_dtype),
        grid=(Mp // TM,),
        in_specs=[
            pl.BlockSpec((Cout, K), lambda i: (0, 0)),
            pl.BlockSpec((K, TM), lambda i: (0, i)),
            pl.BlockSpec((Cout, 1), lambda i: (0, 0)),
        ],
        out_specs=pl.BlockSpec((Cout, TM), lambda i: (0, i)),
        compiler_params=pltpu.CompilerParams(
            dimension_semantics=("parallel",)),
    )(wT.astype(MXU_DTYPE), xT.astype(MXU_DTYPE),
      b.reshape(Cout, 1).astype(jnp.float32))
    return out[:, :M] if Mp != M else out


def pallas_conv_bn_relu(wT, patchesT, bn_p, res=None, out_dtype=MXU_DTYPE):
    # Fused conv + BN + ReLU (+ residual).  grid=(1,) because BN needs
    # whole-M batch statistics (see TODO at top for tiled-M variant).
    Cout, K = wT.shape
    M = patchesT.shape[1]
    args = [wT.astype(MXU_DTYPE), patchesT.astype(MXU_DTYPE),
            bn_p.astype(jnp.float32)]
    in_specs = [
        pl.BlockSpec((Cout, K), lambda i: (0, 0)),
        pl.BlockSpec((K, M), lambda i: (0, 0)),
        pl.BlockSpec((Cout, 3), lambda i: (0, 0)),
    ]
    if res is None:
        kernel = _conv_bn_relu_kernel
    else:
        kernel = _conv_bn_relu_res_kernel
        args.append(res.astype(MXU_DTYPE))
        in_specs.append(pl.BlockSpec((Cout, M), lambda i: (0, 0)))
    return pl.pallas_call(
        kernel,
        out_shape=jax.ShapeDtypeStruct((Cout, M), out_dtype),
        grid=(1,),
        in_specs=in_specs,
        out_specs=pl.BlockSpec((Cout, M), lambda i: (0, 0)),
        compiler_params=pltpu.CompilerParams(
            dimension_semantics=("arbitrary",)),
    )(*args)


def pallas_latent_fused(x2d, we, be, wd, bd, out_dtype=MXU_DTYPE):
    # x2d: (Cin, M); we: (latent, Cin); wd: (Cout, latent).
    Cin, M = x2d.shape
    L = we.shape[0]
    Cout = wd.shape[0]
    return pl.pallas_call(
        _latent_kernel,
        out_shape=jax.ShapeDtypeStruct((Cout, M), out_dtype),
        grid=(1,),
        in_specs=[
            pl.BlockSpec((Cin, M), lambda i: (0, 0)),
            pl.BlockSpec((L, Cin), lambda i: (0, 0)),
            pl.BlockSpec((L, 1), lambda i: (0, 0)),
            pl.BlockSpec((Cout, L), lambda i: (0, 0)),
            pl.BlockSpec((Cout, 1), lambda i: (0, 0)),
        ],
        out_specs=pl.BlockSpec((Cout, M), lambda i: (0, 0)),
    )(x2d.astype(MXU_DTYPE), we.astype(MXU_DTYPE),
      be.reshape(L, 1).astype(jnp.float32),
      wd.astype(MXU_DTYPE), bd.reshape(Cout, 1).astype(jnp.float32))


# ----------------------------- JAX glue -----------------------------

def periodic_padding_3d(x, pad):
    # x: (C, N, D, H, W); wrap-around padding on the three spatial dims.
    dl, dh, hl, hh, wl, wh = pad
    return jnp.pad(x, ((0, 0), (0, 0), (dl, dh), (hl, hh), (wl, wh)),
                   mode="wrap")


def im2col3d_T(xp, stride=1, k=3):
    # xp: (Cin, N, Dp, Hp, Wp) already padded.  Returns transposed patches
    # (k^3*Cin, M) with M = N*Do*Ho*Wo on lanes; rows are tap-major then
    # channel, matching w.reshape(-1, Cout).
    Cin, N, Dp, Hp, Wp = xp.shape
    Do = (Dp - k) // stride + 1
    Ho = (Hp - k) // stride + 1
    Wo = (Wp - k) // stride + 1
    rows = []
    for kd in range(k):
        for kh in range(k):
            for kw in range(k):
                sl = xp[:, :, kd:kd + stride * Do:stride,
                              kh:kh + stride * Ho:stride,
                              kw:kw + stride * Wo:stride]
                rows.append(sl.reshape(Cin, N * Do * Ho * Wo))
    return jnp.concatenate(rows, axis=0), (N, Do, Ho, Wo)


def conv_block(x, p):
    # ResBlock / plain block: periodic pad(1) -> conv3x3x3(stride) -> BN ->
    # ReLU (-> + x when inplanes == outplanes and stride == 1).
    stride = p["stride"]
    xp = periodic_padding_3d(x, (1, 1, 1, 1, 1, 1))
    patchesT, (N, Do, Ho, Wo) = im2col3d_T(xp, stride=stride)
    Cout = p["w"].shape[-1]
    wT = p["w"].reshape(-1, Cout).T                       # (Cout, 27*Cin)
    M = N * Do * Ho * Wo
    res = x.reshape(Cout, M) if p["residual"] else None
    out = pallas_conv_bn_relu(wT, patchesT, p["bn_p"], res=res)
    return out.reshape(Cout, N, Do, Ho, Wo)


def conv1x1(x, w, b, out_dtype=MXU_DTYPE):
    C = x.shape[0]
    spatial = tuple(x.shape[1:])
    out = pallas_matmul_bias(w.T, x.reshape(C, math.prod(spatial)), b,
                             out_dtype=out_dtype)
    return out.reshape((w.shape[1],) + spatial)


# Per-dim tap table for phase-split ConvTranspose(k=3, s=2, p=0) + crop:
#   even cropped positions <- w[1] @ input[m]                (start 0)
#   odd  cropped positions <- w[0] @ input[m+1] + w[2] @ input[m]  (starts 1,0)
_DIM_TAPS = {0: ((1, 0),), 1: ((0, 1), (2, 0))}


def conv_transpose3(xp, w, b, out_dtype=MXU_DTYPE):
    # xp: (Cin, N, D+1, H+1, W+1), already periodic-padded by (0,1) per dim.
    # Implements ConvTranspose3d(kernel=3, stride=2, padding=0) followed by
    # crop_tensor() as a sub-pixel (phase-split) conv: a single lane-dense
    # Pallas matmul over the 8 shifted input slabs, then an interleave.
    Cin, N, Dp, Hp, Wp = xp.shape
    D, H, W = Dp - 1, Hp - 1, Wp - 1
    Cout = w.shape[-1]
    M = N * D * H * W

    slabs = []
    for sd in (0, 1):
        for sh in (0, 1):
            for sw in (0, 1):
                slabs.append(
                    xp[:, :, sd:sd + D, sh:sh + H, sw:sw + W].reshape(Cin, M))
    patchesT = jnp.concatenate(slabs, axis=0)             # (8*Cin, M)

    w_all = jnp.zeros((8 * Cout, 8 * Cin), jnp.float32)
    for pd in (0, 1):
        for ph in (0, 1):
            for pw in (0, 1):
                pidx = pd * 4 + ph * 2 + pw
                for kd, sd in _DIM_TAPS[pd]:
                    for kh, sh in _DIM_TAPS[ph]:
                        for kw, sw in _DIM_TAPS[pw]:
                            sidx = sd * 4 + sh * 2 + sw
                            w_all = w_all.at[
                                pidx * Cout:(pidx + 1) * Cout,
                                sidx * Cin:(sidx + 1) * Cin].set(
                                    w[kd, kh, kw].T)
    b_all = jnp.tile(b, 8)                                # (8*Cout,)

    y = pallas_matmul_bias(w_all, patchesT, b_all, out_dtype=out_dtype)
    y = y.reshape(2, 2, 2, Cout, N, D, H, W)
    y = jnp.transpose(y, (3, 4, 5, 0, 6, 1, 7, 2))        # (Cout,N,D,2,H,2,W,2)
    return y.reshape(Cout, N, 2 * D, 2 * H, 2 * W)


# ----------------------------- parameters -----------------------------

def init_ae_params(key, base_filters=8, num_layers=2, blocks_per_layer=1,
                   init_dim=3, latent_dim=4):
    keys = iter(jax.random.split(key, 256))

    def conv_w(cin, cout, k=3):
        return jax.random.normal(next(keys), (k, k, k, cin, cout),
                                 jnp.float32) / jnp.sqrt(k * k * k * cin)

    def lin_w(cin, cout):
        return jax.random.normal(next(keys), (cin, cout),
                                 jnp.float32) / jnp.sqrt(cin)

    def bias(cout):
        return 0.01 * jax.random.normal(next(keys), (cout,), jnp.float32)

    def make_layer(cin, cout, blocks, stride):
        ps = []
        for _ in range(blocks):
            b = bias(cout)
            ps.append(dict(
                w=conv_w(cin, cout),
                # packed [conv bias, BN gamma, BN beta] per output channel
                bn_p=jnp.stack([b, jnp.ones((cout,), jnp.float32),
                                jnp.zeros((cout,), jnp.float32)], axis=1),
                stride=stride,
                residual=(cin == cout and stride == 1),
            ))
            cin = cout
        return ps

    params = {}
    cout = base_filters
    params["init_conv"] = make_layer(init_dim, cout, blocks_per_layer, 1)
    encoders = []
    for _ in range(num_layers):
        encoders.append(make_layer(cout, cout * 2, 1, 2))
        encoders.append(make_layer(cout * 2, cout * 2, blocks_per_layer, 1))
        cout *= 2
    params["encoders"] = encoders
    params["conv_encode"] = dict(w=lin_w(cout, latent_dim), b=bias(latent_dim))
    params["conv_decode"] = dict(w=lin_w(latent_dim, cout), b=bias(cout))
    decoders = []
    for _ in range(num_layers):
        decoders.append(dict(w=conv_w(cout, cout // 2), b=bias(cout // 2)))
        decoders.append(make_layer(cout // 2, cout // 2, blocks_per_layer, 1))
        cout //= 2
    params["decoders"] = decoders
    params["final_conv"] = dict(w=lin_w(cout, init_dim), b=bias(init_dim))
    return params


# ----------------------------- forward -----------------------------

def ae3d_forward(params, x_ncdhw):
    # NCDHW -> (C, N, D, H, W): channels on sublanes, batch*spatial flattened
    # onto lanes inside every kernel (lane-dense outputs).
    x = jnp.transpose(x_ncdhw, (1, 0, 2, 3, 4)).astype(MXU_DTYPE)

    for p in params["init_conv"]:
        x = conv_block(x, p)
    for layer in params["encoders"]:
        for p in layer:
            x = conv_block(x, p)

    # conv_encode (1x1) -> conv_decode (1x1), fused into one Pallas call.
    C = x.shape[0]
    spatial = tuple(x.shape[1:])
    M = math.prod(spatial)
    we, be = params["conv_encode"]["w"], params["conv_encode"]["b"]
    wd, bd = params["conv_decode"]["w"], params["conv_decode"]["b"]
    x = pallas_latent_fused(x.reshape(C, M), we.T, be, wd.T, bd)
    x = x.reshape((wd.shape[1],) + spatial)

    for i in range(0, len(params["decoders"]), 2):
        dec = params["decoders"][i]
        xpad = periodic_padding_3d(x, (0, 1, 0, 1, 0, 1))
        x = conv_transpose3(xpad, dec["w"], dec["b"])     # includes crop_tensor
        for p in params["decoders"][i + 1]:
            x = conv_block(x, p)

    x = conv1x1(x, params["final_conv"]["w"], params["final_conv"]["b"],
                out_dtype=jnp.float32)
    return jnp.transpose(x, (1, 0, 2, 3, 4))              # back to NCDHW


# ----------------------------- main -----------------------------

if __name__ == "__main__":
    key = jax.random.PRNGKey(0)
    pkey, xkey = jax.random.split(key)

    BASE, NUM_LAYERS, BLOCKS, INIT_DIM, LATENT = 8, 2, 1, 3, 4
    params = init_ae_params(pkey, base_filters=BASE, num_layers=NUM_LAYERS,
                            blocks_per_layer=BLOCKS, init_dim=INIT_DIM,
                            latent_dim=LATENT)

    # PyTorch-style NCDHW input: (batch=2, channels=3, 8x8x8 volume).
    x = jax.random.normal(xkey, (2, INIT_DIM, 8, 8, 8), jnp.float32)

    fwd = jax.jit(lambda inp: ae3d_forward(params, inp))
    out = fwd(x)
    jax.block_until_ready(out)

    assert out.shape == (2, INIT_DIM, 8, 8, 8), out.shape
    assert bool(jnp.all(jnp.isfinite(out)))
    print("KERNEL_OK")
</pallas_src>

<mosaic_0001>
module attributes {stable_mosaic.version = 11 : i64} {
  func.func @_conv_bn_relu_kernel(%arg0: i32, %arg1: memref<8x81xbf16, #tpu.memory_space<vmem>>, %arg2: memref<81x1024xbf16, #tpu.memory_space<vmem>>, %arg3: memref<8x3xf32, #tpu.memory_space<vmem>>, %arg4: memref<8x1024xbf16, #tpu.memory_space<vmem>>) attributes {dimension_semantics = [#tpu.dimension_semantics<arbitrary>], iteration_bounds = array<i64: 1>, scalar_prefetch = 0 : i64, scratch_operands = 0 : i64, tpu.core_type = #tpu.core_type<tc>, window_params = [{pipeline_mode = #tpu.pipeline_mode<synchronous>, transform_indices = @transform_0, window_bounds = array<i64: 8, 81>}, {pipeline_mode = #tpu.pipeline_mode<synchronous>, transform_indices = @transform_1, window_bounds = array<i64: 81, 1024>}, {pipeline_mode = #tpu.pipeline_mode<synchronous>, transform_indices = @transform_2, window_bounds = array<i64: 8, 3>}, {pipeline_mode = #tpu.pipeline_mode<synchronous>, transform_indices = @transform_3, window_bounds = array<i64: 8, 1024>}]} {
    %c0 = arith.constant 0 : index
    %c0_0 = arith.constant 0 : index
    %0 = vector.load %arg1[%c0, %c0_0] : memref<8x81xbf16, #tpu.memory_space<vmem>>, vector<8x81xbf16>
    %c0_1 = arith.constant 0 : index
    %c0_2 = arith.constant 0 : index
    %1 = vector.load %arg2[%c0_1, %c0_2] : memref<81x1024xbf16, #tpu.memory_space<vmem>>, vector<81x1024xbf16>
    %cst = arith.constant dense<0.000000e+00> : vector<8x1024xf32>
    %2 = tpu.matmul %0, %1, %cst {dimension_numbers = #tpu.dot_dimension_numbers<[1], [0], [0], [1], [0, 0, 1, 1], [], []>} : vector<8x81xbf16>, vector<81x1024xbf16>, vector<8x1024xf32> -> vector<8x1024xf32>
    %c0_3 = arith.constant 0 : index
    %c0_4 = arith.constant 0 : index
    %3 = vector.load %arg3[%c0_3, %c0_4] : memref<8x3xf32, #tpu.memory_space<vmem>>, vector<8x3xf32>
    %4 = vector.extract_strided_slice %3 {offsets = [0, 0], sizes = [8, 1], strides = [1, 1]} : vector<8x3xf32> to vector<8x1xf32>
    %5 = vector.broadcast %4 : vector<8x1xf32> to vector<8x1024xf32>
    %6 = arith.addf %2, %5 : vector<8x1024xf32>
    %cst_5 = arith.constant dense<0.000000e+00> : vector<8xf32>
    %7 = vector.multi_reduction <add>, %6, %cst_5 [1] : vector<8x1024xf32> to vector<8xf32>
    %8 = vector.shape_cast %7 : vector<8xf32> to vector<8x1xf32>
    %cst_6 = arith.constant 1.024000e+03 : f32
    %9 = vector.broadcast %cst_6 : f32 to vector<8x1xf32>
    %10 = arith.divf %8, %9 : vector<8x1xf32>
    %11 = vector.broadcast %10 : vector<8x1xf32> to vector<8x1024xf32>
    %12 = arith.subf %6, %11 : vector<8x1024xf32>
    %13 = arith.mulf %12, %12 : vector<8x1024xf32>
    %cst_7 = arith.constant dense<0.000000e+00> : vector<8xf32>
    %14 = vector.multi_reduction <add>, %13, %cst_7 [1] : vector<8x1024xf32> to vector<8xf32>
    %15 = vector.shape_cast %14 : vector<8xf32> to vector<8x1xf32>
    %cst_8 = arith.constant 1.024000e+03 : f32
    %16 = vector.broadcast %cst_8 : f32 to vector<8x1xf32>
    %17 = arith.divf %15, %16 : vector<8x1xf32>
    %18 = vector.extract_strided_slice %3 {offsets = [0, 1], sizes = [8, 1], strides = [1, 1]} : vector<8x3xf32> to vector<8x1xf32>
    %19 = vector.broadcast %10 : vector<8x1xf32> to vector<8x1024xf32>
    %20 = arith.subf %6, %19 : vector<8x1024xf32>
    %cst_9 = arith.constant 9.99999974E-6 : f32
    %21 = vector.broadcast %cst_9 : f32 to vector<8x1xf32>
    %22 = arith.addf %17, %21 : vector<8x1xf32>
    %23 = math.rsqrt %22 : vector<8x1xf32>
    %24 = vector.broadcast %23 : vector<8x1xf32> to vector<8x1024xf32>
    %25 = arith.mulf %20, %24 : vector<8x1024xf32>
    %26 = vector.broadcast %18 : vector<8x1xf32> to vector<8x1024xf32>
    %27 = arith.mulf %26, %25 : vector<8x1024xf32>
    %28 = vector.extract_strided_slice %3 {offsets = [0, 2], sizes = [8, 1], strides = [1, 1]} : vector<8x3xf32> to vector<8x1xf32>
    %29 = vector.broadcast %28 : vector<8x1xf32> to vector<8x1024xf32>
    %30 = arith.addf %27, %29 : vector<8x1024xf32>
    %cst_10 = arith.constant 0.000000e+00 : f32
    %31 = vector.broadcast %cst_10 : f32 to vector<8x1024xf32>
    %32 = arith.maximumf %30, %31 : vector<8x1024xf32>
    %33 = arith.truncf %32 : vector<8x1024xf32> to vector<8x1024xbf16>
    %c0_11 = arith.constant 0 : index
    %c0_12 = arith.constant 0 : index
    %34 = vector.load %arg4[%c0_11, %c0_12] : memref<8x1024xbf16, #tpu.memory_space<vmem>>, vector<8x1024xbf16>
    tpu.vector_store %arg4[%c0_11, %c0_12], %33 {strides = array<i32>} : memref<8x1024xbf16, #tpu.memory_space<vmem>>, vector<8x1024xbf16>,
    return
  }
  func.func @transform_0(%arg0: i32) -> (i32, i32) {
    %c0_i32 = arith.constant 0 : i32
    %c0_i32_0 = arith.constant 0 : i32
    %c0_i32_1 = arith.constant 0 : i32
    return %c0_i32, %c0_i32_0 : i32, i32
  }
  func.func @transform_1(%arg0: i32) -> (i32, i32) {
    %c0_i32 = arith.constant 0 : i32
    %c0_i32_0 = arith.constant 0 : i32
    %c0_i32_1 = arith.constant 0 : i32
    return %c0_i32, %c0_i32_0 : i32, i32
  }
  func.func @transform_2(%arg0: i32) -> (i32, i32) {
    %c0_i32 = arith.constant 0 : i32
    %c0_i32_0 = arith.constant 0 : i32
    %c0_i32_1 = arith.constant 0 : i32
    return %c0_i32, %c0_i32_0 : i32, i32
  }
  func.func @transform_3(%arg0: i32) -> (i32, i32) {
    %c0_i32 = arith.constant 0 : i32
    %c0_i32_0 = arith.constant 0 : i32
    %c0_i32_1 = arith.constant 0 : i32
    return %c0_i32, %c0_i32_0 : i32, i32
  }
}

module attributes {stable_mosaic.version = 11 : i64} {
  func.func @_conv_bn_relu_kernel(%arg0: i32, %arg1: memref<16x216xbf16, #tpu.memory_space<vmem>>, %arg2: memref<216x128xbf16, #tpu.memory_space<vmem>>, %arg3: memref<16x3xf32, #tpu.memory_space<vmem>>, %arg4: memref<16x128xbf16, #tpu.memory_space<vmem>>) attributes {dimension_semantics = [#tpu.dimension_semantics<arbitrary>], iteration_bounds = array<i64: 1>, scalar_prefetch = 0 : i64, scratch_operands = 0 : i64, tpu.core_type = #tpu.core_type<tc>, window_params = [{pipeline_mode = #tpu.pipeline_mode<synchronous>, transform_indices = @transform_0, window_bounds = array<i64: 16, 216>}, {pipeline_mode = #tpu.pipeline_mode<synchronous>, transform_indices = @transform_1, window_bounds = array<i64: 216, 128>}, {pipeline_mode = #tpu.pipeline_mode<synchronous>, transform_indices = @transform_2, window_bounds = array<i64: 16, 3>}, {pipeline_mode = #tpu.pipeline_mode<synchronous>, transform_indices = @transform_3, window_bounds = array<i64: 16, 128>}]} {
    %c0 = arith.constant 0 : index
    %c0_0 = arith.constant 0 : index
    %0 = vector.load %arg1[%c0, %c0_0] : memref<16x216xbf16, #tpu.memory_space<vmem>>, vector<16x216xbf16>
    %c0_1 = arith.constant 0 : index
    %c0_2 = arith.constant 0 : index
    %1 = vector.load %arg2[%c0_1, %c0_2] : memref<216x128xbf16, #tpu.memory_space<vmem>>, vector<216x128xbf16>
    %cst = arith.constant dense<0.000000e+00> : vector<16x128xf32>
    %2 = tpu.matmul %0, %1, %cst {dimension_numbers = #tpu.dot_dimension_numbers<[1], [0], [0], [1], [0, 0, 1, 1], [], []>} : vector<16x216xbf16>, vector<216x128xbf16>, vector<16x128xf32> -> vector<16x128xf32>
    %c0_3 = arith.constant 0 : index
    %c0_4 = arith.constant 0 : index
    %3 = vector.load %arg3[%c0_3, %c0_4] : memref<16x3xf32, #tpu.memory_space<vmem>>, vector<16x3xf32>
    %4 = vector.extract_strided_slice %3 {offsets = [0, 0], sizes = [16, 1], strides = [1, 1]} : vector<16x3xf32> to vector<16x1xf32>
    %5 = vector.broadcast %4 : vector<16x1xf32> to vector<16x128xf32>
    %6 = arith.addf %2, %5 : vector<16x128xf32>
    %cst_5 = arith.constant dense<0.000000e+00> : vector<16xf32>
    %7 = vector.multi_reduction <add>, %6, %cst_5 [1] : vector<16x128xf32> to vector<16xf32>
    %8 = vector.shape_cast %7 : vector<16xf32> to vector<16x1xf32>
    %cst_6 = arith.constant 1.280000e+02 : f32
    %9 = vector.broadcast %cst_6 : f32 to vector<16x1xf32>
    %10 = arith.divf %8, %9 : vector<16x1xf32>
    %11 = vector.broadcast %10 : vector<16x1xf32> to vector<16x128xf32>
    %12 = arith.subf %6, %11 : vector<16x128xf32>
    %13 = arith.mulf %12, %12 : vector<16x128xf32>
    %cst_7 = arith.constant dense<0.000000e+00> : vector<16xf32>
    %14 = vector.multi_reduction <add>, %13, %cst_7 [1] : vector<16x128xf32> to vector<16xf32>
    %15 = vector.shape_cast %14 : vector<16xf32> to vector<16x1xf32>
    %cst_8 = arith.constant 1.280000e+02 : f32
    %16 = vector.broadcast %cst_8 : f32 to vector<16x1xf32>
    %17 = arith.divf %15, %16 : vector<16x1xf32>
    %18 = vector.extract_strided_slice %3 {offsets = [0, 1], sizes = [16, 1], strides = [1, 1]} : vector<16x3xf32> to vector<16x1xf32>
    %19 = vector.broadcast %10 : vector<16x1xf32> to vector<16x128xf32>
    %20 = arith.subf %6, %19 : vector<16x128xf32>
    %cst_9 = arith.constant 9.99999974E-6 : f32
    %21 = vector.broadcast %cst_9 : f32 to vector<16x1xf32>
    %22 = arith.addf %17, %21 : vector<16x1xf32>
    %23 = math.rsqrt %22 : vector<16x1xf32>
    %24 = vector.broadcast %23 : vector<16x1xf32> to vector<16x128xf32>
    %25 = arith.mulf %20, %24 : vector<16x128xf32>
    %26 = vector.broadcast %18 : vector<16x1xf32> to vector<16x128xf32>
    %27 = arith.mulf %26, %25 : vector<16x128xf32>
    %28 = vector.extract_strided_slice %3 {offsets = [0, 2], sizes = [16, 1], strides = [1, 1]} : vector<16x3xf32> to vector<16x1xf32>
    %29 = vector.broadcast %28 : vector<16x1xf32> to vector<16x128xf32>
    %30 = arith.addf %27, %29 : vector<16x128xf32>
    %cst_10 = arith.constant 0.000000e+00 : f32
    %31 = vector.broadcast %cst_10 : f32 to vector<16x128xf32>
    %32 = arith.maximumf %30, %31 : vector<16x128xf32>
    %33 = arith.truncf %32 : vector<16x128xf32> to vector<16x128xbf16>
    %c0_11 = arith.constant 0 : index
    %c0_12 = arith.constant 0 : index
    %34 = vector.load %arg4[%c0_11, %c0_12] : memref<16x128xbf16, #tpu.memory_space<vmem>>, vector<16x128xbf16>
    tpu.vector_store %arg4[%c0_11, %c0_12], %33 {strides = array<i32>} : memref<16x128xbf16, #tpu.memory_space<vmem>>, vector<16x128xbf16>,
    return
  }
  func.func @transform_0(%arg0: i32) -> (i32, i32) {
    %c0_i32 = arith.constant 0 : i32
    %c0_i32_0 = arith.constant 0 : i32
    %c0_i32_1 = arith.constant 0 : i32
    return %c0_i32, %c0_i32_0 : i32, i32
  }
  func.func @transform_1(%arg0: i32) -> (i32, i32) {
    %c0_i32 = arith.constant 0 : i32
    %c0_i32_0 = arith.constant 0 : i32
    %c0_i32_1 = arith.constant 0 : i32
    return %c0_i32, %c0_i32_0 : i32, i32
  }
  func.func @transform_2(%arg0: i32) -> (i32, i32) {
    %c0_i32 = arith.constant 0 : i32
    %c0_i32_0 = arith.constant 0 : i32
    %c0_i32_1 = arith.constant 0 : i32
    return %c0_i32, %c0_i32_0 : i32, i32
  }
  func.func @transform_3(%arg0: i32) -> (i32, i32) {
    %c0_i32 = arith.constant 0 : i32
    %c0_i32_0 = arith.constant 0 : i32
    %c0_i32_1 = arith.constant 0 : i32
    return %c0_i32, %c0_i32_0 : i32, i32
  }
}

module attributes {stable_mosaic.version = 11 : i64} {
  func.func @_conv_bn_relu_res_kernel(%arg0: i32, %arg1: memref<16x432xbf16, #tpu.memory_space<vmem>>, %arg2: memref<432x128xbf16, #tpu.memory_space<vmem>>, %arg3: memref<16x3xf32, #tpu.memory_space<vmem>>, %arg4: memref<16x128xbf16, #tpu.memory_space<vmem>>, %arg5: memref<16x128xbf16, #tpu.memory_space<vmem>>) attributes {dimension_semantics = [#tpu.dimension_semantics<arbitrary>], iteration_bounds = array<i64: 1>, scalar_prefetch = 0 : i64, scratch_operands = 0 : i64, tpu.core_type = #tpu.core_type<tc>, window_params = [{pipeline_mode = #tpu.pipeline_mode<synchronous>, transform_indices = @transform_0, window_bounds = array<i64: 16, 432>}, {pipeline_mode = #tpu.pipeline_mode<synchronous>, transform_indices = @transform_1, window_bounds = array<i64: 432, 128>}, {pipeline_mode = #tpu.pipeline_mode<synchronous>, transform_indices = @transform_2, window_bounds = array<i64: 16, 3>}, {pipeline_mode = #tpu.pipeline_mode<synchronous>, transform_indices = @transform_3, window_bounds = array<i64: 16, 128>}, {pipeline_mode = #tpu.pipeline_mode<synchronous>, transform_indices = @transform_4, window_bounds = array<i64: 16, 128>}]} {
    %c0 = arith.constant 0 : index
    %c0_0 = arith.constant 0 : index
    %0 = vector.load %arg1[%c0, %c0_0] : memref<16x432xbf16, #tpu.memory_space<vmem>>, vector<16x432xbf16>
    %c0_1 = arith.constant 0 : index
    %c0_2 = arith.constant 0 : index
    %1 = vector.load %arg2[%c0_1, %c0_2] : memref<432x128xbf16, #tpu.memory_space<vmem>>, vector<432x128xbf16>
    %cst = arith.constant dense<0.000000e+00> : vector<16x128xf32>
    %2 = tpu.matmul %0, %1, %cst {dimension_numbers = #tpu.dot_dimension_numbers<[1], [0], [0], [1], [0, 0, 1, 1], [], []>} : vector<16x432xbf16>, vector<432x128xbf16>, vector<16x128xf32> -> vector<16x128xf32>
    %c0_3 = arith.constant 0 : index
    %c0_4 = arith.constant 0 : index
    %3 = vector.load %arg3[%c0_3, %c0_4] : memref<16x3xf32, #tpu.memory_space<vmem>>, vector<16x3xf32>
    %4 = vector.extract_strided_slice %3 {offsets = [0, 0], sizes = [16, 1], strides = [1, 1]} : vector<16x3xf32> to vector<16x1xf32>
    %5 = vector.broadcast %4 : vector<16x1xf32> to vector<16x128xf32>
    %6 = arith.addf %2, %5 : vector<16x128xf32>
    %cst_5 = arith.constant dense<0.000000e+00> : vector<16xf32>
    %7 = vector.multi_reduction <add>, %6, %cst_5 [1] : vector<16x128xf32> to vector<16xf32>
    %8 = vector.shape_cast %7 : vector<16xf32> to vector<16x1xf32>
    %cst_6 = arith.constant 1.280000e+02 : f32
    %9 = vector.broadcast %cst_6 : f32 to vector<16x1xf32>
    %10 = arith.divf %8, %9 : vector<16x1xf32>
    %11 = vector.broadcast %10 : vector<16x1xf32> to vector<16x128xf32>
    %12 = arith.subf %6, %11 : vector<16x128xf32>
    %13 = arith.mulf %12, %12 : vector<16x128xf32>
    %cst_7 = arith.constant dense<0.000000e+00> : vector<16xf32>
    %14 = vector.multi_reduction <add>, %13, %cst_7 [1] : vector<16x128xf32> to vector<16xf32>
    %15 = vector.shape_cast %14 : vector<16xf32> to vector<16x1xf32>
    %cst_8 = arith.constant 1.280000e+02 : f32
    %16 = vector.broadcast %cst_8 : f32 to vector<16x1xf32>
    %17 = arith.divf %15, %16 : vector<16x1xf32>
    %18 = vector.extract_strided_slice %3 {offsets = [0, 1], sizes = [16, 1], strides = [1, 1]} : vector<16x3xf32> to vector<16x1xf32>
    %19 = vector.broadcast %10 : vector<16x1xf32> to vector<16x128xf32>
    %20 = arith.subf %6, %19 : vector<16x128xf32>
    %cst_9 = arith.constant 9.99999974E-6 : f32
    %21 = vector.broadcast %cst_9 : f32 to vector<16x1xf32>
    %22 = arith.addf %17, %21 : vector<16x1xf32>
    %23 = math.rsqrt %22 : vector<16x1xf32>
    %24 = vector.broadcast %23 : vector<16x1xf32> to vector<16x128xf32>
    %25 = arith.mulf %20, %24 : vector<16x128xf32>
    %26 = vector.broadcast %18 : vector<16x1xf32> to vector<16x128xf32>
    %27 = arith.mulf %26, %25 : vector<16x128xf32>
    %28 = vector.extract_strided_slice %3 {offsets = [0, 2], sizes = [16, 1], strides = [1, 1]} : vector<16x3xf32> to vector<16x1xf32>
    %29 = vector.broadcast %28 : vector<16x1xf32> to vector<16x128xf32>
    %30 = arith.addf %27, %29 : vector<16x128xf32>
    %cst_10 = arith.constant 0.000000e+00 : f32
    %31 = vector.broadcast %cst_10 : f32 to vector<16x128xf32>
    %32 = arith.maximumf %30, %31 : vector<16x128xf32>
    %c0_11 = arith.constant 0 : index
    %c0_12 = arith.constant 0 : index
    %33 = vector.load %arg4[%c0_11, %c0_12] : memref<16x128xbf16, #tpu.memory_space<vmem>>, vector<16x128xbf16>
    %34 = arith.extf %33 : vector<16x128xbf16> to vector<16x128xf32>
    %35 = arith.addf %32, %34 : vector<16x128xf32>
    %36 = arith.truncf %35 : vector<16x128xf32> to vector<16x128xbf16>
    %c0_13 = arith.constant 0 : index
    %c0_14 = arith.constant 0 : index
    %37 = vector.load %arg5[%c0_13, %c0_14] : memref<16x128xbf16, #tpu.memory_space<vmem>>, vector<16x128xbf16>
    tpu.vector_store %arg5[%c0_13, %c0_14], %36 {strides = array<i32>} : memref<16x128xbf16, #tpu.memory_space<vmem>>, vector<16x128xbf16>,
    return
  }
  func.func @transform_0(%arg0: i32) -> (i32, i32) {
    %c0_i32 = arith.constant 0 : i32
    %c0_i32_0 = arith.constant 0 : i32
    %c0_i32_1 = arith.constant 0 : i32
    return %c0_i32, %c0_i32_0 : i32, i32
  }
  func.func @transform_1(%arg0: i32) -> (i32, i32) {
    %c0_i32 = arith.constant 0 : i32
    %c0_i32_0 = arith.constant 0 : i32
    %c0_i32_1 = arith.constant 0 : i32
    return %c0_i32, %c0_i32_0 : i32, i32
  }
  func.func @transform_2(%arg0: i32) -> (i32, i32) {
    %c0_i32 = arith.constant 0 : i32
    %c0_i32_0 = arith.constant 0 : i32
    %c0_i32_1 = arith.constant 0 : i32
    return %c0_i32, %c0_i32_0 : i32, i32
  }
  func.func @transform_3(%arg0: i32) -> (i32, i32) {
    %c0_i32 = arith.constant 0 : i32
    %c0_i32_0 = arith.constant 0 : i32
    %c0_i32_1 = arith.constant 0 : i32
    return %c0_i32, %c0_i32_0 : i32, i32
  }
  func.func @transform_4(%arg0: i32) -> (i32, i32) {
    %c0_i32 = arith.constant 0 : i32
    %c0_i32_0 = arith.constant 0 : i32
    %c0_i32_1 = arith.constant 0 : i32
    return %c0_i32, %c0_i32_0 : i32, i32
  }
}

module attributes {stable_mosaic.version = 11 : i64} {
  func.func @_conv_bn_relu_kernel(%arg0: i32, %arg1: memref<32x432xbf16, #tpu.memory_space<vmem>>, %arg2: memref<432x16xbf16, #tpu.memory_space<vmem>>, %arg3: memref<32x3xf32, #tpu.memory_space<vmem>>, %arg4: memref<32x16xbf16, #tpu.memory_space<vmem>>) attributes {dimension_semantics = [#tpu.dimension_semantics<arbitrary>], iteration_bounds = array<i64: 1>, scalar_prefetch = 0 : i64, scratch_operands = 0 : i64, tpu.core_type = #tpu.core_type<tc>, window_params = [{pipeline_mode = #tpu.pipeline_mode<synchronous>, transform_indices = @transform_0, window_bounds = array<i64: 32, 432>}, {pipeline_mode = #tpu.pipeline_mode<synchronous>, transform_indices = @transform_1, window_bounds = array<i64: 432, 16>}, {pipeline_mode = #tpu.pipeline_mode<synchronous>, transform_indices = @transform_2, window_bounds = array<i64: 32, 3>}, {pipeline_mode = #tpu.pipeline_mode<synchronous>, transform_indices = @transform_3, window_bounds = array<i64: 32, 16>}]} {
    %c0 = arith.constant 0 : index
    %c0_0 = arith.constant 0 : index
    %0 = vector.load %arg1[%c0, %c0_0] : memref<32x432xbf16, #tpu.memory_space<vmem>>, vector<32x432xbf16>
    %c0_1 = arith.constant 0 : index
    %c0_2 = arith.constant 0 : index
    %1 = vector.load %arg2[%c0_1, %c0_2] : memref<432x16xbf16, #tpu.memory_space<vmem>>, vector<432x16xbf16>
    %cst = arith.constant dense<0.000000e+00> : vector<32x16xf32>
    %2 = tpu.matmul %0, %1, %cst {dimension_numbers = #tpu.dot_dimension_numbers<[1], [0], [0], [1], [0, 0, 1, 1], [], []>} : vector<32x432xbf16>, vector<432x16xbf16>, vector<32x16xf32> -> vector<32x16xf32>
    %c0_3 = arith.constant 0 : index
    %c0_4 = arith.constant 0 : index
    %3 = vector.load %arg3[%c0_3, %c0_4] : memref<32x3xf32, #tpu.memory_space<vmem>>, vector<32x3xf32>
    %4 = vector.extract_strided_slice %3 {offsets = [0, 0], sizes = [32, 1], strides = [1, 1]} : vector<32x3xf32> to vector<32x1xf32>
    %5 = vector.broadcast %4 : vector<32x1xf32> to vector<32x16xf32>
    %6 = arith.addf %2, %5 : vector<32x16xf32>
    %cst_5 = arith.constant dense<0.000000e+00> : vector<32xf32>
    %7 = vector.multi_reduction <add>, %6, %cst_5 [1] : vector<32x16xf32> to vector<32xf32>
    %8 = vector.shape_cast %7 : vector<32xf32> to vector<32x1xf32>
    %cst_6 = arith.constant 1.600000e+01 : f32
    %9 = vector.broadcast %cst_6 : f32 to vector<32x1xf32>
    %10 = arith.divf %8, %9 : vector<32x1xf32>
    %11 = vector.broadcast %10 : vector<32x1xf32> to vector<32x16xf32>
    %12 = arith.subf %6, %11 : vector<32x16xf32>
    %13 = arith.mulf %12, %12 : vector<32x16xf32>
    %cst_7 = arith.constant dense<0.000000e+00> : vector<32xf32>
    %14 = vector.multi_reduction <add>, %13, %cst_7 [1] : vector<32x16xf32> to vector<32xf32>
    %15 = vector.shape_cast %14 : vector<32xf32> to vector<32x1xf32>
    %cst_8 = arith.constant 1.600000e+01 : f32
    %16 = vector.broadcast %cst_8 : f32 to vector<32x1xf32>
    %17 = arith.divf %15, %16 : vector<32x1xf32>
    %18 = vector.extract_strided_slice %3 {offsets = [0, 1], sizes = [32, 1], strides = [1, 1]} : vector<32x3xf32> to vector<32x1xf32>
    %19 = vector.broadcast %10 : vector<32x1xf32> to vector<32x16xf32>
    %20 = arith.subf %6, %19 : vector<32x16xf32>
    %cst_9 = arith.constant 9.99999974E-6 : f32
    %21 = vector.broadcast %cst_9 : f32 to vector<32x1xf32>
    %22 = arith.addf %17, %21 : vector<32x1xf32>
    %23 = math.rsqrt %22 : vector<32x1xf32>
    %24 = vector.broadcast %23 : vector<32x1xf32> to vector<32x16xf32>
    %25 = arith.mulf %20, %24 : vector<32x16xf32>
    %26 = vector.broadcast %18 : vector<32x1xf32> to vector<32x16xf32>
    %27 = arith.mulf %26, %25 : vector<32x16xf32>
    %28 = vector.extract_strided_slice %3 {offsets = [0, 2], sizes = [32, 1], strides = [1, 1]} : vector<32x3xf32> to vector<32x1xf32>
    %29 = vector.broadcast %28 : vector<32x1xf32> to vector<32x16xf32>
    %30 = arith.addf %27, %29 : vector<32x16xf32>
    %cst_10 = arith.constant 0.000000e+00 : f32
    %31 = vector.broadcast %cst_10 : f32 to vector<32x16xf32>
    %32 = arith.maximumf %30, %31 : vector<32x16xf32>
    %33 = arith.truncf %32 : vector<32x16xf32> to vector<32x16xbf16>
    %c0_11 = arith.constant 0 : index
    %c0_12 = arith.constant 0 : index
    %34 = vector.load %arg4[%c0_11, %c0_12] : memref<32x16xbf16, #tpu.memory_space<vmem>>, vector<32x16xbf16>
    tpu.vector_store %arg4[%c0_11, %c0_12], %33 {strides = array<i32>} : memref<32x16xbf16, #tpu.memory_space<vmem>>, vector<32x16xbf16>,
    return
  }
  func.func @transform_0(%arg0: i32) -> (i32, i32) {
    %c0_i32 = arith.constant 0 : i32
    %c0_i32_0 = arith.constant 0 : i32
    %c0_i32_1 = arith.constant 0 : i32
    return %c0_i32, %c0_i32_0 : i32, i32
  }
  func.func @transform_1(%arg0: i32) -> (i32, i32) {
    %c0_i32 = arith.constant 0 : i32
    %c0_i32_0 = arith.constant 0 : i32
    %c0_i32_1 = arith.constant 0 : i32
    return %c0_i32, %c0_i32_0 : i32, i32
  }
  func.func @transform_2(%arg0: i32) -> (i32, i32) {
    %c0_i32 = arith.constant 0 : i32
    %c0_i32_0 = arith.constant 0 : i32
    %c0_i32_1 = arith.constant 0 : i32
    return %c0_i32, %c0_i32_0 : i32, i32
  }
  func.func @transform_3(%arg0: i32) -> (i32, i32) {
    %c0_i32 = arith.constant 0 : i32
    %c0_i32_0 = arith.constant 0 : i32
    %c0_i32_1 = arith.constant 0 : i32
    return %c0_i32, %c0_i32_0 : i32, i32
  }
}

module attributes {stable_mosaic.version = 11 : i64} {
  func.func @_conv_bn_relu_res_kernel(%arg0: i32, %arg1: memref<32x864xbf16, #tpu.memory_space<vmem>>, %arg2: memref<864x16xbf16, #tpu.memory_space<vmem>>, %arg3: memref<32x3xf32, #tpu.memory_space<vmem>>, %arg4: memref<32x16xbf16, #tpu.memory_space<vmem>>, %arg5: memref<32x16xbf16, #tpu.memory_space<vmem>>) attributes {dimension_semantics = [#tpu.dimension_semantics<arbitrary>], iteration_bounds = array<i64: 1>, scalar_prefetch = 0 : i64, scratch_operands = 0 : i64, tpu.core_type = #tpu.core_type<tc>, window_params = [{pipeline_mode = #tpu.pipeline_mode<synchronous>, transform_indices = @transform_0, window_bounds = array<i64: 32, 864>}, {pipeline_mode = #tpu.pipeline_mode<synchronous>, transform_indices = @transform_1, window_bounds = array<i64: 864, 16>}, {pipeline_mode = #tpu.pipeline_mode<synchronous>, transform_indices = @transform_2, window_bounds = array<i64: 32, 3>}, {pipeline_mode = #tpu.pipeline_mode<synchronous>, transform_indices = @transform_3, window_bounds = array<i64: 32, 16>}, {pipeline_mode = #tpu.pipeline_mode<synchronous>, transform_indices = @transform_4, window_bounds = array<i64: 32, 16>}]} {
    %c0 = arith.constant 0 : index
    %c0_0 = arith.constant 0 : index
    %0 = vector.load %arg1[%c0, %c0_0] : memref<32x864xbf16, #tpu.memory_space<vmem>>, vector<32x864xbf16>
    %c0_1 = arith.constant 0 : index
    %c0_2 = arith.constant 0 : index
    %1 = vector.load %arg2[%c0_1, %c0_2] : memref<864x16xbf16, #tpu.memory_space<vmem>>, vector<864x16xbf16>
    %cst = arith.constant dense<0.000000e+00> : vector<32x16xf32>
    %2 = tpu.matmul %0, %1, %cst {dimension_numbers = #tpu.dot_dimension_numbers<[1], [0], [0], [1], [0, 0, 1, 1], [], []>} : vector<32x864xbf16>, vector<864x16xbf16>, vector<32x16xf32> -> vector<32x16xf32>
    %c0_3 = arith.constant 0 : index
    %c0_4 = arith.constant 0 : index
    %3 = vector.load %arg3[%c0_3, %c0_4] : memref<32x3xf32, #tpu.memory_space<vmem>>, vector<32x3xf32>
    %4 = vector.extract_strided_slice %3 {offsets = [0, 0], sizes = [32, 1], strides = [1, 1]} : vector<32x3xf32> to vector<32x1xf32>
    %5 = vector.broadcast %4 : vector<32x1xf32> to vector<32x16xf32>
    %6 = arith.addf %2, %5 : vector<32x16xf32>
    %cst_5 = arith.constant dense<0.000000e+00> : vector<32xf32>
    %7 = vector.multi_reduction <add>, %6, %cst_5 [1] : vector<32x16xf32> to vector<32xf32>
    %8 = vector.shape_cast %7 : vector<32xf32> to vector<32x1xf32>
    %cst_6 = arith.constant 1.600000e+01 : f32
    %9 = vector.broadcast %cst_6 : f32 to vector<32x1xf32>
    %10 = arith.divf %8, %9 : vector<32x1xf32>
    %11 = vector.broadcast %10 : vector<32x1xf32> to vector<32x16xf32>
    %12 = arith.subf %6, %11 : vector<32x16xf32>
    %13 = arith.mulf %12, %12 : vector<32x16xf32>
    %cst_7 = arith.constant dense<0.000000e+00> : vector<32xf32>
    %14 = vector.multi_reduction <add>, %13, %cst_7 [1] : vector<32x16xf32> to vector<32xf32>
    %15 = vector.shape_cast %14 : vector<32xf32> to vector<32x1xf32>
    %cst_8 = arith.constant 1.600000e+01 : f32
    %16 = vector.broadcast %cst_8 : f32 to vector<32x1xf32>
    %17 = arith.divf %15, %16 : vector<32x1xf32>
    %18 = vector.extract_strided_slice %3 {offsets = [0, 1], sizes = [32, 1], strides = [1, 1]} : vector<32x3xf32> to vector<32x1xf32>
    %19 = vector.broadcast %10 : vector<32x1xf32> to vector<32x16xf32>
    %20 = arith.subf %6, %19 : vector<32x16xf32>
    %cst_9 = arith.constant 9.99999974E-6 : f32
    %21 = vector.broadcast %cst_9 : f32 to vector<32x1xf32>
    %22 = arith.addf %17, %21 : vector<32x1xf32>
    %23 = math.rsqrt %22 : vector<32x1xf32>
    %24 = vector.broadcast %23 : vector<32x1xf32> to vector<32x16xf32>
    %25 = arith.mulf %20, %24 : vector<32x16xf32>
    %26 = vector.broadcast %18 : vector<32x1xf32> to vector<32x16xf32>
    %27 = arith.mulf %26, %25 : vector<32x16xf32>
    %28 = vector.extract_strided_slice %3 {offsets = [0, 2], sizes = [32, 1], strides = [1, 1]} : vector<32x3xf32> to vector<32x1xf32>
    %29 = vector.broadcast %28 : vector<32x1xf32> to vector<32x16xf32>
    %30 = arith.addf %27, %29 : vector<32x16xf32>
    %cst_10 = arith.constant 0.000000e+00 : f32
    %31 = vector.broadcast %cst_10 : f32 to vector<32x16xf32>
    %32 = arith.maximumf %30, %31 : vector<32x16xf32>
    %c0_11 = arith.constant 0 : index
    %c0_12 = arith.constant 0 : index
    %33 = vector.load %arg4[%c0_11, %c0_12] : memref<32x16xbf16, #tpu.memory_space<vmem>>, vector<32x16xbf16>
    %34 = arith.extf %33 : vector<32x16xbf16> to vector<32x16xf32>
    %35 = arith.addf %32, %34 : vector<32x16xf32>
    %36 = arith.truncf %35 : vector<32x16xf32> to vector<32x16xbf16>
    %c0_13 = arith.constant 0 : index
    %c0_14 = arith.constant 0 : index
    %37 = vector.load %arg5[%c0_13, %c0_14] : memref<32x16xbf16, #tpu.memory_space<vmem>>, vector<32x16xbf16>
    tpu.vector_store %arg5[%c0_13, %c0_14], %36 {strides = array<i32>} : memref<32x16xbf16, #tpu.memory_space<vmem>>, vector<32x16xbf16>,
    return
  }
  func.func @transform_0(%arg0: i32) -> (i32, i32) {
    %c0_i32 = arith.constant 0 : i32
    %c0_i32_0 = arith.constant 0 : i32
    %c0_i32_1 = arith.constant 0 : i32
    return %c0_i32, %c0_i32_0 : i32, i32
  }
  func.func @transform_1(%arg0: i32) -> (i32, i32) {
    %c0_i32 = arith.constant 0 : i32
    %c0_i32_0 = arith.constant 0 : i32
    %c0_i32_1 = arith.constant 0 : i32
    return %c0_i32, %c0_i32_0 : i32, i32
  }
  func.func @transform_2(%arg0: i32) -> (i32, i32) {
    %c0_i32 = arith.constant 0 : i32
    %c0_i32_0 = arith.constant 0 : i32
    %c0_i32_1 = arith.constant 0 : i32
    return %c0_i32, %c0_i32_0 : i32, i32
  }
  func.func @transform_3(%arg0: i32) -> (i32, i32) {
    %c0_i32 = arith.constant 0 : i32
    %c0_i32_0 = arith.constant 0 : i32
    %c0_i32_1 = arith.constant 0 : i32
    return %c0_i32, %c0_i32_0 : i32, i32
  }
  func.func @transform_4(%arg0: i32) -> (i32, i32) {
    %c0_i32 = arith.constant 0 : i32
    %c0_i32_0 = arith.constant 0 : i32
    %c0_i32_1 = arith.constant 0 : i32
    return %c0_i32, %c0_i32_0 : i32, i32
  }
}

module attributes {stable_mosaic.version = 11 : i64} {
  func.func @_latent_kernel(%arg0: i32, %arg1: memref<32x16xbf16, #tpu.memory_space<vmem>>, %arg2: memref<4x32xbf16, #tpu.memory_space<vmem>>, %arg3: memref<4x1xf32, #tpu.memory_space<vmem>>, %arg4: memref<32x4xbf16, #tpu.memory_space<vmem>>, %arg5: memref<32x1xf32, #tpu.memory_space<vmem>>, %arg6: memref<32x16xbf16, #tpu.memory_space<vmem>>) attributes {dimension_semantics = [#tpu.dimension_semantics<arbitrary>], iteration_bounds = array<i64: 1>, scalar_prefetch = 0 : i64, scratch_operands = 0 : i64, tpu.core_type = #tpu.core_type<tc>, window_params = [{pipeline_mode = #tpu.pipeline_mode<synchronous>, transform_indices = @transform_0, window_bounds = array<i64: 32, 16>}, {pipeline_mode = #tpu.pipeline_mode<synchronous>, transform_indices = @transform_1, window_bounds = array<i64: 4, 32>}, {pipeline_mode = #tpu.pipeline_mode<synchronous>, transform_indices = @transform_2, window_bounds = array<i64: 4, 1>}, {pipeline_mode = #tpu.pipeline_mode<synchronous>, transform_indices = @transform_3, window_bounds = array<i64: 32, 4>}, {pipeline_mode = #tpu.pipeline_mode<synchronous>, transform_indices = @transform_4, window_bounds = array<i64: 32, 1>}, {pipeline_mode = #tpu.pipeline_mode<synchronous>, transform_indices = @transform_5, window_bounds = array<i64: 32, 16>}]} {
    %c0 = arith.constant 0 : index
    %c0_0 = arith.constant 0 : index
    %0 = vector.load %arg2[%c0, %c0_0] : memref<4x32xbf16, #tpu.memory_space<vmem>>, vector<4x32xbf16>
    %c0_1 = arith.constant 0 : index
    %c0_2 = arith.constant 0 : index
    %1 = vector.load %arg1[%c0_1, %c0_2] : memref<32x16xbf16, #tpu.memory_space<vmem>>, vector<32x16xbf16>
    %cst = arith.constant dense<0.000000e+00> : vector<4x16xf32>
    %2 = tpu.matmul %0, %1, %cst {dimension_numbers = #tpu.dot_dimension_numbers<[1], [0], [0], [1], [0, 0, 1, 1], [], []>} : vector<4x32xbf16>, vector<32x16xbf16>, vector<4x16xf32> -> vector<4x16xf32>
    %c0_3 = arith.constant 0 : index
    %c0_4 = arith.constant 0 : index
    %3 = vector.load %arg3[%c0_3, %c0_4] : memref<4x1xf32, #tpu.memory_space<vmem>>, vector<4x1xf32>
    %4 = vector.broadcast %3 : vector<4x1xf32> to vector<4x16xf32>
    %5 = arith.addf %2, %4 : vector<4x16xf32>
    %c0_5 = arith.constant 0 : index
    %c0_6 = arith.constant 0 : index
    %6 = vector.load %arg4[%c0_5, %c0_6] : memref<32x4xbf16, #tpu.memory_space<vmem>>, vector<32x4xbf16>
    %7 = arith.truncf %5 : vector<4x16xf32> to vector<4x16xbf16>
    %cst_7 = arith.constant dense<0.000000e+00> : vector<32x16xf32>
    %8 = tpu.matmul %6, %7, %cst_7 {dimension_numbers = #tpu.dot_dimension_numbers<[1], [0], [0], [1], [0, 0, 1, 1], [], []>} : vector<32x4xbf16>, vector<4x16xbf16>, vector<32x16xf32> -> vector<32x16xf32>
    %c0_8 = arith.constant 0 : index
    %c0_9 = arith.constant 0 : index
    %9 = vector.load %arg5[%c0_8, %c0_9] : memref<32x1xf32, #tpu.memory_space<vmem>>, vector<32x1xf32>
    %10 = vector.broadcast %9 : vector<32x1xf32> to vector<32x16xf32>
    %11 = arith.addf %8, %10 : vector<32x16xf32>
    %12 = arith.truncf %11 : vector<32x16xf32> to vector<32x16xbf16>
    %c0_10 = arith.constant 0 : index
    %c0_11 = arith.constant 0 : index
    %13 = vector.load %arg6[%c0_10, %c0_11] : memref<32x16xbf16, #tpu.memory_space<vmem>>, vector<32x16xbf16>
    tpu.vector_store %arg6[%c0_10, %c0_11], %12 {strides = array<i32>} : memref<32x16xbf16, #tpu.memory_space<vmem>>, vector<32x16xbf16>,
    return
  }
  func.func @transform_0(%arg0: i32) -> (i32, i32) {
    %c0_i32 = arith.constant 0 : i32
    %c0_i32_0 = arith.constant 0 : i32
    %c0_i32_1 = arith.constant 0 : i32
    return %c0_i32, %c0_i32_0 : i32, i32
  }
  func.func @transform_1(%arg0: i32) -> (i32, i32) {
    %c0_i32 = arith.constant 0 : i32
    %c0_i32_0 = arith.constant 0 : i32
    %c0_i32_1 = arith.constant 0 : i32
    return %c0_i32, %c0_i32_0 : i32, i32
  }
  func.func @transform_2(%arg0: i32) -> (i32, i32) {
    %c0_i32 = arith.constant 0 : i32
    %c0_i32_0 = arith.constant 0 : i32
    %c0_i32_1 = arith.constant 0 : i32
    return %c0_i32, %c0_i32_0 : i32, i32
  }
  func.func @transform_3(%arg0: i32) -> (i32, i32) {
    %c0_i32 = arith.constant 0 : i32
    %c0_i32_0 = arith.constant 0 : i32
    %c0_i32_1 = arith.constant 0 : i32
    return %c0_i32, %c0_i32_0 : i32, i32
  }
  func.func @transform_4(%arg0: i32) -> (i32, i32) {
    %c0_i32 = arith.constant 0 : i32
    %c0_i32_0 = arith.constant 0 : i32
    %c0_i32_1 = arith.constant 0 : i32
    return %c0_i32, %c0_i32_0 : i32, i32
  }
  func.func @transform_5(%arg0: i32) -> (i32, i32) {
    %c0_i32 = arith.constant 0 : i32
    %c0_i32_0 = arith.constant 0 : i32
    %c0_i32_1 = arith.constant 0 : i32
    return %c0_i32, %c0_i32_0 : i32, i32
  }
}

module attributes {stable_mosaic.version = 11 : i64} {
  func.func @_matmul_bias_kernel(%arg0: i32, %arg1: memref<128x256xbf16, #tpu.memory_space<vmem>>, %arg2: memref<256x16xbf16, #tpu.memory_space<vmem>>, %arg3: memref<128x1xf32, #tpu.memory_space<vmem>>, %arg4: memref<128x16xbf16, #tpu.memory_space<vmem>>) attributes {dimension_semantics = [#tpu.dimension_semantics<parallel>], iteration_bounds = array<i64: 1>, scalar_prefetch = 0 : i64, scratch_operands = 0 : i64, tpu.core_type = #tpu.core_type<tc>, window_params = [{pipeline_mode = #tpu.pipeline_mode<synchronous>, transform_indices = @transform_0, window_bounds = array<i64: 128, 256>}, {transform_indices = @transform_1, window_bounds = array<i64: 256, 16>}, {pipeline_mode = #tpu.pipeline_mode<synchronous>, transform_indices = @transform_2, window_bounds = array<i64: 128, 1>}, {transform_indices = @transform_3, window_bounds = array<i64: 128, 16>}]} {
    %c0 = arith.constant 0 : index
    %c0_0 = arith.constant 0 : index
    %0 = vector.load %arg1[%c0, %c0_0] : memref<128x256xbf16, #tpu.memory_space<vmem>>, vector<128x256xbf16>
    %c0_1 = arith.constant 0 : index
    %c0_2 = arith.constant 0 : index
    %1 = vector.load %arg2[%c0_1, %c0_2] : memref<256x16xbf16, #tpu.memory_space<vmem>>, vector<256x16xbf16>
    %cst = arith.constant dense<0.000000e+00> : vector<128x16xf32>
    %2 = tpu.matmul %0, %1, %cst {dimension_numbers = #tpu.dot_dimension_numbers<[1], [0], [0], [1], [0, 0, 1, 1], [], []>} : vector<128x256xbf16>, vector<256x16xbf16>, vector<128x16xf32> -> vector<128x16xf32>
    %c0_3 = arith.constant 0 : index
    %c0_4 = arith.constant 0 : index
    %3 = vector.load %arg3[%c0_3, %c0_4] : memref<128x1xf32, #tpu.memory_space<vmem>>, vector<128x1xf32>
    %4 = vector.broadcast %3 : vector<128x1xf32> to vector<128x16xf32>
    %5 = arith.addf %2, %4 : vector<128x16xf32>
    %6 = arith.truncf %5 : vector<128x16xf32> to vector<128x16xbf16>
    %c0_5 = arith.constant 0 : index
    %c0_6 = arith.constant 0 : index
    %7 = vector.load %arg4[%c0_5, %c0_6] : memref<128x16xbf16, #tpu.memory_space<vmem>>, vector<128x16xbf16>
    tpu.vector_store %arg4[%c0_5, %c0_6], %6 {strides = array<i32>} : memref<128x16xbf16, #tpu.memory_space<vmem>>, vector<128x16xbf16>,
    return
  }
  func.func @transform_0(%arg0: i32) -> (i32, i32) {
    %c0_i32 = arith.constant 0 : i32
    %c0_i32_0 = arith.constant 0 : i32
    %c0_i32_1 = arith.constant 0 : i32
    return %c0_i32, %c0_i32_0 : i32, i32
  }
  func.func @transform_1(%arg0: i32) -> (i32, i32) {
    %c0_i32 = arith.constant 0 : i32
    %c0_i32_0 = arith.constant 0 : i32
    return %c0_i32, %arg0 : i32, i32
  }
  func.func @transform_2(%arg0: i32) -> (i32, i32) {
    %c0_i32 = arith.constant 0 : i32
    %c0_i32_0 = arith.constant 0 : i32
    %c0_i32_1 = arith.constant 0 : i32
    return %c0_i32, %c0_i32_0 : i32, i32
  }
  func.func @transform_3(%arg0: i32) -> (i32, i32) {
    %c0_i32 = arith.constant 0 : i32
    %c0_i32_0 = arith.constant 0 : i32
    return %c0_i32, %arg0 : i32, i32
  }
}

module attributes {stable_mosaic.version = 11 : i64} {
  func.func @_matmul_bias_kernel(%arg0: i32, %arg1: memref<64x128xbf16, #tpu.memory_space<vmem>>, %arg2: memref<128x128xbf16, #tpu.memory_space<vmem>>, %arg3: memref<64x1xf32, #tpu.memory_space<vmem>>, %arg4: memref<64x128xbf16, #tpu.memory_space<vmem>>) attributes {dimension_semantics = [#tpu.dimension_semantics<parallel>], iteration_bounds = array<i64: 1>, scalar_prefetch = 0 : i64, scratch_operands = 0 : i64, tpu.core_type = #tpu.core_type<tc>, window_params = [{pipeline_mode = #tpu.pipeline_mode<synchronous>, transform_indices = @transform_0, window_bounds = array<i64: 64, 128>}, {transform_indices = @transform_1, window_bounds = array<i64: 128, 128>}, {pipeline_mode = #tpu.pipeline_mode<synchronous>, transform_indices = @transform_2, window_bounds = array<i64: 64, 1>}, {transform_indices = @transform_3, window_bounds = array<i64: 64, 128>}]} {
    %c0 = arith.constant 0 : index
    %c0_0 = arith.constant 0 : index
    %0 = vector.load %arg1[%c0, %c0_0] : memref<64x128xbf16, #tpu.memory_space<vmem>>, vector<64x128xbf16>
    %c0_1 = arith.constant 0 : index
    %c0_2 = arith.constant 0 : index
    %1 = vector.load %arg2[%c0_1, %c0_2] : memref<128x128xbf16, #tpu.memory_space<vmem>>, vector<128x128xbf16>
    %cst = arith.constant dense<0.000000e+00> : vector<64x128xf32>
    %2 = tpu.matmul %0, %1, %cst {dimension_numbers = #tpu.dot_dimension_numbers<[1], [0], [0], [1], [0, 0, 1, 1], [], []>} : vector<64x128xbf16>, vector<128x128xbf16>, vector<64x128xf32> -> vector<64x128xf32>
    %c0_3 = arith.constant 0 : index
    %c0_4 = arith.constant 0 : index
    %3 = vector.load %arg3[%c0_3, %c0_4] : memref<64x1xf32, #tpu.memory_space<vmem>>, vector<64x1xf32>
    %4 = vector.broadcast %3 : vector<64x1xf32> to vector<64x128xf32>
    %5 = arith.addf %2, %4 : vector<64x128xf32>
    %6 = arith.truncf %5 : vector<64x128xf32> to vector<64x128xbf16>
    %c0_5 = arith.constant 0 : index
    %c0_6 = arith.constant 0 : index
    %7 = vector.load %arg4[%c0_5, %c0_6] : memref<64x128xbf16, #tpu.memory_space<vmem>>, vector<64x128xbf16>
    tpu.vector_store %arg4[%c0_5, %c0_6], %6 {strides = array<i32>} : memref<64x128xbf16, #tpu.memory_space<vmem>>, vector<64x128xbf16>,
    return
  }
  func.func @transform_0(%arg0: i32) -> (i32, i32) {
    %c0_i32 = arith.constant 0 : i32
    %c0_i32_0 = arith.constant 0 : i32
    %c0_i32_1 = arith.constant 0 : i32
    return %c0_i32, %c0_i32_0 : i32, i32
  }
  func.func @transform_1(%arg0: i32) -> (i32, i32) {
    %c0_i32 = arith.constant 0 : i32
    %c0_i32_0 = arith.constant 0 : i32
    return %c0_i32, %arg0 : i32, i32
  }
  func.func @transform_2(%arg0: i32) -> (i32, i32) {
    %c0_i32 = arith.constant 0 : i32
    %c0_i32_0 = arith.constant 0 : i32
    %c0_i32_1 = arith.constant 0 : i32
    return %c0_i32, %c0_i32_0 : i32, i32
  }
  func.func @transform_3(%arg0: i32) -> (i32, i32) {
    %c0_i32 = arith.constant 0 : i32
    %c0_i32_0 = arith.constant 0 : i32
    return %c0_i32, %arg0 : i32, i32
  }
}

module attributes {stable_mosaic.version = 11 : i64} {
  func.func @_conv_bn_relu_res_kernel(%arg0: i32, %arg1: memref<8x216xbf16, #tpu.memory_space<vmem>>, %arg2: memref<216x1024xbf16, #tpu.memory_space<vmem>>, %arg3: memref<8x3xf32, #tpu.memory_space<vmem>>, %arg4: memref<8x1024xbf16, #tpu.memory_space<vmem>>, %arg5: memref<8x1024xbf16, #tpu.memory_space<vmem>>) attributes {dimension_semantics = [#tpu.dimension_semantics<arbitrary>], iteration_bounds = array<i64: 1>, scalar_prefetch = 0 : i64, scratch_operands = 0 : i64, tpu.core_type = #tpu.core_type<tc>, window_params = [{pipeline_mode = #tpu.pipeline_mode<synchronous>, transform_indices = @transform_0, window_bounds = array<i64: 8, 216>}, {pipeline_mode = #tpu.pipeline_mode<synchronous>, transform_indices = @transform_1, window_bounds = array<i64: 216, 1024>}, {pipeline_mode = #tpu.pipeline_mode<synchronous>, transform_indices = @transform_2, window_bounds = array<i64: 8, 3>}, {pipeline_mode = #tpu.pipeline_mode<synchronous>, transform_indices = @transform_3, window_bounds = array<i64: 8, 1024>}, {pipeline_mode = #tpu.pipeline_mode<synchronous>, transform_indices = @transform_4, window_bounds = array<i64: 8, 1024>}]} {
    %c0 = arith.constant 0 : index
    %c0_0 = arith.constant 0 : index
    %0 = vector.load %arg1[%c0, %c0_0] : memref<8x216xbf16, #tpu.memory_space<vmem>>, vector<8x216xbf16>
    %c0_1 = arith.constant 0 : index
    %c0_2 = arith.constant 0 : index
    %1 = vector.load %arg2[%c0_1, %c0_2] : memref<216x1024xbf16, #tpu.memory_space<vmem>>, vector<216x1024xbf16>
    %cst = arith.constant dense<0.000000e+00> : vector<8x1024xf32>
    %2 = tpu.matmul %0, %1, %cst {dimension_numbers = #tpu.dot_dimension_numbers<[1], [0], [0], [1], [0, 0, 1, 1], [], []>} : vector<8x216xbf16>, vector<216x1024xbf16>, vector<8x1024xf32> -> vector<8x1024xf32>
    %c0_3 = arith.constant 0 : index
    %c0_4 = arith.constant 0 : index
    %3 = vector.load %arg3[%c0_3, %c0_4] : memref<8x3xf32, #tpu.memory_space<vmem>>, vector<8x3xf32>
    %4 = vector.extract_strided_slice %3 {offsets = [0, 0], sizes = [8, 1], strides = [1, 1]} : vector<8x3xf32> to vector<8x1xf32>
    %5 = vector.broadcast %4 : vector<8x1xf32> to vector<8x1024xf32>
    %6 = arith.addf %2, %5 : vector<8x1024xf32>
    %cst_5 = arith.constant dense<0.000000e+00> : vector<8xf32>
    %7 = vector.multi_reduction <add>, %6, %cst_5 [1] : vector<8x1024xf32> to vector<8xf32>
    %8 = vector.shape_cast %7 : vector<8xf32> to vector<8x1xf32>
    %cst_6 = arith.constant 1.024000e+03 : f32
    %9 = vector.broadcast %cst_6 : f32 to vector<8x1xf32>
    %10 = arith.divf %8, %9 : vector<8x1xf32>
    %11 = vector.broadcast %10 : vector<8x1xf32> to vector<8x1024xf32>
    %12 = arith.subf %6, %11 : vector<8x1024xf32>
    %13 = arith.mulf %12, %12 : vector<8x1024xf32>
    %cst_7 = arith.constant dense<0.000000e+00> : vector<8xf32>
    %14 = vector.multi_reduction <add>, %13, %cst_7 [1] : vector<8x1024xf32> to vector<8xf32>
    %15 = vector.shape_cast %14 : vector<8xf32> to vector<8x1xf32>
    %cst_8 = arith.constant 1.024000e+03 : f32
    %16 = vector.broadcast %cst_8 : f32 to vector<8x1xf32>
    %17 = arith.divf %15, %16 : vector<8x1xf32>
    %18 = vector.extract_strided_slice %3 {offsets = [0, 1], sizes = [8, 1], strides = [1, 1]} : vector<8x3xf32> to vector<8x1xf32>
    %19 = vector.broadcast %10 : vector<8x1xf32> to vector<8x1024xf32>
    %20 = arith.subf %6, %19 : vector<8x1024xf32>
    %cst_9 = arith.constant 9.99999974E-6 : f32
    %21 = vector.broadcast %cst_9 : f32 to vector<8x1xf32>
    %22 = arith.addf %17, %21 : vector<8x1xf32>
    %23 = math.rsqrt %22 : vector<8x1xf32>
    %24 = vector.broadcast %23 : vector<8x1xf32> to vector<8x1024xf32>
    %25 = arith.mulf %20, %24 : vector<8x1024xf32>
    %26 = vector.broadcast %18 : vector<8x1xf32> to vector<8x1024xf32>
    %27 = arith.mulf %26, %25 : vector<8x1024xf32>
    %28 = vector.extract_strided_slice %3 {offsets = [0, 2], sizes = [8, 1], strides = [1, 1]} : vector<8x3xf32> to vector<8x1xf32>
    %29 = vector.broadcast %28 : vector<8x1xf32> to vector<8x1024xf32>
    %30 = arith.addf %27, %29 : vector<8x1024xf32>
    %cst_10 = arith.constant 0.000000e+00 : f32
    %31 = vector.broadcast %cst_10 : f32 to vector<8x1024xf32>
    %32 = arith.maximumf %30, %31 : vector<8x1024xf32>
    %c0_11 = arith.constant 0 : index
    %c0_12 = arith.constant 0 : index
    %33 = vector.load %arg4[%c0_11, %c0_12] : memref<8x1024xbf16, #tpu.memory_space<vmem>>, vector<8x1024xbf16>
    %34 = arith.extf %33 : vector<8x1024xbf16> to vector<8x1024xf32>
    %35 = arith.addf %32, %34 : vector<8x1024xf32>
    %36 = arith.truncf %35 : vector<8x1024xf32> to vector<8x1024xbf16>
    %c0_13 = arith.constant 0 : index
    %c0_14 = arith.constant 0 : index
    %37 = vector.load %arg5[%c0_13, %c0_14] : memref<8x1024xbf16, #tpu.memory_space<vmem>>, vector<8x1024xbf16>
    tpu.vector_store %arg5[%c0_13, %c0_14], %36 {strides = array<i32>} : memref<8x1024xbf16, #tpu.memory_space<vmem>>, vector<8x1024xbf16>,
    return
  }
  func.func @transform_0(%arg0: i32) -> (i32, i32) {
    %c0_i32 = arith.constant 0 : i32
    %c0_i32_0 = arith.constant 0 : i32
    %c0_i32_1 = arith.constant 0 : i32
    return %c0_i32, %c0_i32_0 : i32, i32
  }
  func.func @transform_1(%arg0: i32) -> (i32, i32) {
    %c0_i32 = arith.constant 0 : i32
    %c0_i32_0 = arith.constant 0 : i32
    %c0_i32_1 = arith.constant 0 : i32
    return %c0_i32, %c0_i32_0 : i32, i32
  }
  func.func @transform_2(%arg0: i32) -> (i32, i32) {
    %c0_i32 = arith.constant 0 : i32
    %c0_i32_0 = arith.constant 0 : i32
    %c0_i32_1 = arith.constant 0 : i32
    return %c0_i32, %c0_i32_0 : i32, i32
  }
  func.func @transform_3(%arg0: i32) -> (i32, i32) {
    %c0_i32 = arith.constant 0 : i32
    %c0_i32_0 = arith.constant 0 : i32
    %c0_i32_1 = arith.constant 0 : i32
    return %c0_i32, %c0_i32_0 : i32, i32
  }
  func.func @transform_4(%arg0: i32) -> (i32, i32) {
    %c0_i32 = arith.constant 0 : i32
    %c0_i32_0 = arith.constant 0 : i32
    %c0_i32_1 = arith.constant 0 : i32
    return %c0_i32, %c0_i32_0 : i32, i32
  }
}

module attributes {stable_mosaic.version = 11 : i64} {
  func.func @_matmul_bias_kernel(%arg0: i32, %arg1: memref<3x8xbf16, #tpu.memory_space<vmem>>, %arg2: memref<8x512xbf16, #tpu.memory_space<vmem>>, %arg3: memref<3x1xf32, #tpu.memory_space<vmem>>, %arg4: memref<3x512xf32, #tpu.memory_space<vmem>>) attributes {dimension_semantics = [#tpu.dimension_semantics<parallel>], iteration_bounds = array<i64: 2>, scalar_prefetch = 0 : i64, scratch_operands = 0 : i64, tpu.core_type = #tpu.core_type<tc>, window_params = [{pipeline_mode = #tpu.pipeline_mode<synchronous>, transform_indices = @transform_0, window_bounds = array<i64: 3, 8>}, {transform_indices = @transform_1, window_bounds = array<i64: 8, 512>}, {pipeline_mode = #tpu.pipeline_mode<synchronous>, transform_indices = @transform_2, window_bounds = array<i64: 3, 1>}, {transform_indices = @transform_3, window_bounds = array<i64: 3, 512>}]} {
    %c0 = arith.constant 0 : index
    %c0_0 = arith.constant 0 : index
    %0 = vector.load %arg1[%c0, %c0_0] : memref<3x8xbf16, #tpu.memory_space<vmem>>, vector<3x8xbf16>
    %c0_1 = arith.constant 0 : index
    %c0_2 = arith.constant 0 : index
    %1 = vector.load %arg2[%c0_1, %c0_2] : memref<8x512xbf16, #tpu.memory_space<vmem>>, vector<8x512xbf16>
    %cst = arith.constant dense<0.000000e+00> : vector<3x512xf32>
    %2 = tpu.matmul %0, %1, %cst {dimension_numbers = #tpu.dot_dimension_numbers<[1], [0], [0], [1], [0, 0, 1, 1], [], []>} : vector<3x8xbf16>, vector<8x512xbf16>, vector<3x512xf32> -> vector<3x512xf32>
    %c0_3 = arith.constant 0 : index
    %c0_4 = arith.constant 0 : index
    %3 = vector.load %arg3[%c0_3, %c0_4] : memref<3x1xf32, #tpu.memory_space<vmem>>, vector<3x1xf32>
    %4 = vector.broadcast %3 : vector<3x1xf32> to vector<3x512xf32>
    %5 = arith.addf %2, %4 : vector<3x512xf32>
    %c0_5 = arith.constant 0 : index
    %c0_6 = arith.constant 0 : index
    %6 = vector.load %arg4[%c0_5, %c0_6] : memref<3x512xf32, #tpu.memory_space<vmem>>, vector<3x512xf32>
    tpu.vector_store %arg4[%c0_5, %c0_6], %5 {strides = array<i32>} : memref<3x512xf32, #tpu.memory_space<vmem>>, vector<3x512xf32>,
    return
  }
  func.func @transform_0(%arg0: i32) -> (i32, i32) {
    %c0_i32 = arith.constant 0 : i32
    %c0_i32_0 = arith.constant 0 : i32
    %c0_i32_1 = arith.constant 0 : i32
    return %c0_i32, %c0_i32_0 : i32, i32
  }
  func.func @transform_1(%arg0: i32) -> (i32, i32) {
    %c0_i32 = arith.constant 0 : i32
    %c0_i32_0 = arith.constant 0 : i32
    return %c0_i32, %arg0 : i32, i32
  }
  func.func @transform_2(%arg0: i32) -> (i32, i32) {
    %c0_i32 = arith.constant 0 : i32
    %c0_i32_0 = arith.constant 0 : i32
    %c0_i32_1 = arith.constant 0 : i32
    return %c0_i32, %c0_i32_0 : i32, i32
  }
  func.func @transform_3(%arg0: i32) -> (i32, i32) {
    %c0_i32 = arith.constant 0 : i32
    %c0_i32_0 = arith.constant 0 : i32
    return %c0_i32, %arg0 : i32, i32
  }
}

</mosaic_0001>

<bundles_post_ra>
// kernel: tile.10
= control target key start
LH: loop header
LB: loop body
LE: loop exit
PB: predicated region body
PF: predicated region fallthrough
CT: control target
= control target key end

     0   :  { %s22_s0 = inlined_call_operand.vmem [shape: f32[16], index: 0, kind: input, shape index: {}]   ;;  %s23_s1 = inlined_call_operand.vmem [shape: f32[8,16], index: 1, kind: output, shape index: {}]  }
   0x1   :  { %v4_v0 = vld [vmem:[%s22_s0] ss:$0 sm:$0xff] }
   0x2   :  { %5 = vst [vmem:[%s23_s1] sm:$0xff] %v4_v0 }

// kernel: tile.14
= control target key start
LH: loop header
LB: loop body
LE: loop exit
PB: predicated region body
PF: predicated region fallthrough
CT: control target
= control target key end

     0   :  { %s22_s0 = inlined_call_operand.vmem [shape: f32[8], index: 0, kind: input, shape index: {}]   ;;  %s23_s1 = inlined_call_operand.vmem [shape: f32[8,8], index: 1, kind: output, shape index: {}]  }
   0x1   :  { %v4_v0 = vld [vmem:[%s22_s0] ss:$0 sm:$0xff] }
   0x2   :  { %5 = vst [vmem:[%s23_s1] sm:$0xff] %v4_v0 }

// kernel: tile.1
= control target key start
LH: loop header
LB: loop body
LE: loop exit
PB: predicated region body
PF: predicated region fallthrough
CT: control target
= control target key end

     0   :  { %vm3_vm0 = vcmask 7168   ;;  %s84_s8 = smov 125   ;;  %s85_s13 = smov 126   ;;  %s167_s0 = inlined_call_operand.vmem [shape: f32[8,8], index: 0, kind: input, shape index: {}]   ;;  %s168_s1 = inlined_call_operand.vmem [shape: f32[64,1], index: 1, kind: output, shape index: {}]  }
   0x1   :  { %v6_v0 = vld [vmem:[%s167_s0] sm:$0xff]   ;;  %s83_s0 = smov 127   ;;  %s86_s14 = smov 124  }
   0x2   :  { %7 = vrot.lane.b32.xlu0 %v6_v0, %s83_s0  ;;  %23 = vrot.lane.b32.xlu1 %v6_v0, %s84_s8  ;;  %4 = vst.msk [vmem:[%s168_s1] ss:$8 sm:$0xf] %vm3_vm0, %v6_v0   ;;  %5 = vst.msk [vmem:[%s168_s1] ss:$8 sm:$0xf0] %vm3_vm0, %v6_v0  }
   0x3   :  { %s87_s15 = smov 123   ;;  %s88_s16 = smov 122  }
   0x4   :  { %s89_s17 = smov 121  }
   0x6   :  { %15 = vrot.lane.b32.xlu0 %v6_v0, %s85_s13  ;;  %31 = vrot.lane.b32.xlu1 %v6_v0, %s86_s14 }
   0xa   :  { %39 = vrot.lane.b32.xlu0 %v6_v0, %s87_s15  ;;  %47 = vrot.lane.b32.xlu1 %v6_v0, %s88_s16 }
   0xe   :  { %55 = vrot.lane.b32.xlu0 %v6_v0, %s89_s17 }
  0x74   :  { %v8_v1 = vpop.permute.xlu0 %7   ;;  %v24_v2 = vpop.permute.xlu1 %23  }
  0x75   :  { %62 = vst.msk [vmem:[%s168_s1 + $0x1] ss:$8 sm:$0xf] %vm3_vm0, %v8_v1   ;;  %63 = vst.msk [vmem:[%s168_s1 + $0x1] ss:$8 sm:$0xf0] %vm3_vm0, %v8_v1  }
  0x76   :  { %66 = vst.msk [vmem:[%s168_s1 + $0x3] ss:$8 sm:$0xf] %vm3_vm0, %v24_v2   ;;  %67 = vst.msk [vmem:[%s168_s1 + $0x3] ss:$8 sm:$0xf0] %vm3_vm0, %v24_v2  }
  0x78   :  { %v16_v3 = vpop.permute.xlu0 %15   ;;  %v32_v4 = vpop.permute.xlu1 %31  }
  0x79   :  { %64 = vst.msk [vmem:[%s168_s1 + $0x2] ss:$8 sm:$0xf] %vm3_vm0, %v16_v3   ;;  %65 = vst.msk [vmem:[%s168_s1 + $0x2] ss:$8 sm:$0xf0] %vm3_vm0, %v16_v3  }
  0x7a   :  { %68 = vst.msk [vmem:[%s168_s1 + $0x4] ss:$8 sm:$0xf] %vm3_vm0, %v32_v4   ;;  %69 = vst.msk [vmem:[%s168_s1 + $0x4] ss:$8 sm:$0xf0] %vm3_vm0, %v32_v4  }
  0x7c   :  { %v40_v5 = vpop.permute.xlu0 %39   ;;  %v48_v6 = vpop.permute.xlu1 %47  }
  0x7d   :  { %70 = vst.msk [vmem:[%s168_s1 + $0x5] ss:$8 sm:$0xf] %vm3_vm0, %v40_v5   ;;  %71 = vst.msk [vmem:[%s168_s1 + $0x5] ss:$8 sm:$0xf0] %vm3_vm0, %v40_v5  }
  0x7e   :  { %72 = vst.msk [vmem:[%s168_s1 + $0x6] ss:$8 sm:$0xf] %vm3_vm0, %v48_v6   ;;  %73 = vst.msk [vmem:[%s168_s1 + $0x6] ss:$8 sm:$0xf0] %vm3_vm0, %v48_v6  }
  0x80   :  { %v56_v7 = vpop.permute.xlu0 %55  }
  0x81   :  { %74 = vst.msk [vmem:[%s168_s1 + $0x7] ss:$8 sm:$0xf] %vm3_vm0, %v56_v7   ;;  %75 = vst.msk [vmem:[%s168_s1 + $0x7] ss:$8 sm:$0xf0] %vm3_vm0, %v56_v7  }

// kernel: tile.0
= control target key start
LH: loop header
LB: loop body
LE: loop exit
PB: predicated region body
PF: predicated region fallthrough
CT: control target
= control target key end

     0   :  { %vm3_vm0 = vcmask 7168   ;;  %s264_s8 = smov 125   ;;  %s265_s17 = smov 126   ;;  %s547_s0 = inlined_call_operand.vmem [shape: f32[8,16], index: 0, kind: input, shape index: {}]   ;;  %s548_s1 = inlined_call_operand.vmem [shape: f32[128,1], index: 1, kind: output, shape index: {}]  }
   0x1   :  { %v8_v0 = vld [vmem:[%s547_s0] sm:$0xff]   ;;  %s263_s0 = smov 127   ;;  %s266_s18 = smov 124  }
   0x2   :  { %9 = vrot.lane.b32.xlu0 %v8_v0, %s263_s0  ;;  %33 = vrot.lane.b32.xlu1 %v8_v0, %s264_s8  ;;  %4 = vst.msk [vmem:[%s548_s1] ss:$16 sm:$0x3] %vm3_vm0, %v8_v0   ;;  %5 = vst.msk [vmem:[%s548_s1] ss:$16 sm:$0xc] %vm3_vm0, %v8_v0  }
   0x3   :  { %6 = vst.msk [vmem:[%s548_s1] ss:$16 sm:$0x30] %vm3_vm0, %v8_v0   ;;  %7 = vst.msk [vmem:[%s548_s1] ss:$16 sm:$0xc0] %vm3_vm0, %v8_v0  }
   0x4   :  { %s267_s19 = smov 123   ;;  %s268_s20 = smov 122  }
   0x5   :  { %s269_s21 = smov 121   ;;  %s270_s22 = smov 120  }
   0x6   :  { %21 = vrot.lane.b32.xlu0 %v8_v0, %s265_s17  ;;  %45 = vrot.lane.b32.xlu1 %v8_v0, %s266_s18  ;;  %s271_s23 = smov 119   ;;  %s272_s24 = smov 118  }
   0x7   :  { %s273_s25 = smov 117   ;;  %s274_s26 = smov 116  }
   0x8   :  { %s275_s27 = smov 115   ;;  %s276_s28 = smov 114  }
   0x9   :  { %s277_s29 = smov 113  }
   0xa   :  { %57 = vrot.lane.b32.xlu0 %v8_v0, %s267_s19  ;;  %69 = vrot.lane.b32.xlu1 %v8_v0, %s268_s20 }
   0xe   :  { %81 = vrot.lane.b32.xlu0 %v8_v0, %s269_s21  ;;  %93 = vrot.lane.b32.xlu1 %v8_v0, %s270_s22 }
  0x12   :  { %105 = vrot.lane.b32.xlu0 %v8_v0, %s271_s23  ;;  %117 = vrot.lane.b32.xlu1 %v8_v0, %s272_s24 }
  0x16   :  { %129 = vrot.lane.b32.xlu0 %v8_v0, %s273_s25  ;;  %141 = vrot.lane.b32.xlu1 %v8_v0, %s274_s26 }
  0x1a   :  { %153 = vrot.lane.b32.xlu0 %v8_v0, %s275_s27  ;;  %165 = vrot.lane.b32.xlu1 %v8_v0, %s276_s28 }
  0x1e   :  { %177 = vrot.lane.b32.xlu0 %v8_v0, %s277_s29 }
  0x74   :  { %v10_v1 = vpop.permute.xlu0 %9   ;;  %v34_v2 = vpop.permute.xlu1 %33  }
  0x75   :  { %188 = vst.msk [vmem:[%s548_s1 + $0x1] ss:$16 sm:$0x3] %vm3_vm0, %v10_v1   ;;  %189 = vst.msk [vmem:[%s548_s1 + $0x1] ss:$16 sm:$0xc] %vm3_vm0, %v10_v1  }
  0x76   :  { %190 = vst.msk [vmem:[%s548_s1 + $0x1] ss:$16 sm:$0x30] %vm3_vm0, %v10_v1   ;;  %191 = vst.msk [vmem:[%s548_s1 + $0x1] ss:$16 sm:$0xc0] %vm3_vm0, %v10_v1  }
  0x77   :  { %196 = vst.msk [vmem:[%s548_s1 + $0x3] ss:$16 sm:$0x3] %vm3_vm0, %v34_v2   ;;  %197 = vst.msk [vmem:[%s548_s1 + $0x3] ss:$16 sm:$0xc] %vm3_vm0, %v34_v2  }
  0x78   :  { %198 = vst.msk [vmem:[%s548_s1 + $0x3] ss:$16 sm:$0x30] %vm3_vm0, %v34_v2   ;;  %199 = vst.msk [vmem:[%s548_s1 + $0x3] ss:$16 sm:$0xc0] %vm3_vm0, %v34_v2   ;;  %v22_v3 = vpop.permute.xlu0 %21   ;;  %v46_v4 = vpop.permute.xlu1 %45  }
  0x79   :  { %192 = vst.msk [vmem:[%s548_s1 + $0x2] ss:$16 sm:$0x3] %vm3_vm0, %v22_v3   ;;  %193 = vst.msk [vmem:[%s548_s1 + $0x2] ss:$16 sm:$0xc] %vm3_vm0, %v22_v3  }
  0x7a   :  { %194 = vst.msk [vmem:[%s548_s1 + $0x2] ss:$16 sm:$0x30] %vm3_vm0, %v22_v3   ;;  %195 = vst.msk [vmem:[%s548_s1 + $0x2] ss:$16 sm:$0xc0] %vm3_vm0, %v22_v3  }
  0x7b   :  { %200 = vst.msk [vmem:[%s548_s1 + $0x4] ss:$16 sm:$0x3] %vm3_vm0, %v46_v4   ;;  %201 = vst.msk [vmem:[%s548_s1 + $0x4] ss:$16 sm:$0xc] %vm3_vm0, %v46_v4  }
  0x7c   :  { %202 = vst.msk [vmem:[%s548_s1 + $0x4] ss:$16 sm:$0x30] %vm3_vm0, %v46_v4   ;;  %203 = vst.msk [vmem:[%s548_s1 + $0x4] ss:$16 sm:$0xc0] %vm3_vm0, %v46_v4   ;;  %v58_v5 = vpop.permute.xlu0 %57   ;;  %v70_v6 = vpop.permute.xlu1 %69  }
  0x7d   :  { %204 = vst.msk [vmem:[%s548_s1 + $0x5] ss:$16 sm:$0x3] %vm3_vm0, %v58_v5   ;;  %205 = vst.msk [vmem:[%s548_s1 + $0x5] ss:$16 sm:$0xc] %vm3_vm0, %v58_v5  }
  0x7e   :  { %206 = vst.msk [vmem:[%s548_s1 + $0x5] ss:$16 sm:$0x30] %vm3_vm0, %v58_v5   ;;  %207 = vst.msk [vmem:[%s548_s1 + $0x5] ss:$16 sm:$0xc0] %vm3_vm0, %v58_v5  }
  0x7f   :  { %208 = vst.msk [vmem:[%s548_s1 + $0x6] ss:$16 sm:$0x3] %vm3_vm0, %v70_v6   ;;  %209 = vst.msk [vmem:[%s548_s1 + $0x6] ss:$16 sm:$0xc] %vm3_vm0, %v70_v6  }
  0x80   :  { %210 = vst.msk [vmem:[%s548_s1 + $0x6] ss:$16 sm:$0x30] %vm3_vm0, %v70_v6   ;;  %211 = vst.msk [vmem:[%s548_s1 + $0x6] ss:$16 sm:$0xc0] %vm3_vm0, %v70_v6   ;;  %v82_v7 = vpop.permute.xlu0 %81   ;;  %v94_v8 = vpop.permute.xlu1 %93  }
  0x81   :  { %212 = vst.msk [vmem:[%s548_s1 + $0x7] ss:$16 sm:$0x3] %vm3_vm0, %v82_v7   ;;  %213 = vst.msk [vmem:[%s548_s1 + $0x7] ss:$16 sm:$0xc] %vm3_vm0, %v82_v7  }
  0x82   :  { %214 = vst.msk [vmem:[%s548_s1 + $0x7] ss:$16 sm:$0x30] %vm3_vm0, %v82_v7   ;;  %215 = vst.msk [vmem:[%s548_s1 + $0x7] ss:$16 sm:$0xc0] %vm3_vm0, %v82_v7  }
  0x83   :  { %216 = vst.msk [vmem:[%s548_s1 + $0x8] ss:$16 sm:$0x3] %vm3_vm0, %v94_v8   ;;  %217 = vst.msk [vmem:[%s548_s1 + $0x8] ss:$16 sm:$0xc] %vm3_vm0, %v94_v8  }
  0x84   :  { %218 = vst.msk [vmem:[%s548_s1 + $0x8] ss:$16 sm:$0x30] %vm3_vm0, %v94_v8   ;;  %219 = vst.msk [vmem:[%s548_s1 + $0x8] ss:$16 sm:$0xc0] %vm3_vm0, %v94_v8   ;;  %v106_v9 = vpop.permute.xlu0 %105   ;;  %v118_v10 = vpop.permute.xlu1 %117  }
  0x85   :  { %220 = vst.msk [vmem:[%s548_s1 + $0x9] ss:$16 sm:$0x3] %vm3_vm0, %v106_v9   ;;  %221 = vst.msk [vmem:[%s548_s1 + $0x9] ss:$16 sm:$0xc] %vm3_vm0, %v106_v9  }
  0x86   :  { %222 = vst.msk [vmem:[%s548_s1 + $0x9] ss:$16 sm:$0x30] %vm3_vm0, %v106_v9   ;;  %223 = vst.msk [vmem:[%s548_s1 + $0x9] ss:$16 sm:$0xc0] %vm3_vm0, %v106_v9  }
  0x87   :  { %224 = vst.msk [vmem:[%s548_s1 + $0xa] ss:$16 sm:$0x3] %vm3_vm0, %v118_v10   ;;  %225 = vst.msk [vmem:[%s548_s1 + $0xa] ss:$16 sm:$0xc] %vm3_vm0, %v118_v10  }
  0x88   :  { %226 = vst.msk [vmem:[%s548_s1 + $0xa] ss:$16 sm:$0x30] %vm3_vm0, %v118_v10   ;;  %227 = vst.msk [vmem:[%s548_s1 + $0xa] ss:$16 sm:$0xc0] %vm3_vm0, %v118_v10   ;;  %v130_v11 = vpop.permute.xlu0 %129   ;;  %v142_v12 = vpop.permute.xlu1 %141  }
  0x89   :  { %228 = vst.msk [vmem:[%s548_s1 + $0xb] ss:$16 sm:$0x3] %vm3_vm0, %v130_v11   ;;  %229 = vst.msk [vmem:[%s548_s1 + $0xb] ss:$16 sm:$0xc] %vm3_vm0, %v130_v11  }
  0x8a   :  { %230 = vst.msk [vmem:[%s548_s1 + $0xb] ss:$16 sm:$0x30] %vm3_vm0, %v130_v11   ;;  %231 = vst.msk [vmem:[%s548_s1 + $0xb] ss:$16 sm:$0xc0] %vm3_vm0, %v130_v11  }
  0x8b   :  { %232 = vst.msk [vmem:[%s548_s1 + $0xc] ss:$16 sm:$0x3] %vm3_vm0, %v142_v12   ;;  %233 = vst.msk [vmem:[%s548_s1 + $0xc] ss:$16 sm:$0xc] %vm3_vm0, %v142_v12  }
  0x8c   :  { %234 = vst.msk [vmem:[%s548_s1 + $0xc] ss:$16 sm:$0x30] %vm3_vm0, %v142_v12   ;;  %235 = vst.msk [vmem:[%s548_s1 + $0xc] ss:$16 sm:$0xc0] %vm3_vm0, %v142_v12   ;;  %v154_v13 = vpop.permute.xlu0 %153   ;;  %v166_v14 = vpop.permute.xlu1 %165  }
  0x8d   :  { %236 = vst.msk [vmem:[%s548_s1 + $0xd] ss:$16 sm:$0x3] %vm3_vm0, %v154_v13   ;;  %237 = vst.msk [vmem:[%s548_s1 + $0xd] ss:$16 sm:$0xc] %vm3_vm0, %v154_v13  }
  0x8e   :  { %238 = vst.msk [vmem:[%s548_s1 + $0xd] ss:$16 sm:$0x30] %vm3_vm0, %v154_v13   ;;  %239 = vst.msk [vmem:[%s548_s1 + $0xd] ss:$16 sm:$0xc0] %vm3_vm0, %v154_v13  }
  0x8f   :  { %240 = vst.msk [vmem:[%s548_s1 + $0xe] ss:$16 sm:$0x3] %vm3_vm0, %v166_v14   ;;  %241 = vst.msk [vmem:[%s548_s1 + $0xe] ss:$16 sm:$0xc] %vm3_vm0, %v166_v14  }
  0x90   :  { %242 = vst.msk [vmem:[%s548_s1 + $0xe] ss:$16 sm:$0x30] %vm3_vm0, %v166_v14   ;;  %243 = vst.msk [vmem:[%s548_s1 + $0xe] ss:$16 sm:$0xc0] %vm3_vm0, %v166_v14   ;;  %v178_v15 = vpop.permute.xlu0 %177  }
  0x91   :  { %244 = vst.msk [vmem:[%s548_s1 + $0xf] ss:$16 sm:$0x3] %vm3_vm0, %v178_v15   ;;  %245 = vst.msk [vmem:[%s548_s1 + $0xf] ss:$16 sm:$0xc] %vm3_vm0, %v178_v15  }
  0x92   :  { %246 = vst.msk [vmem:[%s548_s1 + $0xf] ss:$16 sm:$0x30] %vm3_vm0, %v178_v15   ;;  %247 = vst.msk [vmem:[%s548_s1 + $0xf] ss:$16 sm:$0xc0] %vm3_vm0, %v178_v15  }

// kernel: _lambda_.11
= control target key start
LH: loop header
LB: loop body
LE: loop exit
PB: predicated region body
PF: predicated region fallthrough
CT: control target
= control target key end

     0   :  { %vm290_vm0 = vcmask 1040384   ;;  %v677_v1 = vmov 0   ;;  %vm286_vm1 = vcmask 662528   ;;  %s881_s1 = inlined_call_operand.vmem [shape: bf16[81,1024], index: 1, kind: input, shape index: {}]   ;;  %s882_s2 = inlined_call_operand.vmem [shape: f32[8,3], index: 2, kind: input, shape index: {}]   ;;  %s883_s0 = inlined_call_operand.vmem [shape: bf16[8,81], index: 0, kind: input, shape index: {}]   ;;  %s884_s3 = inlined_call_operand.vmem [shape: bf16[8,1024], index: 3, kind: output, shape index: {}]  }
   0x1   :  { %v56_v0 = vld [vmem:[%s881_s1 + $0x140] sm:$0x11]  ;;  %v704_v2 = vsel %vm290_vm0, 65535, %v677_v1  ;;  %v57_v3 = vld [vmem:[%s881_s1 + $0x148] sm:$0x11]  ;;  %349 = vmatprep.mubr.bf16.mxu0 %v677_v1  ;;  %390 = vmatprep.mubr.bf16.mxu1 %v677_v1  ;;  %v50_v61 = vld [vmem:[%s881_s1 + $0x110] sm:$0xff] }
   0x2   :  { %v48_v4 = vld [vmem:[%s881_s1 + $0x100] sm:$0xff]  ;;  %v641_v5 = vcombine.high %v56_v0, %v56_v0  ;;  %v643_v6 = vcombine.high %v57_v3, %v57_v3  ;;  %v640_v7 = vcombine.low %v56_v0, %v56_v0  ;;  %v642_v8 = vcombine.low %v57_v3, %v57_v3  ;;  %v49_v10 = vld [vmem:[%s881_s1 + $0x108] sm:$0xff]  ;;  %663 = vset.pattern.permute.xlu0 %v677_v1  ;;  %v58_v47 = vld [vmem:[%s881_s1 + $0x150] sm:$0x11] }
   0x3   :  { %v52_v9 = vld [vmem:[%s881_s1 + $0x120] sm:$0xff]  ;;  %v53_v11 = vld [vmem:[%s881_s1 + $0x128] sm:$0xff]  ;;  %v59_v48 = vld [vmem:[%s881_s1 + $0x158] sm:$0x11]  ;;  %v645_v53 = vcombine.high %v58_v47, %v58_v47  ;;  %v644_v57 = vcombine.low %v58_v47, %v58_v47 }
   0x4   :  { %v633_v12 = vcombine.high %v48_v4, %v52_v9  ;;  %v635_v13 = vcombine.high %v49_v10, %v53_v11  ;;  %v297_v14 = vand.u32 %v641_v5, %v704_v2  ;;  %v303_v15 = vand.u32 %v643_v6, %v704_v2  ;;  %v40_v18 = vld [vmem:[%s881_s1 + $0xc0] sm:$0xff]  ;;  %v41_v20 = vld [vmem:[%s881_s1 + $0xc8] sm:$0xff]  ;;  %v54_v62 = vld [vmem:[%s881_s1 + $0x130] sm:$0xff] }
   0x5   :  { %v294_v16 = vand.u32 %v640_v7, %v704_v2  ;;  %v300_v17 = vand.u32 %v642_v8, %v704_v2  ;;  %v44_v19 = vld [vmem:[%s881_s1 + $0xe0] sm:$0xff]  ;;  %v45_v21 = vld [vmem:[%s881_s1 + $0xe8] sm:$0xff]  ;;  %v632_v22 = vcombine.low %v48_v4, %v52_v9  ;;  %v634_v23 = vcombine.low %v49_v10, %v53_v11  ;;  %v51_v63 = vld [vmem:[%s881_s1 + $0x118] sm:$0xff] }
   0x6   :  { %321 = vmatprep.subr.bf16.mxu0 %v297_v14  ;;  %362 = vmatprep.subr.bf16.mxu1 %v303_v15  ;;  %v625_v24 = vcombine.high %v40_v18, %v44_v19  ;;  %v627_v25 = vcombine.high %v41_v20, %v45_v21  ;;  %v32_v26 = vld [vmem:[%s881_s1 + $0x80] sm:$0xff]  ;;  %v33_v28 = vld [vmem:[%s881_s1 + $0x88] sm:$0xff]  ;;  %v624_v30 = vcombine.low %v40_v18, %v44_v19  ;;  %v55_v0 = vld [vmem:[%s881_s1 + $0x138] sm:$0xff] }
   0x7   :  { %322 = vmatpush1.bf16.msra.mxu0 %v294_v16  ;;  %363 = vmatpush1.bf16.msra.mxu1 %v300_v17  ;;  %v36_v27 = vld [vmem:[%s881_s1 + $0xa0] sm:$0xff]  ;;  %v37_v29 = vld [vmem:[%s881_s1 + $0xa8] sm:$0xff]  ;;  %v626_v31 = vcombine.low %v41_v20, %v45_v21  ;;  %v647_v54 = vcombine.high %v59_v48, %v59_v48  ;;  %v646_v58 = vcombine.low %v59_v48, %v59_v48  ;;  %v42_v8 = vld [vmem:[%s881_s1 + $0xd0] sm:$0xff] }
   0x8   :  { %323 = vmatprep.subr.bf16.mxu0 %v633_v12  ;;  %364 = vmatprep.subr.bf16.mxu1 %v635_v13  ;;  %v617_v32 = vcombine.high %v32_v26, %v36_v27  ;;  %v619_v33 = vcombine.high %v33_v28, %v37_v29  ;;  %v24_v34 = vld [vmem:[%s881_s1 + $0x40] sm:$0xff]  ;;  %v25_v36 = vld [vmem:[%s881_s1 + $0x48] sm:$0xff]  ;;  %v616_v38 = vcombine.low %v32_v26, %v36_v27  ;;  %v46_v9 = vld [vmem:[%s881_s1 + $0xf0] sm:$0xff] }
   0x9   :  { %v28_v35 = vld [vmem:[%s881_s1 + $0x60] sm:$0xff]  ;;  %v29_v37 = vld [vmem:[%s881_s1 + $0x68] sm:$0xff]  ;;  %v618_v39 = vcombine.low %v33_v28, %v37_v29  ;;  %v309_v59 = vand.u32 %v645_v53, %v704_v2  ;;  %v315_v60 = vand.u32 %v647_v54, %v704_v2  ;;  %v306_v4 = vand.u32 %v644_v57, %v704_v2  ;;  %v43_v10 = vld [vmem:[%s881_s1 + $0xd8] sm:$0xff] }
   0xa   :  { %v16_v40 = vld [vmem:[%s881_s1] sm:$0xff]  ;;  %v609_v41 = vcombine.high %v24_v34, %v28_v35  ;;  %v611_v42 = vcombine.high %v25_v36, %v29_v37  ;;  %v17_v44 = vld [vmem:[%s881_s1 + $0x8] sm:$0xff]  ;;  %v608_v49 = vcombine.low %v24_v34, %v28_v35  ;;  %v610_v50 = vcombine.low %v25_v36, %v29_v37  ;;  %v34_v15 = vld [vmem:[%s881_s1 + $0x90] sm:$0xff] }
   0xb   :  { %324 = vmatpush1.bf16.msra.mxu0 %v632_v22  ;;  %365 = vmatpush1.bf16.msra.mxu1 %v634_v23  ;;  %v20_v43 = vld [vmem:[%s881_s1 + $0x20] sm:$0xff]  ;;  %v21_v46 = vld [vmem:[%s881_s1 + $0x28] sm:$0xff]  ;;  %v312_v5 = vand.u32 %v646_v58, %v704_v2  ;;  %v637_v6 = vcombine.high %v50_v61, %v54_v62  ;;  %v639_v7 = vcombine.high %v51_v63, %v55_v0  ;;  %v47_v2 = vld [vmem:[%s881_s1 + $0xf8] sm:$0xff] }
   0xc   :  { %325 = vmatprep.subr.bf16.mxu0 %v625_v24  ;;  %366 = vmatprep.subr.bf16.mxu1 %v627_v25  ;;  %v776_v45 = vld [vmem:[%s882_s2] sm:$0xff]  ;;  %v601_v51 = vcombine.high %v16_v40, %v20_v43  ;;  %v603_v52 = vcombine.high %v17_v44, %v21_v46  ;;  %v600_v55 = vcombine.low %v16_v40, %v20_v43  ;;  %v38_v16 = vld [vmem:[%s881_s1 + $0xb0] sm:$0xff]  ;;  %v35_v17 = vld [vmem:[%s881_s1 + $0x98] sm:$0xff]  ;;  %v678_v40 = vmov 1  }
   0xd   :  { %63 = vperm.xlu0 %663, %v776_v45   ;;  %v602_v56 = vcombine.low %v17_v44, %v21_v46  ;;  %v805_v3 = vld [vmem:[%s883_s0] sm:$0xf]  ;;  %v636_v11 = vcombine.low %v50_v61, %v54_v62  ;;  %v638_v12 = vcombine.low %v51_v63, %v55_v0  ;;  %v629_v13 = vcombine.high %v42_v8, %v46_v9  ;;  %v39_v18 = vld [vmem:[%s881_s1 + $0xb8] sm:$0xff]  ;;  %v26_v23 = vld [vmem:[%s881_s1 + $0x50] sm:$0xff] }
   0xe   :  { %v631_v14 = vcombine.high %v43_v10, %v47_v2  ;;  %v628_v19 = vcombine.low %v42_v8, %v46_v9  ;;  %v630_v20 = vcombine.low %v43_v10, %v47_v2  ;;  %v621_v21 = vcombine.high %v34_v15, %v38_v16  ;;  %v30_v24 = vld [vmem:[%s881_s1 + $0x70] sm:$0xff]  ;;  %v31_v25 = vld [vmem:[%s881_s1 + $0x78] sm:$0xff]  ;;  %664 = vset.pattern.permute.xlu1 %v678_v40 }
   0xf   :  { %326 = vmatpush1.bf16.msra.mxu0 %v624_v30  ;;  %367 = vmatpush1.bf16.msra.mxu1 %v626_v31  ;;  %v623_v22 = vcombine.high %v35_v17, %v39_v18  ;;  %v620_v26 = vcombine.low %v34_v15, %v38_v16  ;;  %v622_v27 = vcombine.low %v35_v17, %v39_v18  ;;  %v18_v30 = vld [vmem:[%s881_s1 + $0x10] sm:$0xff] }
  0x10   :  { %327 = vmatprep.subr.bf16.mxu0 %v617_v32  ;;  %368 = vmatprep.subr.bf16.mxu1 %v619_v33  ;;  %v613_v28 = vcombine.high %v26_v23, %v30_v24  ;;  %v22_v31 = vld [vmem:[%s881_s1 + $0x30] sm:$0xff]  ;;  %v19_v32 = vld [vmem:[%s881_s1 + $0x18] sm:$0xff]  ;;  %v612_v34 = vcombine.low %v26_v23, %v30_v24 }
  0x11   :  { %v23_v33 = vld [vmem:[%s881_s1 + $0x38] sm:$0xff]  ;;  %v605_v36 = vcombine.high %v18_v30, %v22_v31  ;;  %529 = vperm.xlu1 %664, %v776_v45  }
  0x12   :  { %v607_v37 = vcombine.high %v19_v32, %v23_v33 }
  0x13   :  { %328 = vmatpush1.bf16.msra.mxu0 %v616_v38  ;;  %369 = vmatpush1.bf16.msra.mxu1 %v618_v39  ;;  %v604_v38 = vcombine.low %v18_v30, %v22_v31  ;;  %v606_v39 = vcombine.low %v19_v32, %v23_v33 }
  0x14   :  { %329 = vmatprep.subr.bf16.mxu0 %v609_v41  ;;  %370 = vmatprep.subr.bf16.mxu1 %v611_v42 }
  0x17   :  { %330 = vmatpush1.bf16.msra.mxu0 %v608_v49  ;;  %371 = vmatpush1.bf16.msra.mxu1 %v610_v50 }
  0x18   :  { %331 = vmatprep.subr.bf16.mxu0 %v601_v51  ;;  %372 = vmatprep.subr.bf16.mxu1 %v603_v52 }
  0x1b   :  { %332 = vmatpush1.bf16.msra.mxu0 %v600_v55  ;;  %373 = vmatpush1.bf16.msra.mxu1 %v602_v56 }
  0x1c   :  { %403 = vmatprep.subr.bf16.mxu0 %v309_v59  ;;  %444 = vmatprep.subr.bf16.mxu1 %v315_v60 }
  0x1e   :  { %648 = vmatmul.mubr.msk.bf16.vlgmr.msra.gmra.mxu0 %vm286_vm1, %v805_v3  ;;  %649 = vmatmul.mubr.msk.bf16.vlgmr.msra.gmra.mxu1 %vm286_vm1, %v805_v3 }
  0x1f   :  { %404 = vmatpush1.bf16.msra.mxu0 %v306_v4  ;;  %445 = vmatpush1.bf16.msra.mxu1 %v312_v5 }
  0x20   :  { %405 = vmatprep.subr.bf16.mxu0 %v637_v6  ;;  %446 = vmatprep.subr.bf16.mxu1 %v639_v7 }
  0x21   :  { %431 = vmatprep.mubr.bf16.mxu0 %v677_v1  ;;  %472 = vmatprep.mubr.bf16.mxu1 %v677_v1  ;;  %v27_v1 = vld [vmem:[%s881_s1 + $0x58] sm:$0xff] }
  0x22   :  { %v615_v29 = vcombine.high %v27_v1, %v31_v25  ;;  %v614_v35 = vcombine.low %v27_v1, %v31_v25 }
  0x23   :  { %406 = vmatpush1.bf16.msra.mxu0 %v636_v11  ;;  %447 = vmatpush1.bf16.msra.mxu1 %v638_v12  ;;  %v679_v11 = vmov 2  }
  0x24   :  { %407 = vmatprep.subr.bf16.mxu0 %v629_v13  ;;  %448 = vmatprep.subr.bf16.mxu1 %v631_v14 }
  0x25   :  { %665 = vset.pattern.permute.xlu1 %v679_v11  ;;  %666 = vset.pattern.permute.xlu0 %v679_v11 }
  0x27   :  { %408 = vmatpush1.bf16.msra.mxu0 %v628_v19  ;;  %449 = vmatpush1.bf16.msra.mxu1 %v630_v20 }
  0x28   :  { %409 = vmatprep.subr.bf16.mxu0 %v621_v21  ;;  %450 = vmatprep.subr.bf16.mxu1 %v623_v22 }
  0x2b   :  { %410 = vmatpush1.bf16.msra.mxu0 %v620_v26  ;;  %451 = vmatpush1.bf16.msra.mxu1 %v622_v27 }
  0x2c   :  { %411 = vmatprep.subr.bf16.mxu0 %v613_v28  ;;  %452 = vmatprep.subr.bf16.mxu1 %v615_v29 }
  0x2f   :  { %412 = vmatpush1.bf16.msra.mxu0 %v612_v34  ;;  %453 = vmatpush1.bf16.msra.mxu1 %v614_v35 }
  0x30   :  { %413 = vmatprep.subr.bf16.mxu0 %v605_v36  ;;  %454 = vmatprep.subr.bf16.mxu1 %v607_v37 }
  0x33   :  { %414 = vmatpush1.bf16.msra.mxu0 %v604_v38  ;;  %455 = vmatpush1.bf16.msra.mxu1 %v606_v39 }
  0x36   :  { %650 = vmatmul.mubr.msk.bf16.vlgmr.msra.gmra.mxu0 %vm286_vm1, %v805_v3  ;;  %651 = vmatmul.mubr.msk.bf16.vlgmr.msra.gmra.mxu1 %vm286_vm1, %v805_v3 }
  0x88   :  { %v64_v50 = vpop.permute.xlu0 %63 }
  0x8c   :  { %v530_v36 = vpop.permute.xlu1 %529 }
  0xde   :  { %v351_v41 = vpop.f32.mrf.mxu0  ;;  %v392_v42 = vpop.f32.mrf.mxu1 }
  0xdf   :  { %v352_v51 = vadd.f32 %v351_v41, %v64_v50  ;;  %v393_v54 = vadd.f32 %v392_v42, %v64_v50 }
  0xe0   :  { %v353_v43 = vpop.f32.mrf.mxu0  ;;  %v394_v44 = vpop.f32.mrf.mxu1 }
  0xe1   :  { %v354_v52 = vadd.f32 %v353_v43, %v64_v50  ;;  %v395_v55 = vadd.f32 %v394_v44, %v64_v50 }
  0xe2   :  { %v355_v46 = vpop.f32.mrf.mxu0  ;;  %v396_v47 = vpop.f32.mrf.mxu1 }
  0xe3   :  { %v481_v53 = vadd.f32 %v354_v52, %v352_v51 }
  0xe4   :  { %v356_v48 = vpop.f32.mrf.mxu0  ;;  %v397_v49 = vpop.f32.mrf.mxu1 }
  0xe5   :  { %v482_v56 = vadd.f32 %v481_v53, %v393_v54 }
  0xe7   :  { %v483_v59 = vadd.f32 %v482_v56, %v395_v55 }
  0xf6   :  { %v433_v57 = vpop.f32.mrf.mxu0  ;;  %v474_v58 = vpop.f32.mrf.mxu1 }
  0xf7   :  { %v434_v60 = vadd.f32 %v433_v57, %v64_v50  ;;  %v475_v5 = vadd.f32 %v474_v58, %v64_v50 }
  0xf8   :  { %v435_v61 = vpop.f32.mrf.mxu0  ;;  %v476_v62 = vpop.f32.mrf.mxu1 }
  0xf9   :  { %v484_v63 = vadd.f32 %v483_v59, %v434_v60  ;;  %v436_v0 = vadd.f32 %v435_v61, %v64_v50  ;;  %v477_v9 = vadd.f32 %v476_v62, %v64_v50 }
  0xfa   :  { %v437_v3 = vpop.f32.mrf.mxu0  ;;  %v478_v4 = vpop.f32.mrf.mxu1 }
  0xfb   :  { %v485_v6 = vadd.f32 %v484_v63, %v436_v0 }
  0xfc   :  { %v438_v7 = vpop.f32.mrf.mxu0  ;;  %v479_v8 = vpop.f32.mrf.mxu1 }
  0xfd   :  { %v486_v10 = vadd.f32 %v485_v6, %v475_v5 }
  0xff   :  { %v487_v2 = vadd.f32 %v486_v10, %v477_v9 }
 0x101   :  { %488 = vadd.xlane.f32.xlu0 %v487_v2 }
 0x18a   :  { %v489_v12 = vpop.xlane.xlu0 %488 }
 0x18b   :  { %v491_v13 = vmul.f32 0.0009765625, %v489_v12 }
 0x18d   :  { %v492_v14 = vsub.f32 %v352_v51, %v491_v13  ;;  %v493_v15 = vsub.f32 %v354_v52, %v491_v13  ;;  %v494_v16 = vsub.f32 %v393_v54, %v491_v13  ;;  %v495_v17 = vsub.f32 %v395_v55, %v491_v13 }
 0x18e   :  { %v496_v20 = vsub.f32 %v434_v60, %v491_v13  ;;  %v497_v23 = vsub.f32 %v436_v0, %v491_v13  ;;  %v498_v25 = vsub.f32 %v475_v5, %v491_v13  ;;  %v499_v28 = vsub.f32 %v477_v9, %v491_v13 }
 0x18f   :  { %v500_v18 = vmul.f32 %v492_v14, %v492_v14  ;;  %v501_v19 = vmul.f32 %v493_v15, %v493_v15  ;;  %v502_v21 = vmul.f32 %v494_v16, %v494_v16  ;;  %v503_v24 = vmul.f32 %v495_v17, %v495_v17 }
 0x190   :  { %v504_v26 = vmul.f32 %v496_v20, %v496_v20  ;;  %v505_v29 = vmul.f32 %v497_v23, %v497_v23  ;;  %v506_v31 = vmul.f32 %v498_v25, %v498_v25  ;;  %v507_v33 = vmul.f32 %v499_v28, %v499_v28 }
 0x191   :  { %v508_v22 = vadd.f32 %v501_v19, %v500_v18 }
 0x193   :  { %v509_v1 = vadd.f32 %v508_v22, %v502_v21 }
 0x195   :  { %v510_v27 = vadd.f32 %v509_v1, %v503_v24 }
 0x197   :  { %v511_v30 = vadd.f32 %v510_v27, %v504_v26 }
 0x199   :  { %v512_v32 = vadd.f32 %v511_v30, %v505_v29 }
 0x19b   :  { %v513_v34 = vadd.f32 %v512_v32, %v506_v31 }
 0x19d   :  { %v514_v35 = vadd.f32 %v513_v34, %v507_v33 }
 0x19f   :  { %515 = vadd.xlane.f32.xlu1 %v514_v35 }
 0x1b0   :  { %541 = vperm.xlu1 %665, %v776_v45  }
 0x228   :  { %v516_v37 = vpop.xlane.xlu1 %515 }
 0x229   :  { %v517_v38 = vmul.f32 0.0009765625, %v516_v37 }
 0x22b   :  { %v518_v39 = vadd.f32 1e-05, %v517_v38 }
 0x22c   :  { %v542_v50 = vpop.permute.xlu1 %541 }
 0x22d   :  { %675 = vrsqrt.f32 %v518_v39 }
 0x23a   :  { %v676_v40 = vpop.eup %675 }
 0x23b   :  { %v520_v41 = vmul.f32 %v676_v40, %v492_v14  ;;  %v521_v42 = vmul.f32 %v676_v40, %v493_v15  ;;  %v522_v43 = vmul.f32 %v676_v40, %v494_v16  ;;  %v523_v44 = vmul.f32 %v676_v40, %v495_v17 }
 0x23c   :  { %v524_v46 = vmul.f32 %v676_v40, %v496_v20  ;;  %v525_v47 = vmul.f32 %v676_v40, %v497_v23  ;;  %v526_v48 = vmul.f32 %v676_v40, %v498_v25  ;;  %v527_v49 = vmul.f32 %v676_v40, %v499_v28 }
 0x23d   :  { %v532_v51 = vmul.f32 %v530_v36, %v520_v41  ;;  %v533_v52 = vmul.f32 %v530_v36, %v521_v42  ;;  %v534_v53 = vmul.f32 %v530_v36, %v522_v43  ;;  %v535_v54 = vmul.f32 %v530_v36, %v523_v44 }
 0x23e   :  { %v536_v45 = vmul.f32 %v530_v36, %v524_v46  ;;  %v537_v55 = vmul.f32 %v530_v36, %v525_v47  ;;  %v538_v56 = vmul.f32 %v530_v36, %v526_v48  ;;  %v539_v57 = vmul.f32 %v530_v36, %v527_v49 }
 0x23f   :  { %v544_v58 = vadd.f32 %v542_v50, %v532_v51  ;;  %v545_v59 = vadd.f32 %v542_v50, %v533_v52  ;;  %v546_v60 = vadd.f32 %v542_v50, %v534_v53  ;;  %v547_v61 = vadd.f32 %v542_v50, %v535_v54 }
 0x240   :  { %v548_v62 = vadd.f32 %v542_v50, %v536_v45  ;;  %v549_v63 = vadd.f32 %v542_v50, %v537_v55  ;;  %v550_v0 = vadd.f32 %v542_v50, %v538_v56  ;;  %v551_v3 = vadd.f32 %v542_v50, %v539_v57 }
 0x241   :  { %v552_v4 = vmax.f32 %v544_v58, 0.0  ;;  %v553_v5 = vmax.f32 %v545_v59, 0.0  ;;  %v554_v6 = vmax.f32 %v546_v60, 0.0  ;;  %v555_v7 = vmax.f32 %v547_v61, 0.0 }
 0x242   :  { %v556_v8 = vmax.f32 %v548_v62, 0.0  ;;  %v557_v9 = vmax.f32 %v549_v63, 0.0  ;;  %v558_v10 = vmax.f32 %v550_v0, 0.0  ;;  %v559_v2 = vmax.f32 %v551_v3, 0.0 }
 0x243   :  { %v656_v11 = vpack.c.bf16 %v553_v5, %v552_v4  ;;  %v657_v12 = vpack.c.bf16 %v555_v7, %v554_v6 }
 0x244   :  { %v658_v13 = vpack.c.bf16 %v557_v9, %v556_v8  ;;  %v659_v14 = vpack.c.bf16 %v559_v2, %v558_v10 }
 0x245   :  { %592 = vst [vmem:[%s884_s3] sm:$0xff] %v656_v11  ;;  %593 = vst [vmem:[%s884_s3 + $0x8] sm:$0xff] %v657_v12 }
 0x246   :  { %594 = vst [vmem:[%s884_s3 + $0x10] sm:$0xff] %v658_v13  ;;  %595 = vst [vmem:[%s884_s3 + $0x18] sm:$0xff] %v659_v14 }

// kernel: _lambda_.12
= control target key start
LH: loop header
LB: loop body
LE: loop exit
PB: predicated region body
PF: predicated region fallthrough
CT: control target
= control target key end

     0   :  { %v308_v0 = vmov 0   ;;  %vm146_vm0 = vcmask 719872   ;;  %vm150_vm1 = vcmask 1043456   ;;  %v309_v20 = vmov 1   ;;  %s388_s1 = inlined_call_operand.vmem [shape: bf16[216,128], index: 1, kind: input, shape index: {}]   ;;  %s389_s0 = inlined_call_operand.vmem [shape: bf16[16,216], index: 0, kind: input, shape index: {}]   ;;  %s390_s2 = inlined_call_operand.vmem [shape: f32[16,3], index: 2, kind: input, shape index: {}]   ;;  %s391_s3 = inlined_call_operand.vmem [shape: bf16[16,128], index: 3, kind: output, shape index: {}]  }
   0x1   :  { %154 = vmatprep.subr.bf16.mxu0 %v308_v0  ;;  %v287_v1 = vld [vmem:[%s388_s1 + $0x38] sm:$0xff]   ;;  %283 = vset.pattern.permute.xlu0 %v308_v0  ;;  %v288_v2 = vld [vmem:[%s388_s1 + $0x30] sm:$0xff]   ;;  %v289_v3 = vld [vmem:[%s388_s1 + $0x28] sm:$0xff]   ;;  %v310_v21 = vmov 2  }
   0x2   :  { %155 = vmatpush1.bf16.msra.mxu0 %v287_v1  ;;  %v290_v4 = vld [vmem:[%s388_s1 + $0x20] sm:$0xff]   ;;  %v291_v5 = vld [vmem:[%s388_s1 + $0x18] sm:$0xff]   ;;  %v45_v8 = vld [vmem:[%s390_s2 + $0x8] sm:$0xff]  ;;  %284 = vset.pattern.permute.xlu1 %v309_v20 }
   0x3   :  { %156 = vmatprep.subr.bf16.mxu0 %v308_v0  ;;  %v303_v6 = vld [vmem:[%s389_s0 + $0x4] ss:$8 sps:$4 sm:$0xff]   ;;  %v292_v9 = vld [vmem:[%s388_s1 + $0x10] sm:$0xff]   ;;  %v295_v12 = vld [vmem:[%s388_s1 + $0x68] ss:$0 sps:$4 sm:$0xff]  }
   0x4   :  { %v44_v7 = vld [vmem:[%s390_s2] sm:$0xff]  ;;  %270 = vmatprep.mubr.msk.bf16.mxu0 %vm146_vm0, %v303_v6  ;;  %v293_v10 = vld [vmem:[%s388_s1 + $0x8] sm:$0xff]   ;;  %v152_v13 = vsel %vm150_vm1, %v295_v12, 0  ;;  %v297_v15 = vld [vmem:[%s388_s1 + $0x58] sm:$0xff]  }
   0x5   :  { %48 = vperm.xlu0 %283, %v44_v7   ;;  %v294_v11 = vld [vmem:[%s388_s1] sm:$0xff]   ;;  %v298_v16 = vld [vmem:[%s388_s1 + $0x50] sm:$0xff]   ;;  %v299_v17 = vld [vmem:[%s388_s1 + $0x48] sm:$0xff]  }
   0x6   :  { %157 = vmatpush1.bf16.msra.mxu0 %v288_v2  ;;  %v296_v14 = vld [vmem:[%s388_s1 + $0x60] sm:$0xff]  }
   0x7   :  { %158 = vmatprep.subr.bf16.mxu0 %v308_v0  ;;  %v300_v18 = vld [vmem:[%s388_s1 + $0x40] sm:$0xff]  }
   0x8   :  { %v301_v19 = vld [vmem:[%s389_s0] ss:$8 sps:$4 sm:$0xff]  }
   0x9   :  { %53 = vperm.xlu0 %283, %v45_v8  }
   0xa   :  { %159 = vmatpush1.bf16.msra.mxu0 %v289_v3 }
   0xb   :  { %160 = vmatprep.subr.bf16.mxu0 %v308_v0 }
   0xd   :  { %286 = vset.pattern.permute.xlu0 %v310_v21 }
   0xe   :  { %161 = vmatpush1.bf16.msra.mxu0 %v290_v4 }
   0xf   :  { %162 = vmatprep.subr.bf16.mxu0 %v308_v0 }
  0x12   :  { %163 = vmatpush1.bf16.msra.mxu0 %v291_v5 }
  0x13   :  { %164 = vmatprep.subr.bf16.mxu0 %v308_v0 }
  0x16   :  { %165 = vmatpush1.bf16.msra.mxu0 %v292_v9 }
  0x17   :  { %166 = vmatprep.subr.bf16.mxu0 %v308_v0 }
  0x1a   :  { %167 = vmatpush1.bf16.msra.mxu0 %v293_v10 }
  0x1b   :  { %168 = vmatprep.subr.bf16.mxu0 %v308_v0 }
  0x1e   :  { %169 = vmatpush1.bf16.msra.mxu0 %v294_v11 }
  0x1f   :  { %174 = vmatprep.subr.bf16.mxu0 %v308_v0 }
  0x22   :  { %175 = vmatpush2.bf16.msra.mxu0 %v152_v13 }
  0x23   :  { %176 = vmatprep.subr.bf16.mxu0 %v308_v0 }
  0x26   :  { %177 = vmatpush2.bf16.msra.mxu0 %v296_v14 }
  0x27   :  { %178 = vmatprep.subr.bf16.mxu0 %v308_v0 }
  0x2a   :  { %179 = vmatpush2.bf16.msra.mxu0 %v297_v15 }
  0x2b   :  { %180 = vmatprep.subr.bf16.mxu0 %v308_v0 }
  0x2e   :  { %181 = vmatpush2.bf16.msra.mxu0 %v298_v16 }
  0x2f   :  { %182 = vmatprep.subr.bf16.mxu0 %v308_v0 }
  0x32   :  { %183 = vmatpush2.bf16.msra.mxu0 %v299_v17 }
  0x33   :  { %184 = vmatprep.subr.bf16.mxu0 %v308_v0 }
  0x36   :  { %185 = vmatpush2.bf16.msra.mxu0 %v300_v18 }
  0x39   :  { %187 = vmatmul.mubr.bf16.vlgmr.msra.gmra.mxu0 %v301_v19 }
  0x80   :  { %v49_v22 = vpop.permute.xlu0 %48 }
  0x84   :  { %v54_v26 = vpop.permute.xlu0 %53 }
  0xf9   :  { %v188_v23 = vpop.f32.mrf.mxu0 }
  0xfa   :  { %v189_v24 = vadd.f32 %v188_v23, %v49_v22 }
  0xfb   :  { %v190_v25 = vpop.f32.mrf.mxu0 }
  0xfc   :  { %195 = vadd.xlane.f32.xlu1 %v189_v24 }
  0xfd   :  { %v191_v27 = vpop.f32.mrf.mxu0 }
  0xfe   :  { %v192_v28 = vadd.f32 %v191_v27, %v54_v26 }
  0xff   :  { %v193_v29 = vpop.f32.mrf.mxu0 }
 0x100   :  { %197 = vadd.xlane.f32.xlu1 %v192_v28 }
 0x111   :  { %219 = vperm.xlu1 %284, %v44_v7  }
 0x115   :  { %223 = vperm.xlu1 %284, %v45_v8  }
 0x119   :  { %285 = vset.pattern.permute.xlu1 %v310_v21 }
 0x11a   :  { %229 = vperm.xlu1 %285, %v44_v7  }
 0x185   :  { %v196_v30 = vpop.xlane.xlu1 %195 }
 0x186   :  { %v200_v31 = vmul.f32 0.0078125, %v196_v30 }
 0x188   :  { %v202_v32 = vsub.f32 %v189_v24, %v200_v31 }
 0x189   :  { %v198_v33 = vpop.xlane.xlu1 %197 }
 0x18a   :  { %v201_v34 = vmul.f32 0.0078125, %v198_v33  ;;  %v204_v35 = vmul.f32 %v202_v32, %v202_v32 }
 0x18c   :  { %v203_v36 = vsub.f32 %v192_v28, %v201_v34  ;;  %206 = vadd.xlane.f32.xlu0 %v204_v35 }
 0x18d   :  { %v220_v38 = vpop.permute.xlu1 %219 }
 0x18e   :  { %v205_v37 = vmul.f32 %v203_v36, %v203_v36 }
 0x190   :  { %208 = vadd.xlane.f32.xlu1 %v205_v37 }
 0x191   :  { %v224_v39 = vpop.permute.xlu1 %223 }
 0x195   :  { %v230_v40 = vpop.permute.xlu1 %229 }
 0x1a1   :  { %233 = vperm.xlu1 %285, %v45_v8  }
 0x215   :  { %v207_v41 = vpop.xlane.xlu0 %206 }
 0x216   :  { %v210_v42 = vmul.f32 0.0078125, %v207_v41 }
 0x218   :  { %v212_v43 = vadd.f32 1e-05, %v210_v42 }
 0x219   :  { %v209_v44 = vpop.xlane.xlu1 %208 }
 0x21a   :  { %304 = vrsqrt.f32 %v212_v43  ;;  %v211_v45 = vmul.f32 0.0078125, %v209_v44 }
 0x21c   :  { %v213_v46 = vadd.f32 1e-05, %v211_v45 }
 0x21d   :  { %v234_v54 = vpop.permute.xlu1 %233 }
 0x21e   :  { %306 = vrsqrt.f32 %v213_v46 }
 0x227   :  { %v305_v47 = vpop.eup %304 }
 0x228   :  { %v216_v48 = vmul.f32 %v305_v47, %v202_v32 }
 0x22a   :  { %v226_v49 = vmul.f32 %v220_v38, %v216_v48 }
 0x22b   :  { %v307_v50 = vpop.eup %306 }
 0x22c   :  { %v217_v51 = vmul.f32 %v307_v50, %v203_v36  ;;  %v236_v53 = vadd.f32 %v230_v40, %v226_v49 }
 0x22e   :  { %v227_v52 = vmul.f32 %v224_v39, %v217_v51  ;;  %v238_v56 = vmax.f32 %v236_v53, 0.0 }
 0x230   :  { %v237_v55 = vadd.f32 %v234_v54, %v227_v52 }
 0x232   :  { %v239_v57 = vmax.f32 %v237_v55, 0.0 }
 0x234   :  { %v278_v58 = vpack.c.bf16 %v239_v57, %v238_v56 }
 0x236   :  { %279 = vst [vmem:[%s391_s3] sm:$0xff] %v278_v58  }

// kernel: _lambda_.13
= control target key start
LH: loop header
LB: loop body
LE: loop exit
PB: predicated region body
PF: predicated region fallthrough
CT: control target
= control target key end

     0   :  { %v531_v0 = vmov 0   ;;  %vm269_vm0 = vcmask 392192   ;;  %v532_v34 = vmov 1   ;;  %v533_v35 = vmov 2   ;;  %s676_s1 = inlined_call_operand.vmem [shape: bf16[432,128], index: 1, kind: input, shape index: {}]   ;;  %s677_s0 = inlined_call_operand.vmem [shape: bf16[16,432], index: 0, kind: input, shape index: {}]   ;;  %s678_s2 = inlined_call_operand.vmem [shape: f32[16,3], index: 2, kind: input, shape index: {}]   ;;  %s679_s3 = inlined_call_operand.vmem [shape: bf16[16,128], index: 3, kind: input, shape index: {}]   ;;  %s680_s4 = inlined_call_operand.vmem [shape: bf16[16,128], index: 4, kind: output, shape index: {}]  }
   0x1   :  { %314 = vmatprep.subr.bf16.mxu1 %v531_v0  ;;  %v494_v1 = vld [vmem:[%s676_s1 + $0x78] sm:$0xff]   ;;  %490 = vset.pattern.permute.xlu0 %v531_v0  ;;  %v497_v4 = vld [vmem:[%s676_s1 + $0x70] sm:$0xff]   ;;  %v500_v7 = vld [vmem:[%s676_s1 + $0x68] sm:$0xff]  }
   0x2   :  { %v495_v2 = vld [vmem:[%s676_s1 + $0xb8] sm:$0xff]   ;;  %465 = vmatprep.subr.bf16.mxu0 %v494_v1  ;;  %v498_v5 = vld [vmem:[%s676_s1 + $0xb0] sm:$0xff]   ;;  %v501_v8 = vld [vmem:[%s676_s1 + $0xa8] sm:$0xff]   ;;  %491 = vset.pattern.permute.xlu1 %v532_v34 }
   0x3   :  { %v496_v3 = vld [vmem:[%s676_s1 + $0x38] sm:$0xff]   ;;  %315 = vmatpush1.bf16.msra.mxu1 %v495_v2  ;;  %v499_v6 = vld [vmem:[%s676_s1 + $0x30] sm:$0xff]   ;;  %v502_v9 = vld [vmem:[%s676_s1 + $0x28] sm:$0xff]  }
   0x4   :  { %466 = vmatpush3.bf16.msra.mxu0 %v496_v3  ;;  %316 = vmatprep.subr.bf16.mxu1 %v531_v0  ;;  %v503_v10 = vld [vmem:[%s676_s1 + $0x60] sm:$0xff]   ;;  %v506_v13 = vld [vmem:[%s676_s1 + $0x58] sm:$0xff]   ;;  %v509_v16 = vld [vmem:[%s676_s1 + $0x50] sm:$0xff]  }
   0x5   :  { %467 = vmatprep.subr.bf16.mxu0 %v497_v4  ;;  %v504_v11 = vld [vmem:[%s676_s1 + $0xa0] sm:$0xff]   ;;  %v507_v14 = vld [vmem:[%s676_s1 + $0x98] sm:$0xff]   ;;  %v510_v17 = vld [vmem:[%s676_s1 + $0x90] sm:$0xff]  }
   0x6   :  { %v505_v12 = vld [vmem:[%s676_s1 + $0x20] sm:$0xff]   ;;  %v508_v15 = vld [vmem:[%s676_s1 + $0x18] sm:$0xff]   ;;  %v511_v18 = vld [vmem:[%s676_s1 + $0x10] sm:$0xff]  }
   0x7   :  { %317 = vmatpush1.bf16.msra.mxu1 %v498_v5  ;;  %v512_v19 = vld [vmem:[%s676_s1 + $0x48] sm:$0xff]   ;;  %v515_v22 = vld [vmem:[%s676_s1 + $0x40] sm:$0xff]   ;;  %v521_v29 = vld [vmem:[%s676_s1 + $0xd0] sm:$0xff]  }
   0x8   :  { %468 = vmatpush3.bf16.msra.mxu0 %v499_v6  ;;  %318 = vmatprep.subr.bf16.mxu1 %v531_v0  ;;  %v513_v20 = vld [vmem:[%s676_s1 + $0x88] sm:$0xff]   ;;  %v520_v23 = vld [vmem:[%s677_s0 + $0x4] ss:$16 sps:$4 sm:$0xff]   ;;  %v518_v28 = vld [vmem:[%s677_s0] ss:$16 sps:$4 sm:$0xff]  }
   0x9   :  { %469 = vmatprep.subr.bf16.mxu0 %v500_v7  ;;  %v514_v21 = vld [vmem:[%s676_s1 + $0x8] sm:$0xff]   ;;  %v516_v24 = vld [vmem:[%s676_s1 + $0x80] sm:$0xff]   ;;  %305 = vmatprep.mubr.bf16.mxu0 %v520_v23 }
   0xa   :  { %v517_v25 = vld [vmem:[%s676_s1] sm:$0xff]   ;;  %v526_v26 = vld [vmem:[%s677_s0 + $0xc] ss:$16 sps:$4 sm:$0xff]   ;;  %v524_v33 = vld [vmem:[%s677_s0 + $0x8] ss:$16 sps:$4 sm:$0xff]  }
   0xb   :  { %319 = vmatpush1.bf16.msra.mxu1 %v501_v8  ;;  %v76_v27 = vld [vmem:[%s678_s2] sm:$0xff]  ;;  %451 = vmatprep.mubr.msk.bf16.mxu1 %vm269_vm0, %v526_v26  ;;  %v77_v30 = vld [vmem:[%s678_s2 + $0x8] sm:$0xff] }
   0xc   :  { %470 = vmatpush3.bf16.msra.mxu0 %v502_v9  ;;  %320 = vmatprep.subr.bf16.mxu1 %v531_v0  ;;  %v522_v31 = vld [vmem:[%s676_s1 + $0xc8] sm:$0xff]   ;;  %v523_v32 = vld [vmem:[%s676_s1 + $0xc0] sm:$0xff]  }
   0xd   :  { %471 = vmatprep.subr.bf16.mxu0 %v503_v10  ;;  %80 = vperm.xlu0 %490, %v76_v27  }
   0xf   :  { %321 = vmatpush1.bf16.msra.mxu1 %v504_v11  ;;  %v457_v11 = vld [vmem:[%s679_s3] sm:$0xff]  }
  0x10   :  { %472 = vmatpush3.bf16.msra.mxu0 %v505_v12  ;;  %322 = vmatprep.subr.bf16.mxu1 %v531_v0 }
  0x11   :  { %473 = vmatprep.subr.bf16.mxu0 %v506_v13  ;;  %85 = vperm.xlu0 %490, %v77_v30  }
  0x13   :  { %323 = vmatpush1.bf16.msra.mxu1 %v507_v14 }
  0x14   :  { %474 = vmatpush3.bf16.msra.mxu0 %v508_v15  ;;  %324 = vmatprep.subr.bf16.mxu1 %v531_v0  ;;  %v458_v15 = vunpack.c.l.bf16 %v457_v11 }
  0x15   :  { %475 = vmatprep.subr.bf16.mxu0 %v509_v16  ;;  %493 = vset.pattern.permute.xlu0 %v533_v35  ;;  %v459_v16 = vunpack.c.h.bf16 %v457_v11 }
  0x17   :  { %325 = vmatpush1.bf16.msra.mxu1 %v510_v17 }
  0x18   :  { %476 = vmatpush3.bf16.msra.mxu0 %v511_v18  ;;  %326 = vmatprep.subr.bf16.mxu1 %v531_v0 }
  0x19   :  { %477 = vmatprep.subr.bf16.mxu0 %v512_v19 }
  0x1b   :  { %327 = vmatpush1.bf16.msra.mxu1 %v513_v20 }
  0x1c   :  { %478 = vmatpush3.bf16.msra.mxu0 %v514_v21  ;;  %328 = vmatprep.subr.bf16.mxu1 %v531_v0 }
  0x1d   :  { %479 = vmatprep.subr.bf16.mxu0 %v515_v22 }
  0x1f   :  { %329 = vmatpush1.bf16.msra.mxu1 %v516_v24 }
  0x20   :  { %480 = vmatpush3.bf16.msra.mxu0 %v517_v25  ;;  %340 = vmatprep.subr.bf16.mxu1 %v531_v0 }
  0x23   :  { %306 = vmatmul.mubr.bf16.vlgmr.msra.gmra.mxu0 %v518_v28  ;;  %341 = vmatpush2.bf16.msra.mxu1 %v521_v29 }
  0x24   :  { %342 = vmatprep.subr.bf16.mxu1 %v531_v0 }
  0x27   :  { %343 = vmatpush2.bf16.msra.mxu1 %v522_v31 }
  0x28   :  { %344 = vmatprep.subr.bf16.mxu1 %v531_v0 }
  0x2b   :  { %345 = vmatpush2.bf16.msra.mxu1 %v523_v32 }
  0x2e   :  { %347 = vmatmul.mubr.bf16.vlgmr.msra.gmra.mxu1 %v524_v33 }
  0x88   :  { %v81_v39 = vpop.permute.xlu0 %80 }
  0x8c   :  { %v86_v44 = vpop.permute.xlu0 %85 }
  0xe3   :  { %v481_v36 = vpop.f32.mrf.mxu0 }
  0xe5   :  { %v482_v37 = vpop.f32.mrf.mxu0 }
  0xe6   :  { %v483_v40 = vadd.f32 %v482_v37, %v481_v36 }
  0xe7   :  { %v484_v38 = vpop.f32.mrf.mxu0 }
  0xe8   :  { %v308_v42 = vadd.f32 %v483_v40, %v81_v39 }
  0xe9   :  { %v485_v41 = vpop.f32.mrf.mxu0 }
  0xea   :  { %v486_v43 = vadd.f32 %v485_v41, %v484_v38 }
  0xec   :  { %v311_v48 = vadd.f32 %v486_v43, %v86_v44 }
  0xee   :  { %v348_v45 = vpop.f32.mrf.mxu1 }
  0xef   :  { %v349_v46 = vadd.f32 %v348_v45, %v308_v42 }
  0xf0   :  { %v350_v47 = vpop.f32.mrf.mxu1 }
  0xf1   :  { %355 = vadd.xlane.f32.xlu1 %v349_v46 }
  0xf2   :  { %v351_v49 = vpop.f32.mrf.mxu1 }
  0xf3   :  { %v352_v50 = vadd.f32 %v351_v49, %v311_v48 }
  0xf4   :  { %v353_v51 = vpop.f32.mrf.mxu1 }
  0xf5   :  { %357 = vadd.xlane.f32.xlu1 %v352_v50 }
 0x106   :  { %379 = vperm.xlu1 %491, %v76_v27  }
 0x10a   :  { %383 = vperm.xlu1 %491, %v77_v30  }
 0x10e   :  { %492 = vset.pattern.permute.xlu1 %v533_v35 }
 0x10f   :  { %389 = vperm.xlu1 %492, %v76_v27  }
 0x17a   :  { %v356_v52 = vpop.xlane.xlu1 %355 }
 0x17b   :  { %v360_v53 = vmul.f32 0.0078125, %v356_v52 }
 0x17d   :  { %v362_v54 = vsub.f32 %v349_v46, %v360_v53 }
 0x17e   :  { %v358_v55 = vpop.xlane.xlu1 %357 }
 0x17f   :  { %v361_v56 = vmul.f32 0.0078125, %v358_v55  ;;  %v364_v57 = vmul.f32 %v362_v54, %v362_v54 }
 0x181   :  { %v363_v58 = vsub.f32 %v352_v50, %v361_v56  ;;  %366 = vadd.xlane.f32.xlu0 %v364_v57 }
 0x182   :  { %v380_v60 = vpop.permute.xlu1 %379 }
 0x183   :  { %v365_v59 = vmul.f32 %v363_v58, %v363_v58 }
 0x185   :  { %368 = vadd.xlane.f32.xlu1 %v365_v59 }
 0x186   :  { %v384_v61 = vpop.permute.xlu1 %383 }
 0x18a   :  { %v390_v62 = vpop.permute.xlu1 %389 }
 0x196   :  { %393 = vperm.xlu1 %492, %v77_v30  }
 0x20a   :  { %v367_v63 = vpop.xlane.xlu0 %366 }
 0x20b   :  { %v370_v0 = vmul.f32 0.0078125, %v367_v63 }
 0x20d   :  { %v372_v1 = vadd.f32 1e-05, %v370_v0 }
 0x20e   :  { %v369_v2 = vpop.xlane.xlu1 %368 }
 0x20f   :  { %527 = vrsqrt.f32 %v372_v1  ;;  %v371_v3 = vmul.f32 0.0078125, %v369_v2 }
 0x211   :  { %v373_v4 = vadd.f32 1e-05, %v371_v3 }
 0x212   :  { %v394_v13 = vpop.permute.xlu1 %393 }
 0x213   :  { %529 = vrsqrt.f32 %v373_v4 }
 0x21c   :  { %v528_v5 = vpop.eup %527 }
 0x21d   :  { %v376_v6 = vmul.f32 %v528_v5, %v362_v54 }
 0x21f   :  { %v386_v7 = vmul.f32 %v380_v60, %v376_v6 }
 0x220   :  { %v530_v8 = vpop.eup %529 }
 0x221   :  { %v377_v9 = vmul.f32 %v530_v8, %v363_v58  ;;  %v396_v10 = vadd.f32 %v390_v62, %v386_v7 }
 0x223   :  { %v387_v12 = vmul.f32 %v384_v61, %v377_v9  ;;  %v398_v14 = vmax.f32 %v396_v10, 0.0 }
 0x225   :  { %v397_v17 = vadd.f32 %v394_v13, %v387_v12  ;;  %v404_v19 = vadd.f32 %v458_v15, %v398_v14 }
 0x227   :  { %v399_v18 = vmax.f32 %v397_v17, 0.0 }
 0x229   :  { %v405_v20 = vadd.f32 %v459_v16, %v399_v18 }
 0x22b   :  { %v463_v21 = vpack.c.bf16 %v405_v20, %v404_v19 }
 0x22d   :  { %464 = vst [vmem:[%s680_s4] sm:$0xff] %v463_v21  }

// kernel: _lambda_.14
= control target key start
LH: loop header
LB: loop body
LE: loop exit
PB: predicated region body
PF: predicated region fallthrough
CT: control target
= control target key end

     0   :  { %v658_v0 = vmov 0   ;;  %vm301_vm0 = vcmask 392192   ;;  %v659_v40 = vmov 1   ;;  %vm406_vm1 = vcmask 130048   ;;  %s857_s1 = inlined_call_operand.vmem [shape: bf16[432,16], index: 1, kind: input, shape index: {}]   ;;  %s858_s0 = inlined_call_operand.vmem [shape: bf16[32,432], index: 0, kind: input, shape index: {}]   ;;  %s859_s2 = inlined_call_operand.vmem [shape: f32[32,3], index: 2, kind: input, shape index: {}]   ;;  %s860_s3 = inlined_call_operand.vmem [shape: bf16[32,16], index: 3, kind: output, shape index: {}]  }
   0x1   :  { %357 = vmatprep.subr.bf16.mxu1 %v658_v0  ;;  %v611_v1 = vld [vmem:[%s857_s1 + $0x78] sm:$0xff]   ;;  %605 = vset.pattern.permute.xlu0 %v658_v0  ;;  %v614_v4 = vld [vmem:[%s857_s1 + $0x70] sm:$0xff]   ;;  %v617_v7 = vld [vmem:[%s857_s1 + $0x68] sm:$0xff]   ;;  %vm520_vm2 = vcmask 125952  }
   0x2   :  { %v612_v2 = vld [vmem:[%s857_s1 + $0xb8] sm:$0xff]   ;;  %606 = vset.pattern.permute.xlu1 %v658_v0  ;;  %574 = vmatprep.subr.bf16.mxu0 %v611_v1  ;;  %v615_v5 = vld [vmem:[%s857_s1 + $0xb0] sm:$0xff]   ;;  %v618_v8 = vld [vmem:[%s857_s1 + $0xa8] sm:$0xff]  }
   0x3   :  { %v613_v3 = vld [vmem:[%s857_s1 + $0x38] sm:$0xff]   ;;  %358 = vmatpush1.bf16.msra.mxu1 %v612_v2  ;;  %v616_v6 = vld [vmem:[%s857_s1 + $0x30] sm:$0xff]   ;;  %v619_v9 = vld [vmem:[%s857_s1 + $0x28] sm:$0xff]  }
   0x4   :  { %575 = vmatpush3.bf16.msra.mxu0 %v613_v3  ;;  %359 = vmatprep.subr.bf16.mxu1 %v658_v0  ;;  %v620_v10 = vld [vmem:[%s857_s1 + $0x60] sm:$0xff]   ;;  %v623_v13 = vld [vmem:[%s857_s1 + $0x58] sm:$0xff]   ;;  %v626_v16 = vld [vmem:[%s857_s1 + $0x50] sm:$0xff]  }
   0x5   :  { %576 = vmatprep.subr.bf16.mxu0 %v614_v4  ;;  %v621_v11 = vld [vmem:[%s857_s1 + $0xa0] sm:$0xff]   ;;  %v624_v14 = vld [vmem:[%s857_s1 + $0x98] sm:$0xff]   ;;  %v627_v17 = vld [vmem:[%s857_s1 + $0x90] sm:$0xff]  }
   0x6   :  { %v622_v12 = vld [vmem:[%s857_s1 + $0x20] sm:$0xff]   ;;  %v625_v15 = vld [vmem:[%s857_s1 + $0x18] sm:$0xff]   ;;  %v628_v18 = vld [vmem:[%s857_s1 + $0x10] sm:$0xff]  }
   0x7   :  { %360 = vmatpush1.bf16.msra.mxu1 %v615_v5  ;;  %v629_v19 = vld [vmem:[%s857_s1 + $0x48] sm:$0xff]   ;;  %v632_v22 = vld [vmem:[%s857_s1 + $0x40] sm:$0xff]   ;;  %v638_v28 = vld [vmem:[%s857_s1 + $0xd0] sm:$0xff]  }
   0x8   :  { %577 = vmatpush3.bf16.msra.mxu0 %v616_v6  ;;  %361 = vmatprep.subr.bf16.mxu1 %v658_v0  ;;  %v630_v20 = vld [vmem:[%s857_s1 + $0x88] sm:$0xff]   ;;  %v637_v23 = vld [vmem:[%s858_s0 + $0x4] ss:$16 sps:$4 sm:$0xff]   ;;  %v635_v26 = vld [vmem:[%s858_s0] ss:$16 sps:$4 sm:$0xff]  }
   0x9   :  { %578 = vmatprep.subr.bf16.mxu0 %v617_v7  ;;  %v631_v21 = vld [vmem:[%s857_s1 + $0x8] sm:$0xff]   ;;  %v633_v24 = vld [vmem:[%s857_s1 + $0x80] sm:$0xff]   ;;  %340 = vmatprep.mubr.bf16.mxu0 %v637_v23  ;;  %v789_v31 = vld [vmem:[%s859_s2 + $0x10] sm:$0xff] }
   0xa   :  { %v634_v25 = vld [vmem:[%s857_s1] sm:$0xff]   ;;  %v646_v27 = vld [vmem:[%s858_s0 + $0xc] ss:$16 sps:$4 sm:$0xff]   ;;  %93 = vperm.xlu1 %606, %v789_v31   ;;  %v644_v37 = vld [vmem:[%s858_s0 + $0x8] ss:$16 sps:$4 sm:$0xff]  }
   0xb   :  { %362 = vmatpush1.bf16.msra.mxu1 %v618_v8  ;;  %v640_v29 = vld [vmem:[%s858_s0 + $0x24] ss:$16 sps:$4 sm:$0xff]   ;;  %564 = vmatprep.mubr.msk.bf16.mxu1 %vm301_vm0, %v646_v27  ;;  %v794_v32 = vld [vmem:[%s859_s2 + $0x8] sm:$0xff]  ;;  %v803_v34 = vld [vmem:[%s859_s2 + $0x18] sm:$0xff] }
   0xc   :  { %579 = vmatpush3.bf16.msra.mxu0 %v619_v9  ;;  %363 = vmatprep.subr.bf16.mxu1 %v658_v0  ;;  %v782_v30 = vld [vmem:[%s859_s2] sm:$0xff]  ;;  %v639_v33 = vld [vmem:[%s857_s1 + $0xc8] sm:$0xff]  }
   0xd   :  { %580 = vmatprep.subr.bf16.mxu0 %v620_v10  ;;  %83 = vperm.xlu0 %605, %v782_v30   ;;  %v642_v35 = vld [vmem:[%s858_s0 + $0x20] ss:$16 sps:$4 sm:$0xff]   ;;  %v647_v38 = vld [vmem:[%s858_s0 + $0x2c] ss:$16 sps:$4 sm:$0xff]   ;;  %v649_v39 = vld [vmem:[%s858_s0 + $0x28] ss:$16 sps:$4 sm:$0xff]  }
   0xe   :  { %98 = vperm.xlu1 %606, %v803_v34   ;;  %v643_v36 = vld [vmem:[%s857_s1 + $0xc0] sm:$0xff]  }
   0xf   :  { %364 = vmatpush1.bf16.msra.mxu1 %v621_v11 }
  0x10   :  { %581 = vmatpush3.bf16.msra.mxu0 %v622_v12  ;;  %365 = vmatprep.subr.bf16.mxu1 %v658_v0 }
  0x11   :  { %582 = vmatprep.subr.bf16.mxu0 %v623_v13  ;;  %88 = vperm.xlu0 %605, %v794_v32  }
  0x12   :  { %607 = vset.pattern.permute.xlu1 %v659_v40 }
  0x13   :  { %366 = vmatpush1.bf16.msra.mxu1 %v624_v14 }
  0x14   :  { %583 = vmatpush3.bf16.msra.mxu0 %v625_v15  ;;  %367 = vmatprep.subr.bf16.mxu1 %v658_v0 }
  0x15   :  { %584 = vmatprep.subr.bf16.mxu0 %v626_v16  ;;  %608 = vset.pattern.permute.xlu0 %v659_v40 }
  0x17   :  { %368 = vmatpush1.bf16.msra.mxu1 %v627_v17 }
  0x18   :  { %585 = vmatpush3.bf16.msra.mxu0 %v628_v18  ;;  %369 = vmatprep.subr.bf16.mxu1 %v658_v0 }
  0x19   :  { %586 = vmatprep.subr.bf16.mxu0 %v629_v19 }
  0x1b   :  { %370 = vmatpush1.bf16.msra.mxu1 %v630_v20 }
  0x1c   :  { %587 = vmatpush3.bf16.msra.mxu0 %v631_v21  ;;  %371 = vmatprep.subr.bf16.mxu1 %v658_v0 }
  0x1d   :  { %588 = vmatprep.subr.bf16.mxu0 %v632_v22 }
  0x1f   :  { %372 = vmatpush1.bf16.msra.mxu1 %v633_v24 }
  0x20   :  { %589 = vmatpush3.bf16.msra.mxu0 %v634_v25  ;;  %383 = vmatprep.subr.bf16.mxu1 %v658_v0 }
  0x23   :  { %341 = vmatmul.mubr.bf16.vlgmr.msra.gmra.mxu0 %v635_v26  ;;  %384 = vmatpush2.bf16.msra.mxu1 %v638_v28 }
  0x24   :  { %385 = vmatprep.subr.bf16.mxu1 %v658_v0  ;;  %348 = vmatprep.mubr.bf16.mxu0 %v640_v29 }
  0x27   :  { %386 = vmatpush2.bf16.msra.mxu1 %v639_v33 }
  0x28   :  { %387 = vmatprep.subr.bf16.mxu1 %v658_v0 }
  0x2b   :  { %349 = vmatmul.mubr.bf16.gmra.mxu0 %v642_v35  ;;  %388 = vmatpush2.bf16.msra.mxu1 %v643_v36 }
  0x2e   :  { %390 = vmatmul.mubr.bf16.vlgmr.msra.gmra.mxu1 %v644_v37  ;;  %v660_v37 = vmov 2  }
  0x2f   :  { %565 = vmatprep.mubr.msk.bf16.mxu1 %vm301_vm0, %v647_v38 }
  0x36   :  { %398 = vmatmul.mubr.bf16.gmra.mxu1 %v649_v39 }
  0x85   :  { %v94_v55 = vpop.permute.xlu1 %93 }
  0x88   :  { %v84_v44 = vpop.permute.xlu0 %83 }
  0x89   :  { %v99_v3 = vpop.permute.xlu1 %98 }
  0x8c   :  { %v89_v51 = vpop.permute.xlu0 %88 }
  0xe3   :  { %v590_v41 = vpop.f32.mrf.mxu0 }
  0xe5   :  { %v591_v42 = vpop.f32.mrf.mxu0 }
  0xe6   :  { %v592_v45 = vadd.f32 %v591_v42, %v590_v41 }
  0xe7   :  { %v593_v43 = vpop.f32.mrf.mxu0 }
  0xe8   :  { %v343_v48 = vadd.f32 %v592_v45, %v84_v44 }
  0xe9   :  { %v594_v46 = vpop.f32.mrf.mxu0 }
  0xea   :  { %v595_v49 = vadd.f32 %v594_v46, %v593_v43 }
  0xeb   :  { %v596_v47 = vpop.f32.mrf.mxu0 }
  0xec   :  { %v346_v57 = vadd.f32 %v595_v49, %v89_v51 }
  0xed   :  { %v597_v50 = vpop.f32.mrf.mxu0 }
  0xee   :  { %v391_v52 = vpop.f32.mrf.mxu1  ;;  %v598_v58 = vadd.f32 %v597_v50, %v596_v47 }
  0xef   :  { %v392_v53 = vadd.f32 %v391_v52, %v343_v48  ;;  %v599_v54 = vpop.f32.mrf.mxu0 }
  0xf0   :  { %v393_v56 = vpop.f32.mrf.mxu1  ;;  %v351_v0 = vadd.f32 %v598_v58, %v94_v55 }
  0xf1   :  { %v407_v59 = vsel %vm406_vm1, %v392_v53, 0.0  ;;  %v600_v60 = vpop.f32.mrf.mxu0 }
  0xf2   :  { %v394_v61 = vpop.f32.mrf.mxu1  ;;  %408 = vadd.xlane.f32.xlu0 %v407_v59  ;;  %v601_v1 = vadd.f32 %v600_v60, %v599_v54 }
  0xf3   :  { %v395_v62 = vadd.f32 %v394_v61, %v346_v57 }
  0xf4   :  { %v396_v63 = vpop.f32.mrf.mxu1  ;;  %v354_v7 = vadd.f32 %v601_v1, %v99_v3 }
  0xf5   :  { %v410_v2 = vsel %vm406_vm1, %v395_v62, 0.0 }
  0xf6   :  { %v399_v4 = vpop.f32.mrf.mxu1  ;;  %411 = vadd.xlane.f32.xlu1 %v410_v2 }
  0xf7   :  { %v400_v5 = vadd.f32 %v399_v4, %v351_v0 }
  0xf8   :  { %v401_v6 = vpop.f32.mrf.mxu1 }
  0xf9   :  { %v413_v8 = vsel %vm406_vm1, %v400_v5, 0.0 }
  0xfa   :  { %v402_v9 = vpop.f32.mrf.mxu1  ;;  %414 = vadd.xlane.f32.xlu0 %v413_v8 }
  0xfb   :  { %v403_v10 = vadd.f32 %v402_v9, %v354_v7 }
  0xfc   :  { %v404_v11 = vpop.f32.mrf.mxu1 }
  0xfd   :  { %v416_v12 = vsel %vm406_vm1, %v403_v10, 0.0 }
  0xfe   :  { %417 = vadd.xlane.f32.xlu0 %v416_v12 }
 0x107   :  { %461 = vperm.xlu1 %607, %v782_v30  }
 0x17b   :  { %v409_v13 = vpop.xlane.xlu0 %408 }
 0x17c   :  { %v420_v14 = vmul.f32 0.0625, %v409_v13 }
 0x17e   :  { %v424_v15 = vsub.f32 %v392_v53, %v420_v14 }
 0x17f   :  { %v412_v16 = vpop.xlane.xlu1 %411 }
 0x180   :  { %v421_v17 = vmul.f32 0.0625, %v412_v16  ;;  %v428_v18 = vmul.f32 %v424_v15, %v424_v15 }
 0x182   :  { %v425_v19 = vsub.f32 %v395_v62, %v421_v17  ;;  %v432_v20 = vsel %vm406_vm1, %v428_v18, 0.0 }
 0x183   :  { %433 = vadd.xlane.f32.xlu1 %v432_v20  ;;  %v415_v21 = vpop.xlane.xlu0 %414  ;;  %v462_v38 = vpop.permute.xlu1 %461 }
 0x184   :  { %v422_v22 = vmul.f32 0.0625, %v415_v21  ;;  %v429_v23 = vmul.f32 %v425_v19, %v425_v19 }
 0x186   :  { %v426_v24 = vsub.f32 %v400_v5, %v422_v22  ;;  %v435_v25 = vsel %vm406_vm1, %v429_v23, 0.0 }
 0x187   :  { %436 = vadd.xlane.f32.xlu0 %v435_v25  ;;  %v418_v26 = vpop.xlane.xlu0 %417 }
 0x188   :  { %v423_v27 = vmul.f32 0.0625, %v418_v26  ;;  %v430_v28 = vmul.f32 %v426_v24, %v426_v24 }
 0x18a   :  { %v427_v29 = vsub.f32 %v403_v10, %v423_v27  ;;  %v438_v33 = vsel %vm406_vm1, %v430_v28, 0.0 }
 0x18b   :  { %439 = vadd.xlane.f32.xlu1 %v438_v33 }
 0x18c   :  { %v431_v35 = vmul.f32 %v427_v29, %v427_v29 }
 0x18e   :  { %v441_v36 = vsel %vm406_vm1, %v431_v35, 0.0 }
 0x18f   :  { %442 = vadd.xlane.f32.xlu0 %v441_v36 }
 0x19c   :  { %469 = vperm.xlu1 %607, %v789_v31  }
 0x1a0   :  { %473 = vperm.xlu1 %607, %v803_v34  }
 0x1a4   :  { %609 = vset.pattern.permute.xlu1 %v660_v37 }
 0x1a5   :  { %481 = vperm.xlu1 %609, %v782_v30   ;;  %465 = vperm.xlu0 %608, %v794_v32  }
 0x1a9   :  { %485 = vperm.xlu1 %609, %v794_v32   ;;  %610 = vset.pattern.permute.xlu0 %v660_v37 }
 0x1ad   :  { %489 = vperm.xlu1 %609, %v789_v31  }
 0x1b1   :  { %493 = vperm.xlu1 %609, %v803_v34  }
 0x20c   :  { %v434_v39 = vpop.xlane.xlu1 %433 }
 0x20d   :  { %v444_v40 = vmul.f32 0.0625, %v434_v39 }
 0x20f   :  { %v448_v41 = vadd.f32 1e-05, %v444_v40 }
 0x210   :  { %v437_v42 = vpop.xlane.xlu0 %436 }
 0x211   :  { %650 = vrsqrt.f32 %v448_v41  ;;  %v445_v43 = vmul.f32 0.0625, %v437_v42 }
 0x213   :  { %v449_v44 = vadd.f32 1e-05, %v445_v43 }
 0x214   :  { %v440_v45 = vpop.xlane.xlu1 %439 }
 0x215   :  { %652 = vrsqrt.f32 %v449_v44  ;;  %v446_v30 = vmul.f32 0.0625, %v440_v45 }
 0x217   :  { %v450_v46 = vadd.f32 1e-05, %v446_v30 }
 0x218   :  { %v470_v47 = vpop.permute.xlu1 %469  ;;  %v443_v48 = vpop.xlane.xlu0 %442 }
 0x219   :  { %654 = vrsqrt.f32 %v450_v46  ;;  %v447_v32 = vmul.f32 0.0625, %v443_v48 }
 0x21b   :  { %v451_v49 = vadd.f32 1e-05, %v447_v32 }
 0x21c   :  { %v474_v31 = vpop.permute.xlu1 %473 }
 0x21d   :  { %656 = vrsqrt.f32 %v451_v49 }
 0x21e   :  { %v651_v34 = vpop.eup %650 }
 0x21f   :  { %v456_v50 = vmul.f32 %v651_v34, %v424_v15 }
 0x220   :  { %v482_v51 = vpop.permute.xlu1 %481  ;;  %v466_v54 = vpop.permute.xlu0 %465 }
 0x221   :  { %v476_v52 = vmul.f32 %v462_v38, %v456_v50 }
 0x222   :  { %v653_v53 = vpop.eup %652 }
 0x223   :  { %v496_v55 = vadd.f32 %v482_v51, %v476_v52  ;;  %v457_v56 = vmul.f32 %v653_v53, %v425_v19 }
 0x224   :  { %v486_v57 = vpop.permute.xlu1 %485 }
 0x225   :  { %v500_v58 = vmax.f32 %v496_v55, 0.0  ;;  %v477_v59 = vmul.f32 %v466_v54, %v457_v56 }
 0x226   :  { %v655_v60 = vpop.eup %654 }
 0x227   :  { %v458_v61 = vmul.f32 %v655_v60, %v426_v24  ;;  %v570_v62 = vpack.c.bf16 %v500_v58, %v500_v58  ;;  %v497_v63 = vadd.f32 %v486_v57, %v477_v59 }
 0x228   :  { %v490_v0 = vpop.permute.xlu1 %489 }
 0x229   :  { %v478_v1 = vmul.f32 %v470_v47, %v458_v61  ;;  %521 = vst.msk [vmem:[%s860_s3] sm:$0xf] %vm520_vm2, %v570_v62  ;;  %v501_v2 = vmax.f32 %v497_v63, 0.0 }
 0x22a   :  { %v657_v3 = vpop.eup %656 }
 0x22b   :  { %v459_v4 = vmul.f32 %v657_v3, %v427_v29  ;;  %v571_v5 = vpack.c.bf16 %v501_v2, %v501_v2  ;;  %v498_v6 = vadd.f32 %v490_v0, %v478_v1 }
 0x22c   :  { %v494_v9 = vpop.permute.xlu1 %493 }
 0x22d   :  { %v479_v7 = vmul.f32 %v474_v31, %v459_v4  ;;  %522 = vst.msk [vmem:[%s860_s3 + $0x4] sm:$0xf] %vm520_vm2, %v571_v5  ;;  %v502_v8 = vmax.f32 %v498_v6, 0.0 }
 0x22f   :  { %v572_v10 = vpack.c.bf16 %v502_v8, %v502_v8  ;;  %v499_v11 = vadd.f32 %v494_v9, %v479_v7 }
 0x231   :  { %523 = vst.msk [vmem:[%s860_s3 + $0x8] sm:$0xf] %vm520_vm2, %v572_v10  ;;  %v503_v12 = vmax.f32 %v499_v11, 0.0 }
 0x233   :  { %v573_v13 = vpack.c.bf16 %v503_v12, %v503_v12 }
 0x235   :  { %524 = vst.msk [vmem:[%s860_s3 + $0xc] sm:$0xf] %vm520_vm2, %v573_v13 }

// kernel: _lambda_.16
= control target key start
LH: loop header
LB: loop body
LE: loop exit
PB: predicated region body
PF: predicated region fallthrough
CT: control target
= control target key end

     0   :  { %v257_v0 = vmov 0.0   ;;  %vm258_vm0 = vmmov 0   ;;  %v259_v2 = vmov 0   ;;  %vm44_vm1 = vcmask 261120   ;;  %s334_s0 = inlined_call_operand.vmem [shape: bf16[32,16], index: 0, kind: input, shape index: {}]   ;;  %s335_s2 = inlined_call_operand.vmem [shape: f32[4,1], index: 2, kind: input, shape index: {}]   ;;  %s336_s4 = inlined_call_operand.vmem [shape: f32[32,1], index: 4, kind: input, shape index: {}]   ;;  %s337_s1 = inlined_call_operand.vmem [shape: bf16[4,32], index: 1, kind: input, shape index: {}]   ;;  %s338_s3 = inlined_call_operand.vmem [shape: bf16[32,4], index: 3, kind: input, shape index: {}]   ;;  %s339_s5 = inlined_call_operand.vmem [shape: bf16[32,16], index: 5, kind: output, shape index: {}]  }
   0x1   :  { %233 = vmatprep.subr.bf16.mxu0 %v257_v0  ;;  %v253_v1 = vld [vmem:[%s334_s0 + $0x8] sm:$0xff]   ;;  %237 = vmatprep.mubr.msk.bf16.mxu0 %vm258_vm0, %v257_v0  ;;  %v254_v3 = vld [vmem:[%s334_s0] sm:$0xff]   ;;  %v96_v7 = vld [vmem:[%s336_s4 + $0x18] sm:$0xff]  ;;  %vm127_vm2 = vcmask 31744   ;;  %vm134_vm3 = vcmask 1041408   ;;  %vm203_vm4 = vcmask 125952  }
   0x2   :  { %251 = vset.pattern.permute.xlu0 %v259_v2  ;;  %252 = vset.pattern.permute.xlu1 %v259_v2  ;;  %v26_v4 = vld [vmem:[%s335_s2] sm:$0xf]  ;;  %v94_v9 = vld [vmem:[%s336_s4 + $0x8] sm:$0xff]  ;;  %v95_v10 = vld [vmem:[%s336_s4 + $0x10] sm:$0xff] }
   0x3   :  { %234 = vmatpush3.bf16.msra.mxu0 %v253_v1  ;;  %29 = vperm.xlu0 %251, %v26_v4   ;;  %v93_v5 = vld [vmem:[%s336_s4] sm:$0xff]  ;;  %v256_v18 = vld [vmem:[%s338_s3 + $0x8] sm:$0xff]  }
   0x4   :  { %235 = vmatprep.subr.bf16.mxu0 %v257_v0  ;;  %v21_v6 = vld [vmem:[%s337_s1] sm:$0x3]  ;;  %104 = vperm.xlu1 %252, %v94_v9  }
   0x5   :  { %v255_v8 = vld [vmem:[%s338_s3] sm:$0xff]  }
   0x6   :  { %243 = vmatprep.mubr.msk.bf16.mxu1 %vm127_vm2, %v255_v8 }
   0x7   :  { %236 = vmatpush3.bf16.msra.mxu0 %v254_v3  ;;  %99 = vperm.xlu0 %251, %v93_v5  }
   0x8   :  { %109 = vperm.xlu1 %252, %v95_v10  }
   0xa   :  { %238 = vmatmul.mubr.msk.bf16.vlgmr.msra.gmra.mxu0 %vm44_vm1, %v21_v6 }
   0xb   :  { %114 = vperm.xlu0 %251, %v96_v7  }
  0x7e   :  { %v30_v11 = vpop.permute.xlu0 %29 }
  0x7f   :  { %v105_v20 = vpop.permute.xlu1 %104 }
  0x82   :  { %v100_v21 = vpop.permute.xlu0 %99 }
  0x83   :  { %v110_v22 = vpop.permute.xlu1 %109 }
  0x86   :  { %v115_v28 = vpop.permute.xlu0 %114 }
  0xca   :  { %v82_v12 = vpop.f32.mrf.mxu0 }
  0xcb   :  { %v83_v13 = vadd.f32 %v82_v12, %v30_v11 }
  0xcc   :  { %v239_v14 = vpop.f32.mrf.mxu0 }
  0xcd   :  { %v92_v15 = vpack.c.bf16 %v83_v13, %v83_v13 }
  0xce   :  { %v85_v16 = vpop.f32.mrf.mxu0 }
  0xcf   :  { %247 = vmatprep.subr.msk.bf16.mxu1 %vm134_vm3, %v92_v15  ;;  %v136_v17 = vsel %vm134_vm3, %v92_v15, 0 }
  0xd0   :  { %v240_v19 = vpop.f32.mrf.mxu0  ;;  %242 = vmatpush3.bf16.msra.mxu1 %v136_v17 }
  0xd3   :  { %244 = vmatmul.mubr.msk.bf16.vlgmr.msra.gmra.mxu1 %vm127_vm2, %v256_v18 }
 0x193   :  { %v245_v23 = vpop.f32.mrf.mxu1 }
 0x194   :  { %v181_v24 = vadd.f32 %v245_v23, %v110_v22 }
 0x195   :  { %v172_v25 = vpop.f32.mrf.mxu1 }
 0x196   :  { %v225_v26 = vpack.c.bf16 %v181_v24, %v181_v24  ;;  %v173_v27 = vadd.f32 %v172_v25, %v100_v21 }
 0x197   :  { %v246_v29 = vpop.f32.mrf.mxu1 }
 0x198   :  { %206 = vst.msk [vmem:[%s339_s5 + $0x8] sm:$0xf] %vm203_vm4, %v225_v26  ;;  %v223_v30 = vpack.c.bf16 %v173_v27, %v173_v27  ;;  %v184_v31 = vadd.f32 %v246_v29, %v115_v28 }
 0x199   :  { %v175_v32 = vpop.f32.mrf.mxu1 }
 0x19a   :  { %204 = vst.msk [vmem:[%s339_s5] sm:$0xf] %vm203_vm4, %v223_v30  ;;  %v226_v33 = vpack.c.bf16 %v184_v31, %v184_v31  ;;  %v176_v34 = vadd.f32 %v175_v32, %v105_v20 }
 0x19c   :  { %207 = vst.msk [vmem:[%s339_s5 + $0xc] sm:$0xf] %vm203_vm4, %v226_v33  ;;  %v224_v35 = vpack.c.bf16 %v176_v34, %v176_v34 }
 0x19e   :  { %205 = vst.msk [vmem:[%s339_s5 + $0x4] sm:$0xf] %vm203_vm4, %v224_v35 }

// kernel: _lambda_.15
= control target key start
LH: loop header
LB: loop body
LE: loop exit
PB: predicated region body
PF: predicated region fallthrough
CT: control target
= control target key end

     0   :  { %v1184_v1 = vmov 0   ;;  %vm560_vm0 = vcmask 785408   ;;  %vm763_vm1 = vcmask 130048   ;;  %vm889_vm2 = vcmask 125952   ;;  %s1480_s1 = inlined_call_operand.vmem [shape: bf16[864,16], index: 1, kind: input, shape index: {}]   ;;  %s1481_s0 = inlined_call_operand.vmem [shape: bf16[32,864], index: 0, kind: input, shape index: {}]   ;;  %s1482_s2 = inlined_call_operand.vmem [shape: f32[32,3], index: 2, kind: input, shape index: {}]   ;;  %s1483_s3 = inlined_call_operand.vmem [shape: bf16[32,16], index: 3, kind: input, shape index: {}]   ;;  %s1484_s4 = inlined_call_operand.vmem [shape: bf16[32,16], index: 4, kind: output, shape index: {}]  }
   0x1   :  { %v1102_v0 = vld [vmem:[%s1480_s1 + $0x78] sm:$0xff]   ;;  %1096 = vset.pattern.permute.xlu0 %v1184_v1  ;;  %1097 = vset.pattern.permute.xlu1 %v1184_v1  ;;  %v1106_v5 = vld [vmem:[%s1480_s1 + $0x70] sm:$0xff]   ;;  %v1110_v9 = vld [vmem:[%s1480_s1 + $0x68] sm:$0xff]  }
   0x2   :  { %v1103_v2 = vld [vmem:[%s1480_s1 + $0x38] sm:$0xff]   ;;  %985 = vmatprep.subr.bf16.mxu0 %v1102_v0  ;;  %v1107_v6 = vld [vmem:[%s1480_s1 + $0x30] sm:$0xff]   ;;  %v1111_v10 = vld [vmem:[%s1480_s1 + $0x28] sm:$0xff]  }
   0x3   :  { %v1104_v3 = vld [vmem:[%s1480_s1 + $0xf8] sm:$0xff]   ;;  %986 = vmatpush3.bf16.msra.mxu0 %v1103_v2  ;;  %v1108_v7 = vld [vmem:[%s1480_s1 + $0xf0] sm:$0xff]   ;;  %v1112_v11 = vld [vmem:[%s1480_s1 + $0xe8] sm:$0xff]  }
   0x4   :  { %v1105_v4 = vld [vmem:[%s1480_s1 + $0xb8] sm:$0xff]   ;;  %1013 = vmatprep.subr.bf16.mxu1 %v1104_v3  ;;  %987 = vmatprep.subr.bf16.mxu0 %v1106_v5  ;;  %v1109_v8 = vld [vmem:[%s1480_s1 + $0xb0] sm:$0xff]   ;;  %v1113_v12 = vld [vmem:[%s1480_s1 + $0xa8] sm:$0xff]  }
   0x5   :  { %1014 = vmatpush3.bf16.msra.mxu1 %v1105_v4  ;;  %v1114_v13 = vld [vmem:[%s1480_s1 + $0x60] sm:$0xff]   ;;  %v1118_v17 = vld [vmem:[%s1480_s1 + $0x58] sm:$0xff]   ;;  %v1122_v21 = vld [vmem:[%s1480_s1 + $0x50] sm:$0xff]  }
   0x6   :  { %1015 = vmatprep.subr.bf16.mxu1 %v1108_v7  ;;  %v1115_v14 = vld [vmem:[%s1480_s1 + $0x20] sm:$0xff]   ;;  %v1119_v18 = vld [vmem:[%s1480_s1 + $0x18] sm:$0xff]   ;;  %v1123_v22 = vld [vmem:[%s1480_s1 + $0x10] sm:$0xff]  }
   0x7   :  { %988 = vmatpush3.bf16.msra.mxu0 %v1107_v6  ;;  %v1116_v15 = vld [vmem:[%s1480_s1 + $0xe0] sm:$0xff]   ;;  %v1120_v19 = vld [vmem:[%s1480_s1 + $0xd8] sm:$0xff]   ;;  %v1124_v23 = vld [vmem:[%s1480_s1 + $0xd0] sm:$0xff]  }
   0x8   :  { %989 = vmatprep.subr.bf16.mxu0 %v1110_v9  ;;  %v1117_v16 = vld [vmem:[%s1480_s1 + $0xa0] sm:$0xff]   ;;  %v1121_v20 = vld [vmem:[%s1480_s1 + $0x98] sm:$0xff]   ;;  %v1125_v24 = vld [vmem:[%s1480_s1 + $0x90] sm:$0xff]   ;;  %v1185_v9 = vmov 1  }
   0x9   :  { %1016 = vmatpush3.bf16.msra.mxu1 %v1109_v8  ;;  %v1126_v25 = vld [vmem:[%s1480_s1 + $0x48] sm:$0xff]   ;;  %v1130_v29 = vld [vmem:[%s1480_s1 + $0x40] sm:$0xff]   ;;  %v1137_v35 = vld [vmem:[%s1480_s1 + $0x178] sm:$0xff]  }
   0xa   :  { %1017 = vmatprep.subr.bf16.mxu1 %v1112_v11  ;;  %v1127_v26 = vld [vmem:[%s1480_s1 + $0x8] sm:$0xff]   ;;  %v1131_v30 = vld [vmem:[%s1480_s1] sm:$0xff]   ;;  %v1141_v38 = vld [vmem:[%s1480_s1 + $0x138] sm:$0xff]  }
   0xb   :  { %990 = vmatpush3.bf16.msra.mxu0 %v1111_v10  ;;  %v1128_v27 = vld [vmem:[%s1480_s1 + $0xc8] sm:$0xff]   ;;  %v1132_v31 = vld [vmem:[%s1480_s1 + $0xc0] sm:$0xff]   ;;  %v1142_v39 = vld [vmem:[%s1480_s1 + $0x170] sm:$0xff]  }
   0xc   :  { %991 = vmatprep.subr.bf16.mxu0 %v1114_v13  ;;  %v1129_v28 = vld [vmem:[%s1480_s1 + $0x88] sm:$0xff]   ;;  %v1133_v32 = vld [vmem:[%s1481_s0] ss:$28 sps:$4 sm:$0xff]   ;;  %v1143_v40 = vld [vmem:[%s1480_s1 + $0x130] sm:$0xff]  }
   0xd   :  { %1018 = vmatpush3.bf16.msra.mxu1 %v1113_v12  ;;  %v1135_v33 = vld [vmem:[%s1481_s0 + $0x4] ss:$28 sps:$4 sm:$0xff]   ;;  %v1140_v37 = vld [vmem:[%s1481_s0 + $0xc] ss:$28 sps:$4 sm:$0xff]   ;;  %v1151_v47 = vld [vmem:[%s1481_s0 + $0x3c] ss:$28 sps:$4 sm:$0xff]  }
   0xe   :  { %1019 = vmatprep.subr.bf16.mxu1 %v1116_v15  ;;  %v1136_v34 = vld [vmem:[%s1480_s1 + $0x80] sm:$0xff]   ;;  %599 = vmatprep.mubr.bf16.mxu0 %v1135_v33  ;;  %v1144_v41 = vld [vmem:[%s1480_s1 + $0x168] sm:$0xff]   ;;  %v1150_v48 = vld [vmem:[%s1480_s1 + $0x158] sm:$0xff]  }
   0xf   :  { %992 = vmatpush3.bf16.msra.mxu0 %v1115_v14  ;;  %v1138_v36 = vld [vmem:[%s1481_s0 + $0x8] ss:$28 sps:$4 sm:$0xff]   ;;  %648 = vmatprep.mubr.bf16.mxu1 %v1140_v37  ;;  %v1154_v49 = vld [vmem:[%s1481_s0 + $0x38] ss:$28 sps:$4 sm:$0xff]   ;;  %v1158_v53 = vld [vmem:[%s1481_s0 + $0x40] ss:$28 sps:$4 sm:$0xff]  }
  0x10   :  { %993 = vmatprep.subr.bf16.mxu0 %v1118_v17  ;;  %v1146_v42 = vld [vmem:[%s1480_s1 + $0x1a8] sm:$0xff]   ;;  %v1147_v44 = vld [vmem:[%s1480_s1 + $0x160] sm:$0xff]   ;;  %v1153_v50 = vld [vmem:[%s1480_s1 + $0x118] sm:$0xff]  }
  0x11   :  { %1020 = vmatpush3.bf16.msra.mxu1 %v1117_v16  ;;  %v1145_v43 = vld [vmem:[%s1480_s1 + $0x128] sm:$0xff]   ;;  %v1149_v45 = vld [vmem:[%s1480_s1 + $0x1a0] sm:$0xff]   ;;  %v1155_v51 = vld [vmem:[%s1480_s1 + $0x198] sm:$0xff]  }
  0x12   :  { %1021 = vmatprep.subr.bf16.mxu1 %v1120_v19  ;;  %v1148_v46 = vld [vmem:[%s1480_s1 + $0x120] sm:$0xff]   ;;  %v1159_v54 = vld [vmem:[%s1480_s1 + $0x150] sm:$0xff]   ;;  %v1162_v57 = vld [vmem:[%s1480_s1 + $0x148] sm:$0xff]  }
  0x13   :  { %994 = vmatpush3.bf16.msra.mxu0 %v1119_v18  ;;  %v1156_v52 = vld [vmem:[%s1481_s0 + $0x44] ss:$28 sps:$4 sm:$0xff]   ;;  %v1161_v55 = vld [vmem:[%s1480_s1 + $0x190] sm:$0xff]   ;;  %v1164_v58 = vld [vmem:[%s1480_s1 + $0x188] sm:$0xff]  }
  0x14   :  { %995 = vmatprep.subr.bf16.mxu0 %v1122_v21  ;;  %v1160_v56 = vld [vmem:[%s1480_s1 + $0x110] sm:$0xff]   ;;  %v1163_v59 = vld [vmem:[%s1480_s1 + $0x108] sm:$0xff]   ;;  %v1165_v60 = vld [vmem:[%s1480_s1 + $0x140] sm:$0xff]  }
  0x15   :  { %1022 = vmatpush3.bf16.msra.mxu1 %v1121_v20  ;;  %v1167_v61 = vld [vmem:[%s1480_s1 + $0x180] sm:$0xff]   ;;  %v1170_v62 = vld [vmem:[%s1481_s0 + $0x14] ss:$28 sps:$4 sm:$0xff]   ;;  %v1173_v5 = vld [vmem:[%s1481_s0 + $0x4c] ss:$28 sps:$4 sm:$0xff]  }
  0x16   :  { %1023 = vmatprep.subr.bf16.mxu1 %v1124_v23  ;;  %v1171_v63 = vld [vmem:[%s1481_s0 + $0x18] ss:$28 sps:$4 sm:$0xff]   ;;  %v1166_v0 = vld [vmem:[%s1480_s1 + $0x100] sm:$0xff]   ;;  %v1172_v1 = vld [vmem:[%s1481_s0 + $0x50] ss:$28 sps:$4 sm:$0xff]  }
  0x17   :  { %996 = vmatpush3.bf16.msra.mxu0 %v1123_v22  ;;  %v1411_v2 = vld [vmem:[%s1482_s2] sm:$0xff]  ;;  %v1416_v3 = vld [vmem:[%s1482_s2 + $0x10] sm:$0xff]  ;;  %v1429_v6 = vld [vmem:[%s1482_s2 + $0x8] sm:$0xff] }
  0x18   :  { %997 = vmatprep.subr.bf16.mxu0 %v1126_v25  ;;  %v1168_v4 = vld [vmem:[%s1481_s0 + $0x10] ss:$28 sps:$4 sm:$0xff]   ;;  %148 = vperm.xlu0 %1096, %v1411_v2   ;;  %v1435_v7 = vld [vmem:[%s1482_s2 + $0x18] sm:$0xff]  ;;  %v1175_v8 = vld [vmem:[%s1481_s0 + $0x48] ss:$28 sps:$4 sm:$0xff]  }
  0x19   :  { %1024 = vmatpush3.bf16.msra.mxu1 %v1125_v24  ;;  %158 = vperm.xlu1 %1097, %v1416_v3  }
  0x1a   :  { %1025 = vmatprep.subr.bf16.mxu1 %v1128_v27 }
  0x1b   :  { %998 = vmatpush3.bf16.msra.mxu0 %v1127_v26 }
  0x1c   :  { %999 = vmatprep.subr.bf16.mxu0 %v1130_v29  ;;  %153 = vperm.xlu0 %1096, %v1429_v6  }
  0x1d   :  { %1026 = vmatpush3.bf16.msra.mxu1 %v1129_v28  ;;  %163 = vperm.xlu1 %1097, %v1435_v7  }
  0x1e   :  { %1027 = vmatprep.subr.bf16.mxu1 %v1132_v31 }
  0x1f   :  { %1000 = vmatpush3.bf16.msra.mxu0 %v1131_v30 }
  0x20   :  { %1041 = vmatprep.subr.bf16.mxu0 %v1137_v35  ;;  %1099 = vset.pattern.permute.xlu0 %v1185_v9 }
  0x21   :  { %1028 = vmatpush3.bf16.msra.mxu1 %v1136_v34  ;;  %1098 = vset.pattern.permute.xlu1 %v1185_v9 }
  0x22   :  { %600 = vmatmul.mubr.bf16.vlgmr.msra.gmra.mxu0 %v1133_v32  ;;  %1077 = vmatprep.subr.bf16.mxu1 %v1146_v42 }
  0x23   :  { %1042 = vmatpush3.bf16.msra.mxu0 %v1141_v38  ;;  %607 = vmatprep.mubr.bf16.mxu0 %v1151_v47 }
  0x24   :  { %649 = vmatmul.mubr.bf16.vlgmr.msra.gmra.mxu1 %v1138_v36  ;;  %1043 = vmatprep.subr.bf16.mxu0 %v1142_v39 }
  0x25   :  { %1078 = vmatpush3.bf16.msra.mxu1 %v1146_v42  ;;  %656 = vmatprep.mubr.bf16.mxu1 %v1156_v52 }
  0x26   :  { %1079 = vmatprep.subr.bf16.mxu1 %v1149_v45 }
  0x27   :  { %1044 = vmatpush3.bf16.msra.mxu0 %v1143_v40 }
  0x28   :  { %1045 = vmatprep.subr.bf16.mxu0 %v1144_v41 }
  0x29   :  { %1080 = vmatpush3.bf16.msra.mxu1 %v1149_v45 }
  0x2a   :  { %608 = vmatmul.mubr.bf16.gmra.mxu0 %v1154_v49  ;;  %1081 = vmatprep.subr.bf16.mxu1 %v1155_v51 }
  0x2b   :  { %1046 = vmatpush3.bf16.msra.mxu0 %v1145_v43  ;;  %697 = vmatprep.mubr.bf16.mxu0 %v1170_v62 }
  0x2c   :  { %1047 = vmatprep.subr.bf16.mxu0 %v1147_v44  ;;  %657 = vmatmul.mubr.bf16.gmra.mxu1 %v1158_v53 }
  0x2d   :  { %1082 = vmatpush3.bf16.msra.mxu1 %v1155_v51  ;;  %1089 = vmatprep.mubr.msk.bf16.mxu1 %vm560_vm0, %v1171_v63 }
  0x2e   :  { %1083 = vmatprep.subr.bf16.mxu1 %v1161_v55 }
  0x2f   :  { %1048 = vmatpush3.bf16.msra.mxu0 %v1148_v46 }
  0x30   :  { %1049 = vmatprep.subr.bf16.mxu0 %v1150_v48 }
  0x31   :  { %1084 = vmatpush3.bf16.msra.mxu1 %v1161_v55 }
  0x32   :  { %1085 = vmatprep.subr.bf16.mxu1 %v1164_v58 }
  0x33   :  { %1050 = vmatpush3.bf16.msra.mxu0 %v1153_v50 }
  0x34   :  { %1051 = vmatprep.subr.bf16.mxu0 %v1159_v54 }
  0x35   :  { %1086 = vmatpush3.bf16.msra.mxu1 %v1164_v58 }
  0x36   :  { %1087 = vmatprep.subr.bf16.mxu1 %v1167_v61 }
  0x37   :  { %1052 = vmatpush3.bf16.msra.mxu0 %v1160_v56 }
  0x38   :  { %1053 = vmatprep.subr.bf16.mxu0 %v1162_v57 }
  0x39   :  { %1088 = vmatpush3.bf16.msra.mxu1 %v1167_v61 }
  0x3b   :  { %1054 = vmatpush3.bf16.msra.mxu0 %v1163_v59 }
  0x3c   :  { %1055 = vmatprep.subr.bf16.mxu0 %v1165_v60  ;;  %1090 = vmatmul.mubr.msk.bf16.vlgmr.msra.gmra.mxu1 %vm560_vm0, %v1172_v1 }
  0x3f   :  { %1056 = vmatpush3.bf16.msra.mxu0 %v1166_v0 }
  0x42   :  { %698 = vmatmul.mubr.bf16.vlgmr.msra.gmra.mxu0 %v1168_v4 }
  0x43   :  { %705 = vmatprep.mubr.bf16.mxu0 %v1173_v5 }
  0x4a   :  { %706 = vmatmul.mubr.bf16.gmra.mxu0 %v1175_v8 }
  0x93   :  { %v149_v23 = vpop.permute.xlu0 %148 }
  0x94   :  { %v159_v34 = vpop.permute.xlu1 %158 }
  0x97   :  { %v154_v32 = vpop.permute.xlu0 %153 }
  0x98   :  { %v164_v52 = vpop.permute.xlu1 %163 }
  0xe2   :  { %v1001_v11 = vpop.f32.mrf.mxu0 }
  0xe4   :  { %v1029_v10 = vpop.f32.mrf.mxu1  ;;  %v1002_v13 = vpop.f32.mrf.mxu0 }
  0xe5   :  { %v1003_v25 = vadd.f32 %v1002_v13, %v1001_v11 }
  0xe6   :  { %v1030_v12 = vpop.f32.mrf.mxu1  ;;  %v1004_v15 = vpop.f32.mrf.mxu0 }
  0xe7   :  { %v602_v29 = vadd.f32 %v1003_v25, %v149_v23  ;;  %v1031_v30 = vadd.f32 %v1030_v12, %v1029_v10 }
  0xe8   :  { %v1032_v14 = vpop.f32.mrf.mxu1  ;;  %v1005_v17 = vpop.f32.mrf.mxu0 }
  0xe9   :  { %v1006_v31 = vadd.f32 %v1005_v17, %v1004_v15  ;;  %v651_v38 = vadd.f32 %v1031_v30, %v602_v29 }
  0xea   :  { %v1033_v16 = vpop.f32.mrf.mxu1  ;;  %v1007_v19 = vpop.f32.mrf.mxu0 }
  0xeb   :  { %v605_v39 = vadd.f32 %v1006_v31, %v154_v32  ;;  %v1034_v40 = vadd.f32 %v1033_v16, %v1032_v14 }
  0xec   :  { %v1035_v18 = vpop.f32.mrf.mxu1  ;;  %v1008_v21 = vpop.f32.mrf.mxu0 }
  0xed   :  { %v1009_v35 = vadd.f32 %v1008_v21, %v1007_v19  ;;  %v654_v48 = vadd.f32 %v1034_v40, %v605_v39 }
  0xee   :  { %v1036_v20 = vpop.f32.mrf.mxu1  ;;  %v1010_v24 = vpop.f32.mrf.mxu0 }
  0xef   :  { %v610_v44 = vadd.f32 %v1009_v35, %v159_v34  ;;  %v1037_v45 = vadd.f32 %v1036_v20, %v1035_v18  ;;  %v1186_v34 = vmov 2  }
  0xf0   :  { %v1038_v22 = vpop.f32.mrf.mxu1  ;;  %v1011_v27 = vpop.f32.mrf.mxu0 }
  0xf1   :  { %v1012_v49 = vadd.f32 %v1011_v27, %v1010_v24  ;;  %v659_v56 = vadd.f32 %v1037_v45, %v610_v44 }
  0xf2   :  { %v1039_v26 = vpop.f32.mrf.mxu1 }
  0xf3   :  { %v613_v59 = vadd.f32 %v1012_v49, %v164_v52  ;;  %v1040_v60 = vadd.f32 %v1039_v26, %v1038_v22 }
  0xf5   :  { %v662_v5 = vadd.f32 %v1040_v60, %v613_v59 }
  0xfc   :  { %v1091_v28 = vpop.f32.mrf.mxu1 }
  0xfe   :  { %v748_v37 = vpop.f32.mrf.mxu1 }
 0x100   :  { %v1092_v47 = vpop.f32.mrf.mxu1 }
 0x102   :  { %v1057_v33 = vpop.f32.mrf.mxu0  ;;  %v751_v57 = vpop.f32.mrf.mxu1 }
 0x104   :  { %v1058_v36 = vpop.f32.mrf.mxu0 }
 0x105   :  { %v1059_v41 = vadd.f32 %v1058_v36, %v1057_v33 }
 0x106   :  { %v1060_v42 = vpop.f32.mrf.mxu0 }
 0x107   :  { %v700_v43 = vadd.f32 %v1059_v41, %v651_v38 }
 0x108   :  { %v1061_v46 = vpop.f32.mrf.mxu0 }
 0x109   :  { %v749_v50 = vadd.f32 %v748_v37, %v700_v43  ;;  %v1062_v51 = vadd.f32 %v1061_v46, %v1060_v42 }
 0x10a   :  { %v1063_v53 = vpop.f32.mrf.mxu0 }
 0x10b   :  { %v703_v54 = vadd.f32 %v1062_v51, %v654_v48  ;;  %v764_v55 = vsel %vm763_vm1, %v749_v50, 0.0  ;;  %v977_v48 = vld [vmem:[%s1483_s3] sm:$0xff]  }
 0x10c   :  { %v1064_v58 = vpop.f32.mrf.mxu0  ;;  %765 = vadd.xlane.f32.xlu0 %v764_v55 }
 0x10d   :  { %v752_v61 = vadd.f32 %v751_v57, %v703_v54  ;;  %v1065_v62 = vadd.f32 %v1064_v58, %v1063_v53  ;;  %v978_v53 = vunpack.c.l.bf16 %v977_v48 }
 0x10e   :  { %v1066_v63 = vpop.f32.mrf.mxu0 }
 0x10f   :  { %v708_v0 = vadd.f32 %v1065_v62, %v659_v56  ;;  %v767_v1 = vsel %vm763_vm1, %v752_v61, 0.0  ;;  %v979_v62 = vunpack.c.h.bf16 %v977_v48 }
 0x110   :  { %v1067_v4 = vpop.f32.mrf.mxu0  ;;  %768 = vadd.xlane.f32.xlu1 %v767_v1 }
 0x111   :  { %v1068_v8 = vadd.f32 %v1067_v4, %v1066_v63  ;;  %v757_v9 = vadd.f32 %v1091_v28, %v708_v0  ;;  %v984_v0 = vld [vmem:[%s1483_s3 + $0x8] sm:$0xff]  }
 0x113   :  { %v711_v10 = vadd.f32 %v1068_v8, %v662_v5  ;;  %v770_v11 = vsel %vm763_vm1, %v757_v9, 0.0 }
 0x114   :  { %771 = vadd.xlane.f32.xlu0 %v770_v11 }
 0x115   :  { %v760_v12 = vadd.f32 %v1092_v47, %v711_v10 }
 0x117   :  { %v773_v13 = vsel %vm763_vm1, %v760_v12, 0.0 }
 0x118   :  { %774 = vadd.xlane.f32.xlu0 %v773_v13 }
 0x121   :  { %818 = vperm.xlu1 %1098, %v1411_v2  }
 0x195   :  { %v766_v14 = vpop.xlane.xlu0 %765 }
 0x196   :  { %v777_v15 = vmul.f32 0.0625, %v766_v14 }
 0x198   :  { %v781_v16 = vsub.f32 %v749_v50, %v777_v15 }
 0x199   :  { %v769_v17 = vpop.xlane.xlu1 %768 }
 0x19a   :  { %v778_v18 = vmul.f32 0.0625, %v769_v17  ;;  %v785_v19 = vmul.f32 %v781_v16, %v781_v16 }
 0x19c   :  { %v782_v20 = vsub.f32 %v752_v61, %v778_v18  ;;  %v789_v21 = vsel %vm763_vm1, %v785_v19, 0.0  ;;  %v983_v19 = vunpack.c.h.bf16 %v984_v0 }
 0x19d   :  { %790 = vadd.xlane.f32.xlu1 %v789_v21  ;;  %v772_v22 = vpop.xlane.xlu0 %771  ;;  %v819_v35 = vpop.permute.xlu1 %818 }
 0x19e   :  { %v779_v23 = vmul.f32 0.0625, %v772_v22  ;;  %v786_v24 = vmul.f32 %v782_v20, %v782_v20 }
 0x1a0   :  { %v783_v25 = vsub.f32 %v757_v9, %v779_v23  ;;  %v792_v26 = vsel %vm763_vm1, %v786_v24, 0.0 }
 0x1a1   :  { %793 = vadd.xlane.f32.xlu0 %v792_v26  ;;  %v775_v27 = vpop.xlane.xlu0 %774 }
 0x1a2   :  { %v780_v28 = vmul.f32 0.0625, %v775_v27  ;;  %v787_v29 = vmul.f32 %v783_v25, %v783_v25 }
 0x1a4   :  { %v784_v30 = vsub.f32 %v760_v12, %v780_v28  ;;  %v795_v31 = vsel %vm763_vm1, %v787_v29, 0.0  ;;  %v982_v12 = vunpack.c.l.bf16 %v984_v0 }
 0x1a5   :  { %796 = vadd.xlane.f32.xlu1 %v795_v31 }
 0x1a6   :  { %v788_v32 = vmul.f32 %v784_v30, %v784_v30 }
 0x1a8   :  { %v798_v33 = vsel %vm763_vm1, %v788_v32, 0.0 }
 0x1a9   :  { %799 = vadd.xlane.f32.xlu0 %v798_v33 }
 0x1b6   :  { %826 = vperm.xlu1 %1098, %v1416_v3  }
 0x1ba   :  { %830 = vperm.xlu1 %1098, %v1435_v7  }
 0x1be   :  { %1100 = vset.pattern.permute.xlu1 %v1186_v34 }
 0x1bf   :  { %838 = vperm.xlu1 %1100, %v1411_v2   ;;  %822 = vperm.xlu0 %1099, %v1429_v6  }
 0x1c3   :  { %842 = vperm.xlu1 %1100, %v1429_v6   ;;  %1101 = vset.pattern.permute.xlu0 %v1186_v34 }
 0x1c7   :  { %846 = vperm.xlu1 %1100, %v1416_v3  }
 0x1cb   :  { %850 = vperm.xlu1 %1100, %v1435_v7  }
 0x226   :  { %v791_v36 = vpop.xlane.xlu1 %790 }
 0x227   :  { %v801_v37 = vmul.f32 0.0625, %v791_v36 }
 0x229   :  { %v805_v38 = vadd.f32 1e-05, %v801_v37 }
 0x22a   :  { %v794_v39 = vpop.xlane.xlu0 %793 }
 0x22b   :  { %1176 = vrsqrt.f32 %v805_v38  ;;  %v802_v40 = vmul.f32 0.0625, %v794_v39 }
 0x22d   :  { %v806_v41 = vadd.f32 1e-05, %v802_v40 }
 0x22e   :  { %v797_v42 = vpop.xlane.xlu1 %796 }
 0x22f   :  { %1178 = vrsqrt.f32 %v806_v41  ;;  %v803_v2 = vmul.f32 0.0625, %v797_v42 }
 0x231   :  { %v807_v43 = vadd.f32 1e-05, %v803_v2 }
 0x232   :  { %v827_v44 = vpop.permute.xlu1 %826  ;;  %v800_v45 = vpop.xlane.xlu0 %799 }
 0x233   :  { %1180 = vrsqrt.f32 %v807_v43  ;;  %v804_v6 = vmul.f32 0.0625, %v800_v45 }
 0x235   :  { %v808_v46 = vadd.f32 1e-05, %v804_v6 }
 0x236   :  { %v831_v3 = vpop.permute.xlu1 %830 }
 0x237   :  { %1182 = vrsqrt.f32 %v808_v46 }
 0x238   :  { %v1177_v7 = vpop.eup %1176 }
 0x239   :  { %v813_v47 = vmul.f32 %v1177_v7, %v781_v16 }
 0x23a   :  { %v839_v49 = vpop.permute.xlu1 %838  ;;  %v823_v52 = vpop.permute.xlu0 %822 }
 0x23b   :  { %v833_v50 = vmul.f32 %v819_v35, %v813_v47 }
 0x23c   :  { %v1179_v51 = vpop.eup %1178 }
 0x23d   :  { %v853_v54 = vadd.f32 %v839_v49, %v833_v50  ;;  %v814_v55 = vmul.f32 %v1179_v51, %v782_v20 }
 0x23e   :  { %v843_v56 = vpop.permute.xlu1 %842 }
 0x23f   :  { %v857_v57 = vmax.f32 %v853_v54, 0.0  ;;  %v834_v58 = vmul.f32 %v823_v52, %v814_v55 }
 0x240   :  { %v1181_v59 = vpop.eup %1180 }
 0x241   :  { %v815_v60 = vmul.f32 %v1181_v59, %v783_v25  ;;  %v869_v61 = vadd.f32 %v978_v53, %v857_v57  ;;  %v854_v63 = vadd.f32 %v843_v56, %v834_v58 }
 0x242   :  { %v847_v1 = vpop.permute.xlu1 %846 }
 0x243   :  { %v835_v4 = vmul.f32 %v827_v44, %v815_v60  ;;  %v972_v5 = vpack.c.bf16 %v869_v61, %v869_v61  ;;  %v858_v8 = vmax.f32 %v854_v63, 0.0 }
 0x244   :  { %v1183_v9 = vpop.eup %1182 }
 0x245   :  { %v816_v10 = vmul.f32 %v1183_v9, %v784_v30  ;;  %890 = vst.msk [vmem:[%s1484_s4] sm:$0xf] %vm889_vm2, %v972_v5  ;;  %v870_v11 = vadd.f32 %v979_v62, %v858_v8  ;;  %v855_v13 = vadd.f32 %v847_v1, %v835_v4 }
 0x246   :  { %v851_v17 = vpop.permute.xlu1 %850 }
 0x247   :  { %v836_v14 = vmul.f32 %v831_v3, %v816_v10  ;;  %v973_v15 = vpack.c.bf16 %v870_v11, %v870_v11  ;;  %v859_v16 = vmax.f32 %v855_v13, 0.0 }
 0x249   :  { %891 = vst.msk [vmem:[%s1484_s4 + $0x4] sm:$0xf] %vm889_vm2, %v973_v15  ;;  %v871_v18 = vadd.f32 %v982_v12, %v859_v16  ;;  %v856_v20 = vadd.f32 %v851_v17, %v836_v14 }
 0x24b   :  { %v974_v21 = vpack.c.bf16 %v871_v18, %v871_v18  ;;  %v860_v22 = vmax.f32 %v856_v20, 0.0 }
 0x24d   :  { %892 = vst.msk [vmem:[%s1484_s4 + $0x8] sm:$0xf] %vm889_vm2, %v974_v21  ;;  %v872_v23 = vadd.f32 %v983_v19, %v860_v22 }
 0x24f   :  { %v975_v24 = vpack.c.bf16 %v872_v23, %v872_v23 }
 0x251   :  { %893 = vst.msk [vmem:[%s1484_s4 + $0xc] sm:$0xf] %vm889_vm2, %v975_v24 }

// kernel: _lambda_.17
= control target key start
LH: loop header
LB: loop body
LE: loop exit
PB: predicated region body
PF: predicated region fallthrough
CT: control target
= control target key end

     0   :  { %v704_v1 = vmov 0   ;;  %vm496_vm0 = vcmask 125952   ;;  %s945_s1 = inlined_call_operand.vmem [shape: bf16[256,16], index: 1, kind: input, shape index: {}]   ;;  %s946_s0 = inlined_call_operand.vmem [shape: bf16[128,256], index: 0, kind: input, shape index: {}]   ;;  %s947_s2 = inlined_call_operand.vmem [shape: f32[128,1], index: 2, kind: input, shape index: {}]   ;;  %s948_s3 = inlined_call_operand.vmem [shape: bf16[128,16], index: 3, kind: output, shape index: {}]  }
   0x1   :  { %v664_v0 = vld [vmem:[%s945_s1 + $0x78] sm:$0xff]   ;;  %663 = vset.pattern.permute.xlu1 %v704_v1  ;;  %662 = vset.pattern.permute.xlu0 %v704_v1  ;;  %v666_v3 = vld [vmem:[%s945_s1 + $0x70] sm:$0xff]   ;;  %v668_v5 = vld [vmem:[%s945_s1 + $0x68] sm:$0xff]  }
   0x2   :  { %v665_v2 = vld [vmem:[%s945_s1 + $0x38] sm:$0xff]   ;;  %581 = vmatprep.subr.bf16.mxu0 %v664_v0  ;;  %645 = vmatprep.subr.bf16.mxu1 %v664_v0  ;;  %v667_v4 = vld [vmem:[%s945_s1 + $0x30] sm:$0xff]   ;;  %v669_v6 = vld [vmem:[%s945_s1 + $0x28] sm:$0xff]  }
   0x3   :  { %582 = vmatpush3.bf16.msra.mxu0 %v665_v2  ;;  %653 = vmatpush3.bf16.msra.mxu1 %v665_v2  ;;  %v670_v7 = vld [vmem:[%s945_s1 + $0x60] sm:$0xff]   ;;  %v672_v9 = vld [vmem:[%s945_s1 + $0x58] sm:$0xff]   ;;  %v674_v11 = vld [vmem:[%s945_s1 + $0x50] sm:$0xff]  }
   0x4   :  { %583 = vmatprep.subr.bf16.mxu0 %v666_v3  ;;  %646 = vmatprep.subr.bf16.mxu1 %v666_v3  ;;  %v671_v8 = vld [vmem:[%s945_s1 + $0x20] sm:$0xff]   ;;  %v673_v10 = vld [vmem:[%s945_s1 + $0x18] sm:$0xff]   ;;  %v675_v14 = vld [vmem:[%s945_s1 + $0x10] sm:$0xff]  }
   0x5   :  { %v682_v12 = vld [vmem:[%s946_s0 + $0x4] ss:$8 sps:$4 sm:$0xff]   ;;  %v65_v18 = vld [vmem:[%s947_s2 + $0x10] sm:$0xff]  ;;  %v680_v21 = vld [vmem:[%s946_s0] ss:$8 sps:$4 sm:$0xff]  }
   0x6   :  { %v685_v13 = vld [vmem:[%s946_s0 + $0x44] ss:$8 sps:$4 sm:$0xff]   ;;  %367 = vmatprep.mubr.bf16.mxu0 %v682_v12  ;;  %91 = vperm.xlu1 %663, %v65_v18   ;;  %v683_v22 = vld [vmem:[%s946_s0 + $0x40] ss:$8 sps:$4 sm:$0xff]   ;;  %v66_v23 = vld [vmem:[%s947_s2 + $0x18] sm:$0xff] }
   0x7   :  { %584 = vmatpush3.bf16.msra.mxu0 %v667_v4  ;;  %654 = vmatpush3.bf16.msra.mxu1 %v667_v4  ;;  %v676_v15 = vld [vmem:[%s945_s1 + $0x48] sm:$0xff]   ;;  %v678_v17 = vld [vmem:[%s945_s1 + $0x40] sm:$0xff]   ;;  %v686_v25 = vld [vmem:[%s946_s0 + $0x14] ss:$8 sps:$4 sm:$0xff]  }
   0x8   :  { %585 = vmatprep.subr.bf16.mxu0 %v668_v5  ;;  %647 = vmatprep.subr.bf16.mxu1 %v668_v5  ;;  %v677_v16 = vld [vmem:[%s945_s1 + $0x8] sm:$0xff]   ;;  %v679_v19 = vld [vmem:[%s945_s1] sm:$0xff]   ;;  %v688_v26 = vld [vmem:[%s946_s0 + $0x54] ss:$8 sps:$4 sm:$0xff]  }
   0x9   :  { %399 = vmatprep.mubr.bf16.mxu1 %v685_v13  ;;  %v63_v20 = vld [vmem:[%s947_s2] sm:$0xff]  ;;  %v64_v24 = vld [vmem:[%s947_s2 + $0x8] sm:$0xff]  ;;  %v690_v29 = vld [vmem:[%s946_s0 + $0x10] ss:$8 sps:$4 sm:$0xff]  }
   0xa   :  { %81 = vperm.xlu0 %662, %v63_v20   ;;  %96 = vperm.xlu1 %663, %v66_v23   ;;  %v68_v27 = vld [vmem:[%s947_s2 + $0x28] sm:$0xff]  ;;  %v67_v28 = vld [vmem:[%s947_s2 + $0x20] sm:$0xff]  ;;  %v691_v30 = vld [vmem:[%s946_s0 + $0x50] ss:$8 sps:$4 sm:$0xff]  }
   0xb   :  { %586 = vmatpush3.bf16.msra.mxu0 %v669_v6  ;;  %655 = vmatpush3.bf16.msra.mxu1 %v669_v6  ;;  %v70_v31 = vld [vmem:[%s947_s2 + $0x38] sm:$0xff]  ;;  %v69_v32 = vld [vmem:[%s947_s2 + $0x30] sm:$0xff]  ;;  %v692_v33 = vld [vmem:[%s946_s0 + $0x24] ss:$8 sps:$4 sm:$0xff]  }
   0xc   :  { %587 = vmatprep.subr.bf16.mxu0 %v670_v7  ;;  %648 = vmatprep.subr.bf16.mxu1 %v670_v7  ;;  %v694_v34 = vld [vmem:[%s946_s0 + $0x64] ss:$8 sps:$4 sm:$0xff]   ;;  %v696_v37 = vld [vmem:[%s946_s0 + $0x20] ss:$8 sps:$4 sm:$0xff]   ;;  %v74_v39 = vld [vmem:[%s947_s2 + $0x58] sm:$0xff] }
   0xd   :  { %v72_v35 = vld [vmem:[%s947_s2 + $0x48] sm:$0xff]  ;;  %v71_v36 = vld [vmem:[%s947_s2 + $0x40] sm:$0xff]  ;;  %v73_v40 = vld [vmem:[%s947_s2 + $0x50] sm:$0xff] }
   0xe   :  { %86 = vperm.xlu0 %662, %v64_v24   ;;  %106 = vperm.xlu1 %663, %v68_v27   ;;  %v697_v38 = vld [vmem:[%s946_s0 + $0x60] ss:$8 sps:$4 sm:$0xff]   ;;  %v698_v41 = vld [vmem:[%s946_s0 + $0x34] ss:$8 sps:$4 sm:$0xff]   ;;  %v702_v45 = vld [vmem:[%s946_s0 + $0x30] ss:$8 sps:$4 sm:$0xff]  }
   0xf   :  { %588 = vmatpush3.bf16.msra.mxu0 %v671_v8  ;;  %656 = vmatpush3.bf16.msra.mxu1 %v671_v8  ;;  %v700_v42 = vld [vmem:[%s946_s0 + $0x74] ss:$8 sps:$4 sm:$0xff]   ;;  %v76_v43 = vld [vmem:[%s947_s2 + $0x68] sm:$0xff]  ;;  %v75_v44 = vld [vmem:[%s947_s2 + $0x60] sm:$0xff] }
  0x10   :  { %589 = vmatprep.subr.bf16.mxu0 %v672_v9  ;;  %649 = vmatprep.subr.bf16.mxu1 %v672_v9  ;;  %v703_v46 = vld [vmem:[%s946_s0 + $0x70] ss:$8 sps:$4 sm:$0xff]  }
  0x11   :  { %v78_v47 = vld [vmem:[%s947_s2 + $0x78] sm:$0xff]  ;;  %v77_v48 = vld [vmem:[%s947_s2 + $0x70] sm:$0xff] }
  0x12   :  { %101 = vperm.xlu0 %662, %v67_v28   ;;  %116 = vperm.xlu1 %663, %v70_v31  }
  0x13   :  { %590 = vmatpush3.bf16.msra.mxu0 %v673_v10  ;;  %657 = vmatpush3.bf16.msra.mxu1 %v673_v10 }
  0x14   :  { %591 = vmatprep.subr.bf16.mxu0 %v674_v11  ;;  %650 = vmatprep.subr.bf16.mxu1 %v674_v11 }
  0x16   :  { %111 = vperm.xlu0 %662, %v69_v32   ;;  %126 = vperm.xlu1 %663, %v72_v35  }
  0x17   :  { %592 = vmatpush3.bf16.msra.mxu0 %v675_v14  ;;  %658 = vmatpush3.bf16.msra.mxu1 %v675_v14 }
  0x18   :  { %593 = vmatprep.subr.bf16.mxu0 %v676_v15  ;;  %651 = vmatprep.subr.bf16.mxu1 %v676_v15 }
  0x1a   :  { %121 = vperm.xlu0 %662, %v71_v36   ;;  %136 = vperm.xlu1 %663, %v74_v39  }
  0x1b   :  { %594 = vmatpush3.bf16.msra.mxu0 %v677_v16  ;;  %659 = vmatpush3.bf16.msra.mxu1 %v677_v16 }
  0x1c   :  { %595 = vmatprep.subr.bf16.mxu0 %v678_v17  ;;  %652 = vmatprep.subr.bf16.mxu1 %v678_v17 }
  0x1e   :  { %131 = vperm.xlu0 %662, %v73_v40   ;;  %146 = vperm.xlu1 %663, %v76_v43  }
  0x1f   :  { %596 = vmatpush3.bf16.msra.mxu0 %v679_v19  ;;  %660 = vmatpush3.bf16.msra.mxu1 %v679_v19 }
  0x22   :  { %368 = vmatmul.mubr.bf16.vlgmr.msra.gmra.mxu0 %v680_v21  ;;  %400 = vmatmul.mubr.bf16.vlgmr.msra.gmra.mxu1 %v683_v22 }
  0x23   :  { %375 = vmatprep.mubr.bf16.mxu0 %v686_v25  ;;  %407 = vmatprep.mubr.bf16.mxu1 %v688_v26 }
  0x24   :  { %141 = vperm.xlu0 %662, %v75_v44   ;;  %156 = vperm.xlu1 %663, %v78_v47  }
  0x28   :  { %151 = vperm.xlu0 %662, %v77_v48  }
  0x2a   :  { %376 = vmatmul.mubr.bf16.gmra.mxu0 %v690_v29  ;;  %408 = vmatmul.mubr.bf16.gmra.mxu1 %v691_v30 }
  0x2b   :  { %383 = vmatprep.mubr.bf16.mxu0 %v692_v33  ;;  %415 = vmatprep.mubr.bf16.mxu1 %v694_v34 }
  0x32   :  { %384 = vmatmul.mubr.bf16.gmra.mxu0 %v696_v37  ;;  %416 = vmatmul.mubr.bf16.gmra.mxu1 %v697_v38 }
  0x33   :  { %391 = vmatprep.mubr.bf16.mxu0 %v698_v41  ;;  %423 = vmatprep.mubr.bf16.mxu1 %v700_v42 }
  0x3a   :  { %392 = vmatmul.mubr.bf16.gmra.mxu0 %v702_v45  ;;  %424 = vmatmul.mubr.bf16.gmra.mxu1 %v703_v46 }
  0x81   :  { %v92_v50 = vpop.permute.xlu1 %91 }
  0x85   :  { %v82_v49 = vpop.permute.xlu0 %81  ;;  %v97_v52 = vpop.permute.xlu1 %96 }
  0x89   :  { %v87_v51 = vpop.permute.xlu0 %86  ;;  %v871_v54 = vpop.permute.xlu1 %106 }
  0x8d   :  { %v869_v53 = vpop.permute.xlu0 %101  ;;  %v875_v58 = vpop.permute.xlu1 %116 }
  0x91   :  { %v873_v55 = vpop.permute.xlu0 %111  ;;  %v127_v6 = vpop.permute.xlu1 %126 }
  0x95   :  { %v122_v61 = vpop.permute.xlu0 %121  ;;  %v137_v28 = vpop.permute.xlu1 %136 }
  0x99   :  { %v132_v17 = vpop.permute.xlu0 %131 }
  0x9f   :  { %v142_v39 = vpop.permute.xlu0 %141 }
  0xe2   :  { %v597_v56 = vpop.f32.mrf.mxu0  ;;  %v621_v57 = vpop.f32.mrf.mxu1 }
  0xe4   :  { %v598_v59 = vpop.f32.mrf.mxu0  ;;  %v622_v60 = vpop.f32.mrf.mxu1 }
  0xe5   :  { %v599_v62 = vadd.f32 %v598_v59, %v597_v56  ;;  %v623_v63 = vadd.f32 %v622_v60, %v621_v57 }
  0xe6   :  { %v600_v0 = vpop.f32.mrf.mxu0  ;;  %v624_v1 = vpop.f32.mrf.mxu1 }
  0xe7   :  { %v370_v2 = vadd.f32 %v599_v62, %v82_v49  ;;  %v402_v3 = vadd.f32 %v623_v63, %v122_v61 }
  0xe8   :  { %v601_v4 = vpop.f32.mrf.mxu0  ;;  %v625_v5 = vpop.f32.mrf.mxu1 }
  0xe9   :  { %v565_v7 = vpack.c.bf16 %v370_v2, %v370_v2  ;;  %v573_v8 = vpack.c.bf16 %v402_v3, %v402_v3  ;;  %v602_v9 = vadd.f32 %v601_v4, %v600_v0  ;;  %v626_v10 = vadd.f32 %v625_v5, %v624_v1  ;;  %v152_v0 = vpop.permute.xlu0 %151 }
  0xea   :  { %v603_v11 = vpop.f32.mrf.mxu0  ;;  %v627_v12 = vpop.f32.mrf.mxu1 }
  0xeb   :  { %497 = vst.msk [vmem:[%s948_s3] sm:$0xf] %vm496_vm0, %v565_v7  ;;  %505 = vst.msk [vmem:[%s948_s3 + $0x20] sm:$0xf] %vm496_vm0, %v573_v8  ;;  %v373_v13 = vadd.f32 %v602_v9, %v87_v51  ;;  %v405_v14 = vadd.f32 %v626_v10, %v127_v6 }
  0xec   :  { %v604_v15 = vpop.f32.mrf.mxu0  ;;  %v628_v16 = vpop.f32.mrf.mxu1 }
  0xed   :  { %v566_v18 = vpack.c.bf16 %v373_v13, %v373_v13  ;;  %v574_v19 = vpack.c.bf16 %v405_v14, %v405_v14  ;;  %v605_v20 = vadd.f32 %v604_v15, %v603_v11  ;;  %v629_v21 = vadd.f32 %v628_v16, %v627_v12 }
  0xee   :  { %v606_v22 = vpop.f32.mrf.mxu0  ;;  %v630_v23 = vpop.f32.mrf.mxu1 }
  0xef   :  { %498 = vst.msk [vmem:[%s948_s3 + $0x4] sm:$0xf] %vm496_vm0, %v566_v18  ;;  %506 = vst.msk [vmem:[%s948_s3 + $0x24] sm:$0xf] %vm496_vm0, %v574_v19  ;;  %v378_v24 = vadd.f32 %v605_v20, %v92_v50  ;;  %v410_v25 = vadd.f32 %v629_v21, %v132_v17  ;;  %v147_v50 = vpop.permute.xlu1 %146 }
  0xf0   :  { %v607_v26 = vpop.f32.mrf.mxu0  ;;  %v631_v27 = vpop.f32.mrf.mxu1 }
  0xf1   :  { %v567_v29 = vpack.c.bf16 %v378_v24, %v378_v24  ;;  %v575_v30 = vpack.c.bf16 %v410_v25, %v410_v25  ;;  %v608_v31 = vadd.f32 %v607_v26, %v606_v22  ;;  %v632_v32 = vadd.f32 %v631_v27, %v630_v23 }
  0xf2   :  { %v609_v33 = vpop.f32.mrf.mxu0  ;;  %v633_v34 = vpop.f32.mrf.mxu1 }
  0xf3   :  { %499 = vst.msk [vmem:[%s948_s3 + $0x8] sm:$0xf] %vm496_vm0, %v567_v29  ;;  %507 = vst.msk [vmem:[%s948_s3 + $0x28] sm:$0xf] %vm496_vm0, %v575_v30  ;;  %v381_v35 = vadd.f32 %v608_v31, %v97_v52  ;;  %v413_v36 = vadd.f32 %v632_v32, %v137_v28  ;;  %v157_v14 = vpop.permute.xlu1 %156 }
  0xf4   :  { %v610_v37 = vpop.f32.mrf.mxu0  ;;  %v634_v38 = vpop.f32.mrf.mxu1 }
  0xf5   :  { %v568_v40 = vpack.c.bf16 %v381_v35, %v381_v35  ;;  %v576_v41 = vpack.c.bf16 %v413_v36, %v413_v36  ;;  %v611_v42 = vadd.f32 %v610_v37, %v609_v33  ;;  %v635_v43 = vadd.f32 %v634_v38, %v633_v34 }
  0xf6   :  { %v612_v44 = vpop.f32.mrf.mxu0  ;;  %v636_v45 = vpop.f32.mrf.mxu1 }
  0xf7   :  { %500 = vst.msk [vmem:[%s948_s3 + $0xc] sm:$0xf] %vm496_vm0, %v568_v40  ;;  %508 = vst.msk [vmem:[%s948_s3 + $0x2c] sm:$0xf] %vm496_vm0, %v576_v41  ;;  %v386_v46 = vadd.f32 %v611_v42, %v869_v53  ;;  %v418_v47 = vadd.f32 %v635_v43, %v142_v39 }
  0xf8   :  { %v613_v48 = vpop.f32.mrf.mxu0  ;;  %v637_v49 = vpop.f32.mrf.mxu1 }
  0xf9   :  { %v569_v51 = vpack.c.bf16 %v386_v46, %v386_v46  ;;  %v577_v52 = vpack.c.bf16 %v418_v47, %v418_v47  ;;  %v614_v56 = vadd.f32 %v613_v48, %v612_v44  ;;  %v638_v57 = vadd.f32 %v637_v49, %v636_v45 }
  0xfa   :  { %v615_v59 = vpop.f32.mrf.mxu0  ;;  %v639_v60 = vpop.f32.mrf.mxu1 }
  0xfb   :  { %501 = vst.msk [vmem:[%s948_s3 + $0x10] sm:$0xf] %vm496_vm0, %v569_v51  ;;  %509 = vst.msk [vmem:[%s948_s3 + $0x30] sm:$0xf] %vm496_vm0, %v577_v52  ;;  %v389_v53 = vadd.f32 %v614_v56, %v871_v54  ;;  %v421_v61 = vadd.f32 %v638_v57, %v147_v50 }
  0xfc   :  { %v616_v62 = vpop.f32.mrf.mxu0  ;;  %v640_v63 = vpop.f32.mrf.mxu1 }
  0xfd   :  { %v570_v1 = vpack.c.bf16 %v389_v53, %v389_v53  ;;  %v578_v2 = vpack.c.bf16 %v421_v61, %v421_v61  ;;  %v617_v3 = vadd.f32 %v616_v62, %v615_v59  ;;  %v641_v4 = vadd.f32 %v640_v63, %v639_v60 }
  0xfe   :  { %v618_v5 = vpop.f32.mrf.mxu0  ;;  %v642_v6 = vpop.f32.mrf.mxu1 }
  0xff   :  { %502 = vst.msk [vmem:[%s948_s3 + $0x14] sm:$0xf] %vm496_vm0, %v570_v1  ;;  %510 = vst.msk [vmem:[%s948_s3 + $0x34] sm:$0xf] %vm496_vm0, %v578_v2  ;;  %v394_v54 = vadd.f32 %v617_v3, %v873_v55  ;;  %v426_v7 = vadd.f32 %v641_v4, %v152_v0 }
 0x100   :  { %v619_v8 = vpop.f32.mrf.mxu0  ;;  %v643_v9 = vpop.f32.mrf.mxu1 }
 0x101   :  { %v571_v10 = vpack.c.bf16 %v394_v54, %v394_v54  ;;  %v579_v11 = vpack.c.bf16 %v426_v7, %v426_v7  ;;  %v620_v12 = vadd.f32 %v619_v8, %v618_v5  ;;  %v644_v13 = vadd.f32 %v643_v9, %v642_v6 }
 0x103   :  { %503 = vst.msk [vmem:[%s948_s3 + $0x18] sm:$0xf] %vm496_vm0, %v571_v10  ;;  %511 = vst.msk [vmem:[%s948_s3 + $0x38] sm:$0xf] %vm496_vm0, %v579_v11  ;;  %v397_v55 = vadd.f32 %v620_v12, %v875_v58  ;;  %v429_v15 = vadd.f32 %v644_v13, %v157_v14 }
 0x105   :  { %v572_v16 = vpack.c.bf16 %v397_v55, %v397_v55  ;;  %v580_v17 = vpack.c.bf16 %v429_v15, %v429_v15 }
 0x107   :  { %504 = vst.msk [vmem:[%s948_s3 + $0x1c] sm:$0xf] %vm496_vm0, %v572_v16  ;;  %512 = vst.msk [vmem:[%s948_s3 + $0x3c] sm:$0xf] %vm496_vm0, %v580_v17 }

// kernel: _lambda_.19
= control target key start
LH: loop header
LB: loop body
LE: loop exit
PB: predicated region body
PF: predicated region fallthrough
CT: control target
= control target key end

     0   :  { %v386_v1 = vmov 0   ;;  %s479_s1 = inlined_call_operand.vmem [shape: bf16[128,128], index: 1, kind: input, shape index: {}]   ;;  %s480_s0 = inlined_call_operand.vmem [shape: bf16[64,128], index: 0, kind: input, shape index: {}]   ;;  %s481_s2 = inlined_call_operand.vmem [shape: f32[64,1], index: 2, kind: input, shape index: {}]   ;;  %s482_s3 = inlined_call_operand.vmem [shape: bf16[64,128], index: 3, kind: output, shape index: {}]  }
   0x1   :  { %v374_v0 = vld [vmem:[%s479_s1 + $0x38] sm:$0xff]   ;;  %373 = vset.pattern.permute.xlu1 %v386_v1  ;;  %372 = vset.pattern.permute.xlu0 %v386_v1  ;;  %v375_v2 = vld [vmem:[%s479_s1 + $0x30] sm:$0xff]   ;;  %v376_v3 = vld [vmem:[%s479_s1 + $0x28] sm:$0xff]  }
   0x2   :  { %331 = vmatprep.subr.bf16.mxu0 %v374_v0  ;;  %355 = vmatprep.subr.bf16.mxu1 %v374_v0  ;;  %v377_v4 = vld [vmem:[%s479_s1 + $0x20] sm:$0xff]   ;;  %v383_v6 = vld [vmem:[%s480_s0 + $0x10] sm:$0xff]   ;;  %v378_v7 = vld [vmem:[%s479_s1 + $0x18] sm:$0xff]  }
   0x3   :  { %332 = vmatpush3.bf16.msra.mxu0 %v374_v0  ;;  %363 = vmatpush3.bf16.msra.mxu1 %v374_v0  ;;  %v382_v5 = vld [vmem:[%s480_s0] sm:$0xff]   ;;  %v41_v8 = vld [vmem:[%s481_s2 + $0x10] sm:$0xff]  ;;  %v42_v10 = vld [vmem:[%s481_s2 + $0x18] sm:$0xff] }
   0x4   :  { %333 = vmatprep.subr.bf16.mxu0 %v375_v2  ;;  %356 = vmatprep.subr.bf16.mxu1 %v375_v2  ;;  %v39_v9 = vld [vmem:[%s481_s2] sm:$0xff]  ;;  %v40_v11 = vld [vmem:[%s481_s2 + $0x8] sm:$0xff]  ;;  %v379_v12 = vld [vmem:[%s479_s1 + $0x10] sm:$0xff]  }
   0x5   :  { %347 = vmatprep.mubr.bf16.mxu0 %v382_v5  ;;  %351 = vmatprep.mubr.bf16.mxu1 %v383_v6  ;;  %v44_v13 = vld [vmem:[%s481_s2 + $0x28] sm:$0xff]  ;;  %v43_v14 = vld [vmem:[%s481_s2 + $0x20] sm:$0xff]  ;;  %v46_v16 = vld [vmem:[%s481_s2 + $0x38] sm:$0xff] }
   0x6   :  { %59 = vperm.xlu1 %373, %v41_v8   ;;  %49 = vperm.xlu0 %372, %v39_v9   ;;  %v380_v15 = vld [vmem:[%s479_s1 + $0x8] sm:$0xff]   ;;  %v45_v17 = vld [vmem:[%s481_s2 + $0x30] sm:$0xff]  ;;  %v381_v18 = vld [vmem:[%s479_s1] sm:$0xff]  }
   0x7   :  { %334 = vmatpush3.bf16.msra.mxu0 %v375_v2  ;;  %364 = vmatpush3.bf16.msra.mxu1 %v375_v2  ;;  %v384_v19 = vld [vmem:[%s480_s0 + $0x8] sm:$0xff]   ;;  %v385_v20 = vld [vmem:[%s480_s0 + $0x18] sm:$0xff]  }
   0x8   :  { %335 = vmatprep.subr.bf16.mxu0 %v376_v3  ;;  %357 = vmatprep.subr.bf16.mxu1 %v376_v3 }
   0xa   :  { %64 = vperm.xlu1 %373, %v42_v10   ;;  %54 = vperm.xlu0 %372, %v40_v11  }
   0xb   :  { %336 = vmatpush3.bf16.msra.mxu0 %v376_v3  ;;  %365 = vmatpush3.bf16.msra.mxu1 %v376_v3 }
   0xc   :  { %337 = vmatprep.subr.bf16.mxu0 %v377_v4  ;;  %358 = vmatprep.subr.bf16.mxu1 %v377_v4 }
   0xe   :  { %74 = vperm.xlu1 %373, %v44_v13   ;;  %69 = vperm.xlu0 %372, %v43_v14  }
   0xf   :  { %338 = vmatpush3.bf16.msra.mxu0 %v377_v4  ;;  %366 = vmatpush3.bf16.msra.mxu1 %v377_v4 }
  0x10   :  { %339 = vmatprep.subr.bf16.mxu0 %v378_v7  ;;  %359 = vmatprep.subr.bf16.mxu1 %v378_v7 }
  0x12   :  { %84 = vperm.xlu1 %373, %v46_v16   ;;  %79 = vperm.xlu0 %372, %v45_v17  }
  0x13   :  { %340 = vmatpush3.bf16.msra.mxu0 %v378_v7  ;;  %367 = vmatpush3.bf16.msra.mxu1 %v378_v7 }
  0x14   :  { %341 = vmatprep.subr.bf16.mxu0 %v379_v12  ;;  %360 = vmatprep.subr.bf16.mxu1 %v379_v12 }
  0x17   :  { %342 = vmatpush3.bf16.msra.mxu0 %v379_v12  ;;  %368 = vmatpush3.bf16.msra.mxu1 %v379_v12 }
  0x18   :  { %343 = vmatprep.subr.bf16.mxu0 %v380_v15  ;;  %361 = vmatprep.subr.bf16.mxu1 %v380_v15 }
  0x1b   :  { %344 = vmatpush3.bf16.msra.mxu0 %v380_v15  ;;  %369 = vmatpush3.bf16.msra.mxu1 %v380_v15 }
  0x1c   :  { %345 = vmatprep.subr.bf16.mxu0 %v381_v18  ;;  %362 = vmatprep.subr.bf16.mxu1 %v381_v18 }
  0x1f   :  { %346 = vmatpush3.bf16.msra.mxu0 %v381_v18  ;;  %370 = vmatpush3.bf16.msra.mxu1 %v381_v18 }
  0x22   :  { %348 = vmatmul.mubr.bf16.vlgmr.msra.gmra.mxu0 %v384_v19  ;;  %352 = vmatmul.mubr.bf16.vlgmr.msra.gmra.mxu1 %v385_v20 }
  0x81   :  { %v60_v21 = vpop.permute.xlu1 %59  ;;  %v50_v22 = vpop.permute.xlu0 %49 }
  0x85   :  { %v65_v23 = vpop.permute.xlu1 %64  ;;  %v55_v24 = vpop.permute.xlu0 %54 }
  0x89   :  { %v75_v25 = vpop.permute.xlu1 %74  ;;  %v70_v26 = vpop.permute.xlu0 %69 }
  0x8d   :  { %v85_v31 = vpop.permute.xlu1 %84  ;;  %v80_v32 = vpop.permute.xlu0 %79 }
  0xe2   :  { %v349_v27 = vpop.f32.mrf.mxu0  ;;  %v353_v28 = vpop.f32.mrf.mxu1 }
  0xe3   :  { %v202_v35 = vadd.f32 %v349_v27, %v60_v21  ;;  %v218_v36 = vadd.f32 %v353_v28, %v80_v32 }
  0xe4   :  { %v193_v29 = vpop.f32.mrf.mxu0  ;;  %v209_v30 = vpop.f32.mrf.mxu1 }
  0xe5   :  { %v194_v39 = vadd.f32 %v193_v29, %v50_v22  ;;  %v210_v40 = vadd.f32 %v209_v30, %v70_v26 }
  0xe6   :  { %v350_v33 = vpop.f32.mrf.mxu0  ;;  %v354_v34 = vpop.f32.mrf.mxu1 }
  0xe7   :  { %v205_v37 = vadd.f32 %v350_v33, %v65_v23  ;;  %v221_v38 = vadd.f32 %v354_v34, %v85_v31 }
  0xe8   :  { %v196_v41 = vpop.f32.mrf.mxu0  ;;  %v212_v42 = vpop.f32.mrf.mxu1 }
  0xe9   :  { %v304_v43 = vpack.c.bf16 %v205_v37, %v202_v35  ;;  %v314_v44 = vpack.c.bf16 %v221_v38, %v218_v36  ;;  %v197_v45 = vadd.f32 %v196_v41, %v55_v24  ;;  %v213_v46 = vadd.f32 %v212_v42, %v75_v25 }
  0xeb   :  { %316 = vst [vmem:[%s482_s3 + $0x8] sm:$0xff] %v304_v43   ;;  %318 = vst [vmem:[%s482_s3 + $0x18] sm:$0xff] %v314_v44   ;;  %v299_v47 = vpack.c.bf16 %v197_v45, %v194_v39  ;;  %v309_v48 = vpack.c.bf16 %v213_v46, %v210_v40 }
  0xed   :  { %300 = vst [vmem:[%s482_s3] sm:$0xff] %v299_v47   ;;  %317 = vst [vmem:[%s482_s3 + $0x10] sm:$0xff] %v309_v48  }

// kernel: _lambda_.21
= control target key start
LH: loop header
LB: loop body
LE: loop exit
PB: predicated region body
PF: predicated region fallthrough
CT: control target
= control target key end

     0   :  { %s421_s12 = smov 0   ;;  %s447_s0 = inlined_call_operand.vmem [shape: bf16[3,8], index: 0, kind: input, shape index: {}]   ;;  %s448_s1 = inlined_call_operand.vmem [shape: bf16[8,1024], index: 1, kind: input, shape index: {}]   ;;  %s449_s2 = inlined_call_operand.vmem [shape: f32[3,1], index: 2, kind: input, shape index: {}]   ;;  %s450_s3 = inlined_call_operand.vmem [shape: f32[3,1024], index: 3, kind: output, shape index: {}]  }
   0x1 LB: > { %s359_s13 = sadd.s32 4294967295, %s398_s12   ;;  %p363_p0 = scmp.ge.s32.totalorder %s398_s12, 1  ;;  %s398_s12 = sphi %s421_s12, %s13_s12  }
   0x2   : > { %p138_p1 = scmp.lt.s32.totalorder %s398_s12, 3 }
   0x4   : > { %p139_p2 = pnand %p363_p0, %p138_p1 }
   0x5   : > { %s364_s14 = sshll.u32 (!%p139_p2), %s359_s13, 2 }
   0x6   : > { %142 = sbr.rel (%p139_p2) target bundleno = 221 (0xdd), region = 32  ;;  %p163_p3 = scmp.lt.s32.totalorder (!%p139_p2), %s364_s14, 7 }
   0xb   : > { %v400_v0 = vmov 0   ;;  %v178_v1 = vld [vmem:[%s449_s2] sm:$0x7]  ;;  %s452_s14 = smov (!%p163_p3, %s364_s14), 7  ;;  %vm198_vm0 = vcmask 1043456   ;;  %vm194_vm1 = vcmask 64512  }
   0xc   : > { %243 = vmatprep.mubr.bf16.mxu0 %v400_v0  ;;  %284 = vmatprep.mubr.bf16.mxu1 %v400_v0  ;;  %s365_s17 = sshll.u32 %s452_s14, 2  ;;  %v175_v10 = vld [vmem:[%s447_s0] sm:$0x3] }
   0xd   : > { %387 = vset.pattern.permute.xlu0 %v400_v0  ;;  %s166_s20 = scalar_lea.vmem %s448_s1, %s365_s17  ;;  %s172_s25 = scalar_lea.vmem %s450_s3, %s365_s17 }
   0xe   : > { %181 = vperm.xlu0 %387, %v178_v1   ;;  %v176_v2 = vld [vmem:[%s166_s20] sm:$0xff]  ;;  %v177_v3 = vld [vmem:[%s166_s20 + $0x8] sm:$0xff] }
   0xf   : > { %v369_v4 = vcombine.high %v176_v2, %v176_v2  ;;  %v371_v5 = vcombine.high %v177_v3, %v177_v3  ;;  %v368_v6 = vcombine.low %v176_v2, %v176_v2  ;;  %v370_v7 = vcombine.low %v177_v3, %v177_v3 }
  0x11   : > { %372 = vmatprep.subr.msk.bf16.mxu0 %vm198_vm0, %v369_v4  ;;  %374 = vmatprep.subr.msk.bf16.mxu1 %vm198_vm0, %v371_v5  ;;  %v200_v8 = vsel %vm198_vm0, %v368_v6, 0  ;;  %v206_v9 = vsel %vm198_vm0, %v370_v7, 0 }
  0x12   : > { %226 = vmatpush1.bf16.msra.mxu0 %v200_v8  ;;  %267 = vmatpush1.bf16.msra.mxu1 %v206_v9 }
  0x15   : > { %373 = vmatmul.mubr.msk.bf16.vlgmr.msra.gmra.mxu0 %vm194_vm1, %v175_v10  ;;  %375 = vmatmul.mubr.msk.bf16.vlgmr.msra.gmra.mxu1 %vm194_vm1, %v175_v10 }
  0x89   : > { %v182_v11 = vpop.permute.xlu0 %181 }
  0xd5   : > { %v245_v12 = vpop.f32.mrf.mxu0  ;;  %v286_v13 = vpop.f32.mrf.mxu1 }
  0xd6   : > { %v287_v14 = vadd.f32 %v286_v13, %v182_v11  ;;  %v246_v17 = vadd.f32 %v245_v12, %v182_v11 }
  0xd7   : > { %v247_v15 = vpop.f32.mrf.mxu0  ;;  %v288_v16 = vpop.f32.mrf.mxu1 }
  0xd8   : > { %v248_v18 = vadd.f32 %v247_v15, %v182_v11  ;;  %v289_v19 = vadd.f32 %v288_v16, %v182_v11 }
  0xd9   : > { %v249_v20 = vpop.f32.mrf.mxu0  ;;  %v290_v21 = vpop.f32.mrf.mxu1 }
  0xda   : > { %v297_v22 = vcombine.low %v246_v17, %v248_v18  ;;  %v298_v23 = vcombine.low %v287_v14, %v289_v19 }
  0xdb   : > { %v250_v24 = vpop.f32.mrf.mxu0  ;;  %v291_v25 = vpop.f32.mrf.mxu1 }
  0xdc   : > { %301 = vst [vmem:[%s172_s25] sm:$0x77] %v297_v22  ;;  %302 = vst [vmem:[%s172_s25 + $0x8] sm:$0x77] %v298_v23 }
  0xdd PF: > { %s13_s12 = sadd.s32 1, %s398_s12  }
  0xde   : > { %p10_p4 = scmp.ge.s32.totalorder %s13_s12, 4  }
  0xe0   :  { %12 = sbr.rel (!%p10_p4) target bundleno = 1 (0x1), region = 62 }

// kernel: _lambda_.20
= control target key start
LH: loop header
LB: loop body
LE: loop exit
PB: predicated region body
PF: predicated region fallthrough
CT: control target
= control target key end

     0   :  { %v1160_v3 = vmov 0   ;;  %vm679_vm0 = vcmask 719872   ;;  %vm683_vm1 = vcmask 1043456   ;;  %s1577_s1 = inlined_call_operand.vmem [shape: bf16[216,1024], index: 1, kind: input, shape index: {}]   ;;  %s1578_s0 = inlined_call_operand.vmem [shape: bf16[8,216], index: 0, kind: input, shape index: {}]   ;;  %s1579_s2 = inlined_call_operand.vmem [shape: f32[8,3], index: 2, kind: input, shape index: {}]   ;;  %s1580_s3 = inlined_call_operand.vmem [shape: bf16[8,1024], index: 3, kind: input, shape index: {}]   ;;  %s1581_s4 = inlined_call_operand.vmem [shape: bf16[8,1024], index: 4, kind: output, shape index: {}]  }
   0x1   :  { %v75_v0 = vld [vmem:[%s1577_s1 + $0x1c0] sm:$0xff]  ;;  %v76_v2 = vld [vmem:[%s1577_s1 + $0x1c8] sm:$0xff]  ;;  %1144 = vset.pattern.permute.xlu0 %v1160_v3 }
   0x2   :  { %v79_v1 = vld [vmem:[%s1577_s1 + $0x1e0] sm:$0xff]  ;;  %v80_v5 = vld [vmem:[%s1577_s1 + $0x1e8] sm:$0xff] }
   0x3   :  { %v1070_v4 = vcombine.high %v75_v0, %v79_v1  ;;  %v1069_v6 = vcombine.low %v75_v0, %v79_v1  ;;  %v67_v7 = vld [vmem:[%s1577_s1 + $0x180] sm:$0xff]  ;;  %v1072_v9 = vcombine.high %v76_v2, %v80_v5  ;;  %v1071_v10 = vcombine.low %v76_v2, %v80_v5  ;;  %v68_v12 = vld [vmem:[%s1577_s1 + $0x188] sm:$0xff] }
   0x4   :  { %v71_v8 = vld [vmem:[%s1577_s1 + $0x1a0] sm:$0xff]  ;;  %v72_v13 = vld [vmem:[%s1577_s1 + $0x1a8] sm:$0xff] }
   0x5   :  { %v1062_v11 = vcombine.high %v67_v7, %v71_v8  ;;  %v59_v14 = vld [vmem:[%s1577_s1 + $0x140] sm:$0xff]  ;;  %708 = vmatprep.subr.bf16.mxu0 %v1070_v4  ;;  %v1064_v15 = vcombine.high %v68_v12, %v72_v13  ;;  %v60_v17 = vld [vmem:[%s1577_s1 + $0x148] sm:$0xff]  ;;  %749 = vmatprep.subr.bf16.mxu1 %v1072_v9  ;;  %v1061_v19 = vcombine.low %v67_v7, %v71_v8 }
   0x6   :  { %v63_v16 = vld [vmem:[%s1577_s1 + $0x160] sm:$0xff]  ;;  %v64_v18 = vld [vmem:[%s1577_s1 + $0x168] sm:$0xff]  ;;  %709 = vmatpush1.bf16.msra.mxu0 %v1069_v6  ;;  %750 = vmatpush1.bf16.msra.mxu1 %v1071_v10  ;;  %v1063_v20 = vcombine.low %v68_v12, %v72_v13 }
   0x7   :  { %710 = vmatprep.subr.bf16.mxu0 %v1062_v11  ;;  %v1054_v21 = vcombine.high %v59_v14, %v63_v16  ;;  %751 = vmatprep.subr.bf16.mxu1 %v1064_v15  ;;  %v1056_v22 = vcombine.high %v60_v17, %v64_v18  ;;  %v51_v23 = vld [vmem:[%s1577_s1 + $0x100] sm:$0xff]  ;;  %v52_v25 = vld [vmem:[%s1577_s1 + $0x108] sm:$0xff]  ;;  %v1053_v27 = vcombine.low %v59_v14, %v63_v16 }
   0x8   :  { %v55_v24 = vld [vmem:[%s1577_s1 + $0x120] sm:$0xff]  ;;  %v56_v26 = vld [vmem:[%s1577_s1 + $0x128] sm:$0xff]  ;;  %v1055_v28 = vcombine.low %v60_v17, %v64_v18 }
   0x9   :  { %v1046_v29 = vcombine.high %v51_v23, %v55_v24  ;;  %v1048_v30 = vcombine.high %v52_v25, %v56_v26  ;;  %v43_v31 = vld [vmem:[%s1577_s1 + $0xc0] sm:$0xff]  ;;  %v44_v33 = vld [vmem:[%s1577_s1 + $0xc8] sm:$0xff]  ;;  %v1045_v35 = vcombine.low %v51_v23, %v55_v24  ;;  %v1047_v36 = vcombine.low %v52_v25, %v56_v26 }
   0xa   :  { %711 = vmatpush1.bf16.msra.mxu0 %v1061_v19  ;;  %752 = vmatpush1.bf16.msra.mxu1 %v1063_v20  ;;  %v47_v32 = vld [vmem:[%s1577_s1 + $0xe0] sm:$0xff]  ;;  %v48_v34 = vld [vmem:[%s1577_s1 + $0xe8] sm:$0xff] }
   0xb   :  { %712 = vmatprep.subr.bf16.mxu0 %v1054_v21  ;;  %753 = vmatprep.subr.bf16.mxu1 %v1056_v22  ;;  %v1038_v37 = vcombine.high %v43_v31, %v47_v32  ;;  %v1040_v38 = vcombine.high %v44_v33, %v48_v34  ;;  %v35_v39 = vld [vmem:[%s1577_s1 + $0x80] sm:$0xff]  ;;  %v36_v41 = vld [vmem:[%s1577_s1 + $0x88] sm:$0xff]  ;;  %v1037_v43 = vcombine.low %v43_v31, %v47_v32 }
   0xc   :  { %v39_v40 = vld [vmem:[%s1577_s1 + $0xa0] sm:$0xff]  ;;  %v40_v42 = vld [vmem:[%s1577_s1 + $0xa8] sm:$0xff]  ;;  %v1039_v44 = vcombine.low %v44_v33, %v48_v34 }
   0xd   :  { %v1030_v45 = vcombine.high %v35_v39, %v39_v40  ;;  %v1032_v46 = vcombine.high %v36_v41, %v40_v42  ;;  %v27_v47 = vld [vmem:[%s1577_s1 + $0x40] sm:$0xff]  ;;  %v28_v50 = vld [vmem:[%s1577_s1 + $0x48] sm:$0xff]  ;;  %v1029_v53 = vcombine.low %v35_v39, %v39_v40  ;;  %v1031_v54 = vcombine.low %v36_v41, %v40_v42 }
   0xe   :  { %713 = vmatpush1.bf16.msra.mxu0 %v1053_v27  ;;  %754 = vmatpush1.bf16.msra.mxu1 %v1055_v28  ;;  %v31_v48 = vld [vmem:[%s1577_s1 + $0x60] sm:$0xff]  ;;  %v32_v51 = vld [vmem:[%s1577_s1 + $0x68] sm:$0xff] }
   0xf   :  { %714 = vmatprep.subr.bf16.mxu0 %v1046_v29  ;;  %755 = vmatprep.subr.bf16.mxu1 %v1048_v30  ;;  %v1269_v49 = vld [vmem:[%s1578_s0] sm:$0xff]  ;;  %v1022_v55 = vcombine.high %v27_v47, %v31_v48  ;;  %v1024_v56 = vcombine.high %v28_v50, %v32_v51  ;;  %v20_v59 = vld [vmem:[%s1577_s1 + $0x8] sm:$0xff]  ;;  %v1021_v61 = vcombine.low %v27_v47, %v31_v48 }
  0x10   :  { %v1279_v52 = vcombine.high %v1269_v49, %v1269_v49  ;;  %v19_v57 = vld [vmem:[%s1577_s1] sm:$0xff]  ;;  %v24_v60 = vld [vmem:[%s1577_s1 + $0x28] sm:$0xff]  ;;  %v1023_v62 = vcombine.low %v28_v50, %v32_v51  ;;  %v77_v51 = vld [vmem:[%s1577_s1 + $0x1d0] sm:$0xff] }
  0x11   :  { %v23_v58 = vld [vmem:[%s1577_s1 + $0x20] sm:$0xff]  ;;  %v1016_v0 = vcombine.high %v20_v59, %v24_v60  ;;  %v124_v2 = vld [vmem:[%s1577_s1 + $0x348] sm:$0xff]  ;;  %v1015_v4 = vcombine.low %v20_v59, %v24_v60  ;;  %v69_v60 = vld [vmem:[%s1577_s1 + $0x190] sm:$0xff] }
  0x12   :  { %715 = vmatpush1.bf16.msra.mxu0 %v1045_v35  ;;  %756 = vmatpush1.bf16.msra.mxu1 %v1047_v36  ;;  %v1014_v63 = vcombine.high %v19_v57, %v23_v58  ;;  %v123_v1 = vld [vmem:[%s1577_s1 + $0x340] sm:$0xff]  ;;  %v1013_v3 = vcombine.low %v19_v57, %v23_v58  ;;  %v1120_v7 = vcombine.high %v124_v2, %v124_v2  ;;  %v116_v11 = vld [vmem:[%s1577_s1 + $0x308] sm:$0xff] }
  0x13   :  { %716 = vmatprep.subr.bf16.mxu0 %v1038_v37  ;;  %757 = vmatprep.subr.bf16.mxu1 %v1040_v38  ;;  %v1118_v5 = vcombine.high %v123_v1, %v123_v1  ;;  %v1117_v6 = vcombine.low %v123_v1, %v123_v1  ;;  %v1119_v8 = vcombine.low %v124_v2, %v124_v2  ;;  %v115_v9 = vld [vmem:[%s1577_s1 + $0x300] sm:$0xff]  ;;  %v120_v12 = vld [vmem:[%s1577_s1 + $0x328] sm:$0xff] }
  0x14   :  { %1126 = vmatprep.mubr.msk.bf16.mxu0 %vm679_vm0, %v1279_v52  ;;  %1128 = vmatprep.mubr.msk.bf16.mxu1 %vm679_vm0, %v1279_v52  ;;  %v119_v10 = vld [vmem:[%s1577_s1 + $0x320] sm:$0xff]  ;;  %v1112_v16 = vcombine.high %v116_v11, %v120_v12  ;;  %v108_v19 = vld [vmem:[%s1577_s1 + $0x2c8] sm:$0xff]  ;;  %v1111_v23 = vcombine.low %v116_v11, %v120_v12  ;;  %v53_v12 = vld [vmem:[%s1577_s1 + $0x110] sm:$0xff] }
  0x15   :  { %v685_v13 = vsel %vm683_vm1, %v1117_v6, 0  ;;  %v1110_v14 = vcombine.high %v115_v9, %v119_v10  ;;  %v691_v15 = vsel %vm683_vm1, %v1119_v8, 0  ;;  %v107_v17 = vld [vmem:[%s1577_s1 + $0x2c0] sm:$0xff]  ;;  %v112_v20 = vld [vmem:[%s1577_s1 + $0x2e8] sm:$0xff]  ;;  %v1109_v21 = vcombine.low %v115_v9, %v119_v10  ;;  %v62_v6 = vld [vmem:[%s1577_s1 + $0x158] sm:$0xff] }
  0x16   :  { %717 = vmatpush1.bf16.msra.mxu0 %v1037_v43  ;;  %758 = vmatpush1.bf16.msra.mxu1 %v1039_v44  ;;  %v111_v18 = vld [vmem:[%s1577_s1 + $0x2e0] sm:$0xff]  ;;  %v1104_v25 = vcombine.high %v108_v19, %v112_v20  ;;  %v100_v28 = vld [vmem:[%s1577_s1 + $0x288] sm:$0xff]  ;;  %v1103_v31 = vcombine.low %v108_v19, %v112_v20  ;;  %v45_v20 = vld [vmem:[%s1577_s1 + $0xd0] sm:$0xff] }
  0x17   :  { %718 = vmatprep.subr.bf16.mxu0 %v1030_v45  ;;  %759 = vmatprep.subr.bf16.mxu1 %v1032_v46  ;;  %v1334_v22 = vld [vmem:[%s1579_s2] sm:$0xff]  ;;  %v1102_v24 = vcombine.high %v107_v17, %v111_v18  ;;  %v104_v29 = vld [vmem:[%s1577_s1 + $0x2a8] sm:$0xff]  ;;  %v1101_v30 = vcombine.low %v107_v17, %v111_v18 }
  0x18   :  { %v99_v26 = vld [vmem:[%s1577_s1 + $0x280] sm:$0xff]  ;;  %130 = vperm.xlu0 %1144, %v1334_v22   ;;  %v1096_v33 = vcombine.high %v100_v28, %v104_v29  ;;  %v92_v36 = vld [vmem:[%s1577_s1 + $0x248] sm:$0xff]  ;;  %v1095_v39 = vcombine.low %v100_v28, %v104_v29  ;;  %v37_v28 = vld [vmem:[%s1577_s1 + $0x90] sm:$0xff] }
  0x19   :  { %v103_v27 = vld [vmem:[%s1577_s1 + $0x2a0] sm:$0xff]  ;;  %v96_v37 = vld [vmem:[%s1577_s1 + $0x268] sm:$0xff]  ;;  %v41_v29 = vld [vmem:[%s1577_s1 + $0xb0] sm:$0xff] }
  0x1a   :  { %719 = vmatpush1.bf16.msra.mxu0 %v1029_v53  ;;  %760 = vmatpush1.bf16.msra.mxu1 %v1031_v54  ;;  %v1094_v32 = vcombine.high %v99_v26, %v103_v27  ;;  %v91_v34 = vld [vmem:[%s1577_s1 + $0x240] sm:$0xff]  ;;  %v1093_v38 = vcombine.low %v99_v26, %v103_v27  ;;  %v1088_v41 = vcombine.high %v92_v36, %v96_v37  ;;  %v84_v44 = vld [vmem:[%s1577_s1 + $0x208] sm:$0xff]  ;;  %v81_v53 = vld [vmem:[%s1577_s1 + $0x1f0] sm:$0xff] }
  0x1b   :  { %720 = vmatprep.subr.bf16.mxu0 %v1022_v55  ;;  %761 = vmatprep.subr.bf16.mxu1 %v1024_v56  ;;  %v95_v35 = vld [vmem:[%s1577_s1 + $0x260] sm:$0xff]  ;;  %v88_v45 = vld [vmem:[%s1577_s1 + $0x228] sm:$0xff]  ;;  %v1087_v47 = vcombine.low %v92_v36, %v96_v37  ;;  %v78_v54 = vld [vmem:[%s1577_s1 + $0x1d8] sm:$0xff]  ;;  %v1074_v58 = vcombine.high %v77_v51, %v81_v53  ;;  %v1073_v1 = vcombine.low %v77_v51, %v81_v53 }
  0x1c   :  { %v1086_v40 = vcombine.high %v91_v34, %v95_v35  ;;  %v83_v42 = vld [vmem:[%s1577_s1 + $0x200] sm:$0xff]  ;;  %v1085_v46 = vcombine.low %v91_v34, %v95_v35  ;;  %v1080_v50 = vcombine.high %v84_v44, %v88_v45  ;;  %v82_v55 = vld [vmem:[%s1577_s1 + $0x1f8] sm:$0xff]  ;;  %v1079_v57 = vcombine.low %v84_v44, %v88_v45  ;;  %v29_v36 = vld [vmem:[%s1577_s1 + $0x50] sm:$0xff] }
  0x1d   :  { %v87_v43 = vld [vmem:[%s1577_s1 + $0x220] sm:$0xff]  ;;  %v1076_v59 = vcombine.high %v78_v54, %v82_v55  ;;  %v1075_v2 = vcombine.low %v78_v54, %v82_v55  ;;  %v1034_v34 = vcombine.high %v37_v28, %v41_v29  ;;  %v33_v37 = vld [vmem:[%s1577_s1 + $0x70] sm:$0xff]  ;;  %v126_v55 = vld [vmem:[%s1577_s1 + $0x358] sm:$0xff] }
  0x1e   :  { %721 = vmatpush1.bf16.msra.mxu0 %v1021_v61  ;;  %762 = vmatpush1.bf16.msra.mxu1 %v1023_v62  ;;  %v1078_v48 = vcombine.high %v83_v42, %v87_v43  ;;  %v1077_v56 = vcombine.low %v83_v42, %v87_v43  ;;  %v73_v61 = vld [vmem:[%s1577_s1 + $0x1b0] sm:$0xff]  ;;  %v1393_v62 = vcombine.low %v1269_v49, %v1269_v49 }
  0x1f   :  { %722 = vmatprep.subr.bf16.mxu0 %v1014_v63  ;;  %763 = vmatprep.subr.bf16.mxu1 %v1016_v0  ;;  %v70_v63 = vld [vmem:[%s1577_s1 + $0x198] sm:$0xff]  ;;  %v61_v49 = vld [vmem:[%s1577_s1 + $0x150] sm:$0xff]  ;;  %v1065_v8 = vcombine.low %v69_v60, %v73_v61  ;;  %v1026_v42 = vcombine.high %v29_v36, %v33_v37 }
  0x20   :  { %v74_v0 = vld [vmem:[%s1577_s1 + $0x1b8] sm:$0xff]  ;;  %v21_v44 = vld [vmem:[%s1577_s1 + $0x10] sm:$0xff] }
  0x21   :  { %v1067_v9 = vcombine.low %v70_v63, %v74_v0  ;;  %v25_v45 = vld [vmem:[%s1577_s1 + $0x30] sm:$0xff] }
  0x22   :  { %723 = vmatpush1.bf16.msra.mxu0 %v1013_v3  ;;  %764 = vmatpush1.bf16.msra.mxu1 %v1015_v4  ;;  %v1066_v3 = vcombine.high %v69_v60, %v73_v61  ;;  %v1068_v4 = vcombine.high %v70_v63, %v74_v0  ;;  %v1018_v51 = vcombine.high %v21_v44, %v25_v45  ;;  %v125_v54 = vld [vmem:[%s1577_s1 + $0x350] sm:$0xff] }
  0x23   :  { %1125 = vmatprep.subr.msk.bf16.mxu0 %vm683_vm1, %v1118_v5  ;;  %1127 = vmatprep.subr.msk.bf16.mxu1 %vm683_vm1, %v1120_v7  ;;  %v65_v5 = vld [vmem:[%s1577_s1 + $0x170] sm:$0xff]  ;;  %v66_v7 = vld [vmem:[%s1577_s1 + $0x178] sm:$0xff]  ;;  %v1124_v60 = vcombine.high %v126_v55, %v126_v55  ;;  %v1123_v61 = vcombine.low %v126_v55, %v126_v55 }
  0x24   :  { %v1058_v10 = vcombine.high %v61_v49, %v65_v5  ;;  %v1060_v11 = vcombine.high %v62_v6, %v66_v7  ;;  %v1059_v17 = vcombine.low %v62_v6, %v66_v7  ;;  %v117_v63 = vld [vmem:[%s1577_s1 + $0x310] sm:$0xff] }
  0x25   :  { %v121_v0 = vld [vmem:[%s1577_s1 + $0x330] sm:$0xff] }
  0x26   :  { %729 = vmatpush2.bf16.msra.mxu0 %v685_v13  ;;  %770 = vmatpush2.bf16.msra.mxu1 %v691_v15  ;;  %v57_v13 = vld [vmem:[%s1577_s1 + $0x130] sm:$0xff]  ;;  %v58_v15 = vld [vmem:[%s1577_s1 + $0x138] sm:$0xff] }
  0x27   :  { %730 = vmatprep.subr.bf16.mxu0 %v1110_v14  ;;  %771 = vmatprep.subr.bf16.mxu1 %v1112_v16  ;;  %v54_v14 = vld [vmem:[%s1577_s1 + $0x118] sm:$0xff]  ;;  %v1057_v16 = vcombine.low %v61_v49, %v65_v5  ;;  %v1050_v18 = vcombine.high %v53_v12, %v57_v13  ;;  %v703_v49 = vsel %vm683_vm1, %v1123_v61, 0  ;;  %v109_v6 = vld [vmem:[%s1577_s1 + $0x2d0] sm:$0xff] }
  0x28   :  { %v1052_v19 = vcombine.high %v54_v14, %v58_v15  ;;  %v113_v7 = vld [vmem:[%s1577_s1 + $0x2f0] sm:$0xff] }
  0x2a   :  { %731 = vmatpush2.bf16.msra.mxu0 %v1109_v21  ;;  %772 = vmatpush2.bf16.msra.mxu1 %v1111_v23  ;;  %v49_v21 = vld [vmem:[%s1577_s1 + $0xf0] sm:$0xff]  ;;  %v50_v23 = vld [vmem:[%s1577_s1 + $0xf8] sm:$0xff] }
  0x2b   :  { %732 = vmatprep.subr.bf16.mxu0 %v1102_v24  ;;  %773 = vmatprep.subr.bf16.mxu1 %v1104_v25  ;;  %v1049_v24 = vcombine.low %v53_v12, %v57_v13  ;;  %v1051_v25 = vcombine.low %v54_v14, %v58_v15  ;;  %v1042_v26 = vcombine.high %v45_v20, %v49_v21  ;;  %v101_v14 = vld [vmem:[%s1577_s1 + $0x290] sm:$0xff] }
  0x2c   :  { %v1106_v12 = vcombine.high %v109_v6, %v113_v7  ;;  %v105_v15 = vld [vmem:[%s1577_s1 + $0x2b0] sm:$0xff] }
  0x2e   :  { %733 = vmatpush2.bf16.msra.mxu0 %v1101_v30  ;;  %774 = vmatpush2.bf16.msra.mxu1 %v1103_v31  ;;  %v38_v30 = vld [vmem:[%s1577_s1 + $0x98] sm:$0xff] }
  0x2f   :  { %734 = vmatprep.subr.bf16.mxu0 %v1094_v32  ;;  %775 = vmatprep.subr.bf16.mxu1 %v1096_v33  ;;  %v42_v31 = vld [vmem:[%s1577_s1 + $0xb8] sm:$0xff]  ;;  %v1041_v32 = vcombine.low %v45_v20, %v49_v21  ;;  %v1098_v20 = vcombine.high %v101_v14, %v105_v15 }
  0x30   :  { %v1036_v35 = vcombine.high %v38_v30, %v42_v31 }
  0x32   :  { %735 = vmatpush2.bf16.msra.mxu0 %v1093_v38  ;;  %776 = vmatpush2.bf16.msra.mxu1 %v1095_v39  ;;  %v30_v38 = vld [vmem:[%s1577_s1 + $0x58] sm:$0xff] }
  0x33   :  { %736 = vmatprep.subr.bf16.mxu0 %v1086_v40  ;;  %777 = vmatprep.subr.bf16.mxu1 %v1088_v41  ;;  %v34_v39 = vld [vmem:[%s1577_s1 + $0x78] sm:$0xff]  ;;  %v1033_v40 = vcombine.low %v37_v28, %v41_v29  ;;  %v1035_v41 = vcombine.low %v38_v30, %v42_v31  ;;  %v85_v30 = vld [vmem:[%s1577_s1 + $0x210] sm:$0xff] }
  0x34   :  { %v1028_v43 = vcombine.high %v30_v38, %v34_v39  ;;  %v89_v31 = vld [vmem:[%s1577_s1 + $0x230] sm:$0xff] }
  0x36   :  { %737 = vmatpush2.bf16.msra.mxu0 %v1085_v46  ;;  %778 = vmatpush2.bf16.msra.mxu1 %v1087_v47  ;;  %v22_v46 = vld [vmem:[%s1577_s1 + $0x18] sm:$0xff] }
  0x37   :  { %738 = vmatprep.subr.bf16.mxu0 %v1078_v48  ;;  %779 = vmatprep.subr.bf16.mxu1 %v1080_v50  ;;  %v26_v47 = vld [vmem:[%s1577_s1 + $0x38] sm:$0xff]  ;;  %v1025_v48 = vcombine.low %v29_v36, %v33_v37  ;;  %v1027_v50 = vcombine.low %v30_v38, %v34_v39  ;;  %v1082_v36 = vcombine.high %v85_v30, %v89_v31 }
  0x38   :  { %v1020_v53 = vcombine.high %v22_v46, %v26_v47  ;;  %v1081_v38 = vcombine.low %v85_v30, %v89_v31 }
  0x3a   :  { %739 = vmatpush2.bf16.msra.mxu0 %v1077_v56  ;;  %780 = vmatpush2.bf16.msra.mxu1 %v1079_v57  ;;  %v1017_v56 = vcombine.low %v21_v44, %v25_v45  ;;  %v1019_v57 = vcombine.low %v22_v46, %v26_v47 }
  0x3b   :  { %790 = vmatprep.subr.bf16.mxu0 %v1074_v58  ;;  %831 = vmatprep.subr.bf16.mxu1 %v1076_v59  ;;  %v1122_v58 = vcombine.high %v125_v54, %v125_v54  ;;  %v1121_v59 = vcombine.low %v125_v54, %v125_v54 }
  0x3d   :  { %741 = vmatmul.mubr.bf16.vlgmr.msra.gmra.mxu0 %v1393_v62  ;;  %782 = vmatmul.mubr.bf16.vlgmr.msra.gmra.mxu1 %v1393_v62 }
  0x3e   :  { %791 = vmatpush1.bf16.msra.mxu0 %v1073_v1  ;;  %832 = vmatpush1.bf16.msra.mxu1 %v1075_v2  ;;  %v118_v1 = vld [vmem:[%s1577_s1 + $0x318] sm:$0xff] }
  0x3f   :  { %792 = vmatprep.subr.bf16.mxu0 %v1066_v3  ;;  %833 = vmatprep.subr.bf16.mxu1 %v1068_v4  ;;  %v122_v2 = vld [vmem:[%s1577_s1 + $0x338] sm:$0xff]  ;;  %v697_v3 = vsel %vm683_vm1, %v1121_v59, 0  ;;  %v1114_v4 = vcombine.high %v117_v63, %v121_v0 }
  0x40   :  { %1130 = vmatprep.mubr.msk.bf16.mxu0 %vm679_vm0, %v1279_v52  ;;  %1132 = vmatprep.mubr.msk.bf16.mxu1 %vm679_vm0, %v1279_v52  ;;  %v46_v52 = vld [vmem:[%s1577_s1 + $0xd8] sm:$0xff]  ;;  %v1116_v5 = vcombine.high %v118_v1, %v122_v2 }
  0x41   :  { %v1044_v27 = vcombine.high %v46_v52, %v50_v23  ;;  %v1043_v33 = vcombine.low %v46_v52, %v50_v23  ;;  %v93_v52 = vld [vmem:[%s1577_s1 + $0x250] sm:$0xff] }
  0x42   :  { %793 = vmatpush1.bf16.msra.mxu0 %v1065_v8  ;;  %834 = vmatpush1.bf16.msra.mxu1 %v1067_v9  ;;  %v110_v8 = vld [vmem:[%s1577_s1 + $0x2d8] sm:$0xff]  ;;  %v97_v23 = vld [vmem:[%s1577_s1 + $0x270] sm:$0xff] }
  0x43   :  { %794 = vmatprep.subr.bf16.mxu0 %v1058_v10  ;;  %835 = vmatprep.subr.bf16.mxu1 %v1060_v11  ;;  %v114_v9 = vld [vmem:[%s1577_s1 + $0x2f8] sm:$0xff]  ;;  %v1113_v10 = vcombine.low %v117_v63, %v121_v0  ;;  %v1115_v11 = vcombine.low %v118_v1, %v122_v2  ;;  %v1090_v28 = vcombine.high %v93_v52, %v97_v23 }
  0x44   :  { %v1108_v13 = vcombine.high %v110_v8, %v114_v9 }
  0x46   :  { %795 = vmatpush1.bf16.msra.mxu0 %v1057_v16  ;;  %836 = vmatpush1.bf16.msra.mxu1 %v1059_v17  ;;  %v102_v16 = vld [vmem:[%s1577_s1 + $0x298] sm:$0xff] }
  0x47   :  { %796 = vmatprep.subr.bf16.mxu0 %v1050_v18  ;;  %837 = vmatprep.subr.bf16.mxu1 %v1052_v19  ;;  %v106_v17 = vld [vmem:[%s1577_s1 + $0x2b8] sm:$0xff]  ;;  %v1105_v18 = vcombine.low %v109_v6, %v113_v7  ;;  %v1107_v19 = vcombine.low %v110_v8, %v114_v9 }
  0x48   :  { %v1100_v21 = vcombine.high %v102_v16, %v106_v17 }
  0x4a   :  { %797 = vmatpush1.bf16.msra.mxu0 %v1049_v24  ;;  %838 = vmatpush1.bf16.msra.mxu1 %v1051_v25  ;;  %v94_v24 = vld [vmem:[%s1577_s1 + $0x258] sm:$0xff] }
  0x4b   :  { %798 = vmatprep.subr.bf16.mxu0 %v1042_v26  ;;  %839 = vmatprep.subr.bf16.mxu1 %v1044_v27  ;;  %v98_v25 = vld [vmem:[%s1577_s1 + $0x278] sm:$0xff]  ;;  %v1097_v26 = vcombine.low %v101_v14, %v105_v15  ;;  %v1099_v27 = vcombine.low %v102_v16, %v106_v17 }
  0x4c   :  { %v1092_v29 = vcombine.high %v94_v24, %v98_v25 }
  0x4e   :  { %799 = vmatpush1.bf16.msra.mxu0 %v1041_v32  ;;  %840 = vmatpush1.bf16.msra.mxu1 %v1043_v33  ;;  %v86_v32 = vld [vmem:[%s1577_s1 + $0x218] sm:$0xff] }
  0x4f   :  { %800 = vmatprep.subr.bf16.mxu0 %v1034_v34  ;;  %841 = vmatprep.subr.bf16.mxu1 %v1036_v35  ;;  %v90_v33 = vld [vmem:[%s1577_s1 + $0x238] sm:$0xff]  ;;  %v1089_v34 = vcombine.low %v93_v52, %v97_v23  ;;  %v1091_v35 = vcombine.low %v94_v24, %v98_v25 }
  0x50   :  { %v1084_v37 = vcombine.high %v86_v32, %v90_v33  ;;  %v1083_v39 = vcombine.low %v86_v32, %v90_v33 }
  0x52   :  { %801 = vmatpush1.bf16.msra.mxu0 %v1033_v40  ;;  %842 = vmatpush1.bf16.msra.mxu1 %v1035_v41  ;;  %v1161_v40 = vmov 1  }
  0x53   :  { %802 = vmatprep.subr.bf16.mxu0 %v1026_v42  ;;  %843 = vmatprep.subr.bf16.mxu1 %v1028_v43 }
  0x54   :  { %1145 = vset.pattern.permute.xlu1 %v1161_v40  ;;  %v951_v40 = vld [vmem:[%s1580_s3] sm:$0xff] }
  0x55   :  { %920 = vperm.xlu1 %1145, %v1334_v22  }
  0x56   :  { %803 = vmatpush1.bf16.msra.mxu0 %v1025_v48  ;;  %844 = vmatpush1.bf16.msra.mxu1 %v1027_v50 }
  0x57   :  { %804 = vmatprep.subr.bf16.mxu0 %v1018_v51  ;;  %845 = vmatprep.subr.bf16.mxu1 %v1020_v53 }
  0x5a   :  { %805 = vmatpush1.bf16.msra.mxu0 %v1017_v56  ;;  %846 = vmatpush1.bf16.msra.mxu1 %v1019_v57 }
  0x5b   :  { %1129 = vmatprep.subr.msk.bf16.mxu0 %vm683_vm1, %v1122_v58  ;;  %1131 = vmatprep.subr.msk.bf16.mxu1 %vm683_vm1, %v1124_v60 }
  0x5e   :  { %811 = vmatpush2.bf16.msra.mxu0 %v697_v3  ;;  %852 = vmatpush2.bf16.msra.mxu1 %v703_v49 }
  0x5f   :  { %812 = vmatprep.subr.bf16.mxu0 %v1114_v4  ;;  %853 = vmatprep.subr.bf16.mxu1 %v1116_v5 }
  0x62   :  { %813 = vmatpush2.bf16.msra.mxu0 %v1113_v10  ;;  %854 = vmatpush2.bf16.msra.mxu1 %v1115_v11  ;;  %v1162_v10 = vmov 2  }
  0x63   :  { %814 = vmatprep.subr.bf16.mxu0 %v1106_v12  ;;  %855 = vmatprep.subr.bf16.mxu1 %v1108_v13 }
  0x64   :  { %1146 = vset.pattern.permute.xlu1 %v1162_v10  ;;  %1147 = vset.pattern.permute.xlu0 %v1162_v10 }
  0x66   :  { %815 = vmatpush2.bf16.msra.mxu0 %v1105_v18  ;;  %856 = vmatpush2.bf16.msra.mxu1 %v1107_v19 }
  0x67   :  { %816 = vmatprep.subr.bf16.mxu0 %v1098_v20  ;;  %857 = vmatprep.subr.bf16.mxu1 %v1100_v21 }
  0x6a   :  { %817 = vmatpush2.bf16.msra.mxu0 %v1097_v26  ;;  %858 = vmatpush2.bf16.msra.mxu1 %v1099_v27 }
  0x6b   :  { %818 = vmatprep.subr.bf16.mxu0 %v1090_v28  ;;  %859 = vmatprep.subr.bf16.mxu1 %v1092_v29 }
  0x6e   :  { %819 = vmatpush2.bf16.msra.mxu0 %v1089_v34  ;;  %860 = vmatpush2.bf16.msra.mxu1 %v1091_v35 }
  0x6f   :  { %820 = vmatprep.subr.bf16.mxu0 %v1082_v36  ;;  %861 = vmatprep.subr.bf16.mxu1 %v1084_v37 }
  0x72   :  { %821 = vmatpush2.bf16.msra.mxu0 %v1081_v38  ;;  %862 = vmatpush2.bf16.msra.mxu1 %v1083_v39 }
  0x75   :  { %823 = vmatmul.mubr.bf16.vlgmr.msra.gmra.mxu0 %v1393_v62  ;;  %864 = vmatmul.mubr.bf16.vlgmr.msra.gmra.mxu1 %v1393_v62 }
  0x93   :  { %v131_v50 = vpop.permute.xlu0 %130 }
  0xd0   :  { %v921_v36 = vpop.permute.xlu1 %920 }
  0xfd   :  { %v742_v41 = vpop.f32.mrf.mxu0  ;;  %v783_v42 = vpop.f32.mrf.mxu1 }
  0xfe   :  { %v743_v51 = vadd.f32 %v742_v41, %v131_v50  ;;  %v784_v55 = vadd.f32 %v783_v42, %v131_v50  ;;  %v952_v41 = vld [vmem:[%s1580_s3 + $0x8] sm:$0xff]  ;;  %v953_v42 = vld [vmem:[%s1580_s3 + $0x10] sm:$0xff] }
  0xff   :  { %v744_v43 = vpop.f32.mrf.mxu0  ;;  %v785_v44 = vpop.f32.mrf.mxu1 }
 0x100   :  { %v745_v53 = vadd.f32 %v744_v43, %v131_v50  ;;  %v786_v56 = vadd.f32 %v785_v44, %v131_v50  ;;  %v955_v43 = vunpack.c.l.bf16 %v951_v40  ;;  %v956_v44 = vunpack.c.h.bf16 %v951_v40 }
 0x101   :  { %v746_v45 = vpop.f32.mrf.mxu0  ;;  %v787_v46 = vpop.f32.mrf.mxu1 }
 0x102   :  { %v872_v54 = vadd.f32 %v745_v53, %v743_v51  ;;  %v957_v45 = vunpack.c.l.bf16 %v952_v41  ;;  %v958_v46 = vunpack.c.h.bf16 %v952_v41 }
 0x103   :  { %v747_v47 = vpop.f32.mrf.mxu0  ;;  %v788_v48 = vpop.f32.mrf.mxu1 }
 0x104   :  { %v873_v57 = vadd.f32 %v872_v54, %v784_v55  ;;  %v959_v48 = vunpack.c.l.bf16 %v953_v42 }
 0x106   :  { %v874_v58 = vadd.f32 %v873_v57, %v786_v56 }
 0x135   :  { %v824_v62 = vpop.f32.mrf.mxu0  ;;  %v865_v60 = vpop.f32.mrf.mxu1 }
 0x136   :  { %v825_v59 = vadd.f32 %v824_v62, %v131_v50  ;;  %v866_v3 = vadd.f32 %v865_v60, %v131_v50 }
 0x137   :  { %v826_v61 = vpop.f32.mrf.mxu0  ;;  %v867_v1 = vpop.f32.mrf.mxu1 }
 0x138   :  { %v875_v63 = vadd.f32 %v874_v58, %v825_v59  ;;  %v827_v0 = vadd.f32 %v826_v61, %v131_v50  ;;  %v868_v6 = vadd.f32 %v867_v1, %v131_v50  ;;  %v960_v50 = vunpack.c.h.bf16 %v953_v42 }
 0x139   :  { %v828_v2 = vpop.f32.mrf.mxu0  ;;  %v869_v49 = vpop.f32.mrf.mxu1 }
 0x13a   :  { %v876_v4 = vadd.f32 %v875_v63, %v827_v0 }
 0x13b   :  { %v829_v5 = vpop.f32.mrf.mxu0  ;;  %v870_v7 = vpop.f32.mrf.mxu1 }
 0x13c   :  { %v877_v8 = vadd.f32 %v876_v4, %v866_v3 }
 0x13e   :  { %v878_v9 = vadd.f32 %v877_v8, %v868_v6 }
 0x140   :  { %879 = vadd.xlane.f32.xlu0 %v878_v9 }
 0x1c9   :  { %v880_v11 = vpop.xlane.xlu0 %879 }
 0x1ca   :  { %v882_v12 = vmul.f32 0.0009765625, %v880_v11 }
 0x1cc   :  { %v883_v13 = vsub.f32 %v743_v51, %v882_v12  ;;  %v884_v14 = vsub.f32 %v745_v53, %v882_v12  ;;  %v885_v15 = vsub.f32 %v784_v55, %v882_v12  ;;  %v886_v16 = vsub.f32 %v786_v56, %v882_v12 }
 0x1cd   :  { %v887_v19 = vsub.f32 %v825_v59, %v882_v12  ;;  %v888_v52 = vsub.f32 %v827_v0, %v882_v12  ;;  %v889_v25 = vsub.f32 %v866_v3, %v882_v12  ;;  %v890_v28 = vsub.f32 %v868_v6, %v882_v12 }
 0x1ce   :  { %v891_v17 = vmul.f32 %v883_v13, %v883_v13  ;;  %v892_v18 = vmul.f32 %v884_v14, %v884_v14  ;;  %v893_v20 = vmul.f32 %v885_v15, %v885_v15  ;;  %v894_v23 = vmul.f32 %v886_v16, %v886_v16 }
 0x1cf   :  { %v895_v26 = vmul.f32 %v887_v19, %v887_v19  ;;  %v896_v29 = vmul.f32 %v888_v52, %v888_v52  ;;  %v897_v31 = vmul.f32 %v889_v25, %v889_v25  ;;  %v898_v33 = vmul.f32 %v890_v28, %v890_v28 }
 0x1d0   :  { %v899_v21 = vadd.f32 %v892_v18, %v891_v17 }
 0x1d2   :  { %v900_v24 = vadd.f32 %v899_v21, %v893_v20 }
 0x1d4   :  { %v901_v27 = vadd.f32 %v900_v24, %v894_v23 }
 0x1d6   :  { %v902_v30 = vadd.f32 %v901_v27, %v895_v26 }
 0x1d8   :  { %v903_v32 = vadd.f32 %v902_v30, %v896_v29 }
 0x1da   :  { %v904_v34 = vadd.f32 %v903_v32, %v897_v31 }
 0x1dc   :  { %v905_v35 = vadd.f32 %v904_v34, %v898_v33 }
 0x1de   :  { %906 = vadd.xlane.f32.xlu1 %v905_v35 }
 0x1ef   :  { %932 = vperm.xlu1 %1146, %v1334_v22   ;;  %v954_v22 = vld [vmem:[%s1580_s3 + $0x18] sm:$0xff] }
 0x1f0   :  { %v961_v51 = vunpack.c.l.bf16 %v954_v22  ;;  %v962_v53 = vunpack.c.h.bf16 %v954_v22 }
 0x267   :  { %v907_v37 = vpop.xlane.xlu1 %906 }
 0x268   :  { %v908_v38 = vmul.f32 0.0009765625, %v907_v37 }
 0x26a   :  { %v909_v39 = vadd.f32 1e-05, %v908_v38 }
 0x26b   :  { %v933_v61 = vpop.permute.xlu1 %932 }
 0x26c   :  { %1158 = vrsqrt.f32 %v909_v39 }
 0x279   :  { %v1159_v47 = vpop.eup %1158 }
 0x27a   :  { %v911_v54 = vmul.f32 %v1159_v47, %v883_v13  ;;  %v912_v55 = vmul.f32 %v1159_v47, %v884_v14  ;;  %v913_v56 = vmul.f32 %v1159_v47, %v885_v15  ;;  %v914_v57 = vmul.f32 %v1159_v47, %v886_v16 }
 0x27b   :  { %v915_v62 = vmul.f32 %v1159_v47, %v887_v19  ;;  %v916_v58 = vmul.f32 %v1159_v47, %v888_v52  ;;  %v917_v59 = vmul.f32 %v1159_v47, %v889_v25  ;;  %v918_v60 = vmul.f32 %v1159_v47, %v890_v28 }
 0x27c   :  { %v923_v63 = vmul.f32 %v921_v36, %v911_v54  ;;  %v924_v0 = vmul.f32 %v921_v36, %v912_v55  ;;  %v925_v1 = vmul.f32 %v921_v36, %v913_v56  ;;  %v926_v2 = vmul.f32 %v921_v36, %v914_v57 }
 0x27d   :  { %v927_v3 = vmul.f32 %v921_v36, %v915_v62  ;;  %v928_v4 = vmul.f32 %v921_v36, %v916_v58  ;;  %v929_v49 = vmul.f32 %v921_v36, %v917_v59  ;;  %v930_v5 = vmul.f32 %v921_v36, %v918_v60 }
 0x27e   :  { %v935_v6 = vadd.f32 %v933_v61, %v923_v63  ;;  %v936_v7 = vadd.f32 %v933_v61, %v924_v0  ;;  %v937_v8 = vadd.f32 %v933_v61, %v925_v1  ;;  %v938_v9 = vadd.f32 %v933_v61, %v926_v2 }
 0x27f   :  { %v939_v10 = vadd.f32 %v933_v61, %v927_v3  ;;  %v940_v11 = vadd.f32 %v933_v61, %v928_v4  ;;  %v941_v12 = vadd.f32 %v933_v61, %v929_v49  ;;  %v942_v13 = vadd.f32 %v933_v61, %v930_v5 }
 0x280   :  { %v943_v14 = vmax.f32 %v935_v6, 0.0  ;;  %v944_v15 = vmax.f32 %v936_v7, 0.0  ;;  %v945_v16 = vmax.f32 %v937_v8, 0.0  ;;  %v946_v17 = vmax.f32 %v938_v9, 0.0 }
 0x281   :  { %v947_v18 = vmax.f32 %v939_v10, 0.0  ;;  %v948_v19 = vmax.f32 %v940_v11, 0.0  ;;  %v949_v20 = vmax.f32 %v941_v12, 0.0  ;;  %v950_v21 = vmax.f32 %v942_v13, 0.0 }
 0x282   :  { %v963_v52 = vadd.f32 %v955_v43, %v943_v14  ;;  %v964_v23 = vadd.f32 %v956_v44, %v944_v15  ;;  %v965_v24 = vadd.f32 %v957_v45, %v945_v16  ;;  %v966_v25 = vadd.f32 %v958_v46, %v946_v17 }
 0x283   :  { %v967_v26 = vadd.f32 %v959_v48, %v947_v18  ;;  %v968_v27 = vadd.f32 %v960_v50, %v948_v19  ;;  %v969_v28 = vadd.f32 %v961_v51, %v949_v20  ;;  %v970_v29 = vadd.f32 %v962_v53, %v950_v21 }
 0x284   :  { %v1137_v30 = vpack.c.bf16 %v964_v23, %v963_v52  ;;  %v1138_v31 = vpack.c.bf16 %v966_v25, %v965_v24 }
 0x285   :  { %v1139_v32 = vpack.c.bf16 %v968_v27, %v967_v26  ;;  %v1140_v33 = vpack.c.bf16 %v970_v29, %v969_v28 }
 0x286   :  { %1003 = vst [vmem:[%s1581_s4] sm:$0xff] %v1137_v30  ;;  %1004 = vst [vmem:[%s1581_s4 + $0x8] sm:$0xff] %v1138_v31 }
 0x287   :  { %1005 = vst [vmem:[%s1581_s4 + $0x10] sm:$0xff] %v1139_v32  ;;  %1006 = vst [vmem:[%s1581_s4 + $0x18] sm:$0xff] %v1140_v33 }

</bundles_post_ra>
